<compile_context>
chip_gen: v7x
topology: tpu7x:2x2x1
jax: 0.10.0
libtpu: 0.0.40
codegen_flags: <defaults>
</compile_context>

<pallas_src>
import jax
import jax.numpy as jnp
from jax.experimental import pallas as pl
from jax.experimental.pallas import tpu as pltpu

# Layer sizes of the autoencoder (in -> out for each nn.Linear, in order).
LAYER_DIMS = [
    (640, 320),  # encoder_hidden_layer_1
    (320, 160),  # encoder_hidden_layer_2
    (160, 80),   # encoder_hidden_layer_3
    (80, 2),     # encoder_output_layer
    (2, 80),     # decoder_hidden_layer_0
    (80, 160),   # decoder_hidden_layer_1
    (160, 320),  # decoder_hidden_layer_2
    (320, 640),  # decoder_output_layer
    (640, 2),    # fc (no ReLU after this one)
]
NUM_LAYERS = len(LAYER_DIMS)


def _round_up(n, m):
    return ((n + m - 1) // m) * m


# Feature dims zero-padded to lane width (128) for lane-dense vregs / stores.
PADDED_DIMS = [(_round_up(i, 128), _round_up(o, 128)) for (i, o) in LAYER_DIMS]
IN_PAD = PADDED_DIMS[0][0]     # 640
OUT_PAD = PADDED_DIMS[-1][1]   # 128 (real out dim is 2)

# Static lane-aligned offsets of each layer's bias inside the packed bias buf.
BIAS_OFFSETS = []
_off = 0
for (_, _out_p) in PADDED_DIMS:
    BIAS_OFFSETS.append(_off)
    _off += _out_p
TOTAL_BIAS_PAD = _off          # 2560 (multiple of 128)


def _num_tensorcores():
    """Best-effort number of TensorCores per JAX device (2 on v7x/megacore)."""
    try:
        kind = (getattr(jax.devices()[0], "device_kind", "") or "").lower()
        if "v7" in kind:
            return 2
        if "v4" in kind or "v5p" in kind:
            return 2
    except Exception:
        pass
    return 1


def _autoencoder_kernel(x_ref, *refs):
    """Fused 9-layer MLP kernel for one batch tile.

    refs = (w0..w8, bias_pack, out_ref)
      wK:        bf16 [in_pad_K, out_pad_K] (pre-transposed, zero-padded)
      bias_pack: f32  [1, TOTAL_BIAS_PAD]   (all biases, zero-padded, packed)
    bf16 MXU operands, f32 accumulation; ReLU after every layer but the last.
    """
    w_refs = refs[:NUM_LAYERS]
    b_ref = refs[NUM_LAYERS]
    out_ref = refs[NUM_LAYERS + 1]

    h = x_ref[...].astype(jnp.bfloat16)   # no-op if input is already bf16
    for layer in range(NUM_LAYERS):
        out_p = PADDED_DIMS[layer][1]
        off = BIAS_OFFSETS[layer]
        w = w_refs[layer][...]                       # bf16 [in_p, out_p]
        b = b_ref[:, off:off + out_p]                # f32  [1, out_p] (static slice)
        acc = jnp.dot(h, w, preferred_element_type=jnp.float32) + b
        if layer < NUM_LAYERS - 1:
            h = jnp.maximum(acc, 0.0).astype(jnp.bfloat16)
        else:
            out_ref[...] = acc.astype(out_ref.dtype)


def prepare_params(params):
    """One-time packing of PyTorch-convention params for the kernel.

    params: list of (W [out, in], b [out]) per layer.
    Returns (weights_bf16_tuple, bias_pack_f32) where each weight is
    transposed+zero-padded to [in_pad, out_pad] bf16 and all biases are packed
    into a single (1, TOTAL_BIAS_PAD) f32 buffer.
    """
    weights = []
    bias_parts = []
    for (w, b), (in_p, out_p) in zip(params, PADDED_DIMS):
        w = jnp.asarray(w, jnp.float32)              # [out, in]
        b = jnp.asarray(b, jnp.float32).reshape(-1)  # [out]
        wt = jnp.zeros((in_p, out_p), jnp.float32)
        wt = wt.at[: w.shape[1], : w.shape[0]].set(w.T)
        weights.append(wt.astype(jnp.bfloat16))
        bias_parts.append(jnp.zeros((out_p,), jnp.float32).at[: b.shape[0]].set(b))
    bias_pack = jnp.concatenate(bias_parts).reshape(1, TOTAL_BIAS_PAD)
    return tuple(weights), bias_pack


def autoencoder_forward(x, prepared_params, *, tm=512, out_dtype=jnp.float32):
    """Fused autoencoder forward pass.

    x:               [..., 640]; flattened to [B, 640] like x.view(-1, 640).
                     bf16 inputs are streamed as bf16 (halved input DMA);
                     anything else is kept as f32 and cast inside the kernel.
    prepared_params: output of prepare_params(params) (call once, reuse).
    out_dtype:       kernel store dtype (pass jnp.bfloat16 to halve output
                     traffic if the consumer tolerates it).
    returns [B, 2] in out_dtype.
    """
    weights, bias_pack = prepared_params

    x2d = x.reshape(-1, LAYER_DIMS[0][0])
    if x2d.dtype != jnp.bfloat16:
        x2d = x2d.astype(jnp.float32)
    B = x2d.shape[0]

    # Chip-aware batch tile: one big tile on single-TC chips (v5e/v6e); split
    # into >= num_tc grid steps on multi-TC chips (v7x) so the "parallel" axis
    # can shard work across TensorCores.
    n_tc = _num_tensorcores()
    tm_eff = min(_round_up(tm, 8), _round_up(B, 8))
    if n_tc > 1 and B >= 16 and B < n_tc * tm_eff:
        tm_eff = _round_up(pl.cdiv(B, n_tc), 8)
    tm_eff = max(8, tm_eff)

    B_pad = _round_up(B, tm_eff)
    if B_pad != B:
        x2d = jnp.pad(x2d, ((0, B_pad - B), (0, 0)))
    grid = (B_pad // tm_eff,)

    def _run(single_buffer_weights):
        # Grid-invariant weights/biases: resident in VMEM across grid steps;
        # single buffering avoids a second never-refreshed copy.
        if single_buffer_weights:
            resident_kwargs = dict(pipeline_mode=pl.Buffered(1))
        else:
            resident_kwargs = {}
        in_specs = [pl.BlockSpec((tm_eff, IN_PAD), lambda i: (i, 0))]
        for (in_p, out_p) in PADDED_DIMS:
            in_specs.append(
                pl.BlockSpec((in_p, out_p), lambda i: (0, 0), **resident_kwargs))
        in_specs.append(
            pl.BlockSpec((1, TOTAL_BIAS_PAD), lambda i: (0, 0), **resident_kwargs))

        return pl.pallas_call(
            _autoencoder_kernel,
            out_shape=jax.ShapeDtypeStruct((B_pad, OUT_PAD), out_dtype),
            grid_spec=pltpu.PrefetchScalarGridSpec(
                num_scalar_prefetch=0,
                grid=grid,
                in_specs=in_specs,
                out_specs=pl.BlockSpec((tm_eff, OUT_PAD), lambda i: (i, 0)),
            ),
            compiler_params=pltpu.CompilerParams(
                dimension_semantics=("parallel",),
            ),
        )(x2d, *weights, bias_pack)

    try:
        out_padded = _run(True)
    except Exception:
        # Fallback if this JAX version rejects pipeline_mode / Buffered(1).
        out_padded = _run(False)

    # Drop the batch and lane padding: real output is [B, 2].
    return out_padded[:B, : LAYER_DIMS[-1][1]]


def init_params(key):
    """Deterministic parameter init mimicking nn.Linear defaults
    (uniform in [-1/sqrt(fan_in), 1/sqrt(fan_in)])."""
    params = []
    for (fan_in, fan_out) in LAYER_DIMS:
        key, kw, kb = jax.random.split(key, 3)
        bound = 1.0 / jnp.sqrt(fan_in)
        w = jax.random.uniform(kw, (fan_out, fan_in), jnp.float32, -bound, bound)
        b = jax.random.uniform(kb, (fan_out,), jnp.float32, -bound, bound)
        params.append((w, b))
    return params


def reference_forward_f32(x, params):
    """Plain-JAX f32 reference (matches the PyTorch module semantics)."""
    h = x.reshape(-1, 640).astype(jnp.float32)
    for i, (w, b) in enumerate(params):
        h = h @ w.T + b
        if i < NUM_LAYERS - 1:
            h = jnp.maximum(h, 0.0)
    return h


def reference_forward_bf16(x, params):
    """Plain-JAX reference using the same bf16-operand / f32-accumulate math
    as the kernel (for a tight correctness check)."""
    h = x.reshape(-1, 640).astype(jnp.bfloat16)
    out = None
    for i, (w, b) in enumerate(params):
        wt = jnp.asarray(w, jnp.float32).T.astype(jnp.bfloat16)
        acc = jnp.dot(h, wt, preferred_element_type=jnp.float32) + jnp.asarray(b, jnp.float32)
        if i < NUM_LAYERS - 1:
            h = jnp.maximum(acc, 0.0).astype(jnp.bfloat16)
        else:
            out = acc
    return out


if __name__ == "__main__":
    key = jax.random.PRNGKey(0)
    kx, kp = jax.random.split(key)

    # Small batch; x.view(-1, 640) collapses leading dims.
    x = jax.random.normal(kx, (16, 640), jnp.float32)
    params = init_params(kp)

    # One-time weight packing (hoisted out of the per-call hot path).
    prepared = prepare_params(params)

    out = autoencoder_forward(x, prepared, tm=512)
    out = jax.block_until_ready(out)
    assert out.shape == (16, 2), out.shape

    # Tight check against a reference that uses identical bf16/f32 math.
    ref_bf16 = reference_forward_bf16(x, params)
    assert jnp.allclose(out, ref_bf16, atol=1e-2, rtol=1e-2), "mismatch vs bf16 reference"

    # Loose check against the exact f32 module semantics (bf16 MXU operands
    # introduce ~1% error through the 9-layer chain).
    ref_f32 = reference_forward_f32(x, params)
    assert jnp.allclose(out, ref_f32, atol=0.15, rtol=0.15), "mismatch vs f32 reference"

    # Exercise the bf16-input fast path (halved input DMA); sanity check only.
    out_bf16_in = autoencoder_forward(x.astype(jnp.bfloat16), prepared, tm=512)
    out_bf16_in = jax.block_until_ready(out_bf16_in)
    assert out_bf16_in.shape == (16, 2), out_bf16_in.shape
    assert bool(jnp.all(jnp.isfinite(out_bf16_in))), "non-finite output on bf16 input path"

    print("KERNEL_OK")
</pallas_src>

<mosaic_0001>
module attributes {stable_mosaic.version = 11 : i64} {
  func.func @_autoencoder_kernel(%arg0: i32, %arg1: memref<16x640xf32, #tpu.memory_space<vmem>>, %arg2: memref<640x384xbf16, #tpu.memory_space<vmem>>, %arg3: memref<384x256xbf16, #tpu.memory_space<vmem>>, %arg4: memref<256x128xbf16, #tpu.memory_space<vmem>>, %arg5: memref<128x128xbf16, #tpu.memory_space<vmem>>, %arg6: memref<128x128xbf16, #tpu.memory_space<vmem>>, %arg7: memref<128x256xbf16, #tpu.memory_space<vmem>>, %arg8: memref<256x384xbf16, #tpu.memory_space<vmem>>, %arg9: memref<384x640xbf16, #tpu.memory_space<vmem>>, %arg10: memref<640x128xbf16, #tpu.memory_space<vmem>>, %arg11: memref<1x2432xf32, #tpu.memory_space<vmem>>, %arg12: memref<16x128xf32, #tpu.memory_space<vmem>>) attributes {dimension_semantics = [#tpu.dimension_semantics<parallel>], iteration_bounds = array<i64: 1>, scalar_prefetch = 0 : i64, scratch_operands = 0 : i64, tpu.core_type = #tpu.core_type<tc>, window_params = [{transform_indices = @transform_0, window_bounds = array<i64: 16, 640>}, {pipeline_mode = #tpu.pipeline_mode<synchronous>, transform_indices = @transform_1, window_bounds = array<i64: 640, 384>}, {pipeline_mode = #tpu.pipeline_mode<synchronous>, transform_indices = @transform_2, window_bounds = array<i64: 384, 256>}, {pipeline_mode = #tpu.pipeline_mode<synchronous>, transform_indices = @transform_3, window_bounds = array<i64: 256, 128>}, {pipeline_mode = #tpu.pipeline_mode<synchronous>, transform_indices = @transform_4, window_bounds = array<i64: 128, 128>}, {pipeline_mode = #tpu.pipeline_mode<synchronous>, transform_indices = @transform_5, window_bounds = array<i64: 128, 128>}, {pipeline_mode = #tpu.pipeline_mode<synchronous>, transform_indices = @transform_6, window_bounds = array<i64: 128, 256>}, {pipeline_mode = #tpu.pipeline_mode<synchronous>, transform_indices = @transform_7, window_bounds = array<i64: 256, 384>}, {pipeline_mode = #tpu.pipeline_mode<synchronous>, transform_indices = @transform_8, window_bounds = array<i64: 384, 640>}, {pipeline_mode = #tpu.pipeline_mode<synchronous>, transform_indices = @transform_9, window_bounds = array<i64: 640, 128>}, {pipeline_mode = #tpu.pipeline_mode<synchronous>, transform_indices = @transform_10, window_bounds = array<i64: 1, 2432>}, {transform_indices = @transform_11, window_bounds = array<i64: 16, 128>}]} {
    %c0 = arith.constant 0 : index
    %c0_0 = arith.constant 0 : index
    %0 = vector.load %arg1[%c0, %c0_0] : memref<16x640xf32, #tpu.memory_space<vmem>>, vector<16x640xf32>
    %1 = arith.truncf %0 : vector<16x640xf32> to vector<16x640xbf16>
    %c0_1 = arith.constant 0 : index
    %c0_2 = arith.constant 0 : index
    %2 = vector.load %arg2[%c0_1, %c0_2] : memref<640x384xbf16, #tpu.memory_space<vmem>>, vector<640x384xbf16>
    %c0_3 = arith.constant 0 : index
    %c0_4 = arith.constant 0 : index
    %3 = vector.load %arg11[%c0_3, %c0_4] : memref<1x2432xf32, #tpu.memory_space<vmem>>, vector<1x384xf32>
    %cst = arith.constant dense<0.000000e+00> : vector<16x384xf32>
    %4 = tpu.matmul %1, %2, %cst {dimension_numbers = #tpu.dot_dimension_numbers<[1], [0], [0], [1], [0, 0, 1, 1], [], []>} : vector<16x640xbf16>, vector<640x384xbf16>, vector<16x384xf32> -> vector<16x384xf32>
    %5 = vector.broadcast %3 : vector<1x384xf32> to vector<16x384xf32>
    %6 = arith.addf %4, %5 : vector<16x384xf32>
    %cst_5 = arith.constant 0.000000e+00 : f32
    %7 = vector.broadcast %cst_5 : f32 to vector<16x384xf32>
    %8 = arith.maximumf %6, %7 : vector<16x384xf32>
    %9 = arith.truncf %8 : vector<16x384xf32> to vector<16x384xbf16>
    %c0_6 = arith.constant 0 : index
    %c0_7 = arith.constant 0 : index
    %10 = vector.load %arg3[%c0_6, %c0_7] : memref<384x256xbf16, #tpu.memory_space<vmem>>, vector<384x256xbf16>
    %c0_8 = arith.constant 0 : index
    %c384 = arith.constant 384 : index
    %11 = vector.load %arg11[%c0_8, %c384] : memref<1x2432xf32, #tpu.memory_space<vmem>>, vector<1x256xf32>
    %cst_9 = arith.constant dense<0.000000e+00> : vector<16x256xf32>
    %12 = tpu.matmul %9, %10, %cst_9 {dimension_numbers = #tpu.dot_dimension_numbers<[1], [0], [0], [1], [0, 0, 1, 1], [], []>} : vector<16x384xbf16>, vector<384x256xbf16>, vector<16x256xf32> -> vector<16x256xf32>
    %13 = vector.broadcast %11 : vector<1x256xf32> to vector<16x256xf32>
    %14 = arith.addf %12, %13 : vector<16x256xf32>
    %cst_10 = arith.constant 0.000000e+00 : f32
    %15 = vector.broadcast %cst_10 : f32 to vector<16x256xf32>
    %16 = arith.maximumf %14, %15 : vector<16x256xf32>
    %17 = arith.truncf %16 : vector<16x256xf32> to vector<16x256xbf16>
    %c0_11 = arith.constant 0 : index
    %c0_12 = arith.constant 0 : index
    %18 = vector.load %arg4[%c0_11, %c0_12] : memref<256x128xbf16, #tpu.memory_space<vmem>>, vector<256x128xbf16>
    %c0_13 = arith.constant 0 : index
    %c640 = arith.constant 640 : index
    %19 = vector.load %arg11[%c0_13, %c640] : memref<1x2432xf32, #tpu.memory_space<vmem>>, vector<1x128xf32>
    %cst_14 = arith.constant dense<0.000000e+00> : vector<16x128xf32>
    %20 = tpu.matmul %17, %18, %cst_14 {dimension_numbers = #tpu.dot_dimension_numbers<[1], [0], [0], [1], [0, 0, 1, 1], [], []>} : vector<16x256xbf16>, vector<256x128xbf16>, vector<16x128xf32> -> vector<16x128xf32>
    %21 = vector.broadcast %19 : vector<1x128xf32> to vector<16x128xf32>
    %22 = arith.addf %20, %21 : vector<16x128xf32>
    %cst_15 = arith.constant 0.000000e+00 : f32
    %23 = vector.broadcast %cst_15 : f32 to vector<16x128xf32>
    %24 = arith.maximumf %22, %23 : vector<16x128xf32>
    %25 = arith.truncf %24 : vector<16x128xf32> to vector<16x128xbf16>
    %c0_16 = arith.constant 0 : index
    %c0_17 = arith.constant 0 : index
    %26 = vector.load %arg5[%c0_16, %c0_17] : memref<128x128xbf16, #tpu.memory_space<vmem>>, vector<128x128xbf16>
    %c0_18 = arith.constant 0 : index
    %c768 = arith.constant 768 : index
    %27 = vector.load %arg11[%c0_18, %c768] : memref<1x2432xf32, #tpu.memory_space<vmem>>, vector<1x128xf32>
    %cst_19 = arith.constant dense<0.000000e+00> : vector<16x128xf32>
    %28 = tpu.matmul %25, %26, %cst_19 {dimension_numbers = #tpu.dot_dimension_numbers<[1], [0], [0], [1], [0, 0, 1, 1], [], []>} : vector<16x128xbf16>, vector<128x128xbf16>, vector<16x128xf32> -> vector<16x128xf32>
    %29 = vector.broadcast %27 : vector<1x128xf32> to vector<16x128xf32>
    %30 = arith.addf %28, %29 : vector<16x128xf32>
    %cst_20 = arith.constant 0.000000e+00 : f32
    %31 = vector.broadcast %cst_20 : f32 to vector<16x128xf32>
    %32 = arith.maximumf %30, %31 : vector<16x128xf32>
    %33 = arith.truncf %32 : vector<16x128xf32> to vector<16x128xbf16>
    %c0_21 = arith.constant 0 : index
    %c0_22 = arith.constant 0 : index
    %34 = vector.load %arg6[%c0_21, %c0_22] : memref<128x128xbf16, #tpu.memory_space<vmem>>, vector<128x128xbf16>
    %c0_23 = arith.constant 0 : index
    %c896 = arith.constant 896 : index
    %35 = vector.load %arg11[%c0_23, %c896] : memref<1x2432xf32, #tpu.memory_space<vmem>>, vector<1x128xf32>
    %cst_24 = arith.constant dense<0.000000e+00> : vector<16x128xf32>
    %36 = tpu.matmul %33, %34, %cst_24 {dimension_numbers = #tpu.dot_dimension_numbers<[1], [0], [0], [1], [0, 0, 1, 1], [], []>} : vector<16x128xbf16>, vector<128x128xbf16>, vector<16x128xf32> -> vector<16x128xf32>
    %37 = vector.broadcast %35 : vector<1x128xf32> to vector<16x128xf32>
    %38 = arith.addf %36, %37 : vector<16x128xf32>
    %cst_25 = arith.constant 0.000000e+00 : f32
    %39 = vector.broadcast %cst_25 : f32 to vector<16x128xf32>
    %40 = arith.maximumf %38, %39 : vector<16x128xf32>
    %41 = arith.truncf %40 : vector<16x128xf32> to vector<16x128xbf16>
    %c0_26 = arith.constant 0 : index
    %c0_27 = arith.constant 0 : index
    %42 = vector.load %arg7[%c0_26, %c0_27] : memref<128x256xbf16, #tpu.memory_space<vmem>>, vector<128x256xbf16>
    %c0_28 = arith.constant 0 : index
    %c1024 = arith.constant 1024 : index
    %43 = vector.load %arg11[%c0_28, %c1024] : memref<1x2432xf32, #tpu.memory_space<vmem>>, vector<1x256xf32>
    %cst_29 = arith.constant dense<0.000000e+00> : vector<16x256xf32>
    %44 = tpu.matmul %41, %42, %cst_29 {dimension_numbers = #tpu.dot_dimension_numbers<[1], [0], [0], [1], [0, 0, 1, 1], [], []>} : vector<16x128xbf16>, vector<128x256xbf16>, vector<16x256xf32> -> vector<16x256xf32>
    %45 = vector.broadcast %43 : vector<1x256xf32> to vector<16x256xf32>
    %46 = arith.addf %44, %45 : vector<16x256xf32>
    %cst_30 = arith.constant 0.000000e+00 : f32
    %47 = vector.broadcast %cst_30 : f32 to vector<16x256xf32>
    %48 = arith.maximumf %46, %47 : vector<16x256xf32>
    %49 = arith.truncf %48 : vector<16x256xf32> to vector<16x256xbf16>
    %c0_31 = arith.constant 0 : index
    %c0_32 = arith.constant 0 : index
    %50 = vector.load %arg8[%c0_31, %c0_32] : memref<256x384xbf16, #tpu.memory_space<vmem>>, vector<256x384xbf16>
    %c0_33 = arith.constant 0 : index
    %c1280 = arith.constant 1280 : index
    %51 = vector.load %arg11[%c0_33, %c1280] : memref<1x2432xf32, #tpu.memory_space<vmem>>, vector<1x384xf32>
    %cst_34 = arith.constant dense<0.000000e+00> : vector<16x384xf32>
    %52 = tpu.matmul %49, %50, %cst_34 {dimension_numbers = #tpu.dot_dimension_numbers<[1], [0], [0], [1], [0, 0, 1, 1], [], []>} : vector<16x256xbf16>, vector<256x384xbf16>, vector<16x384xf32> -> vector<16x384xf32>
    %53 = vector.broadcast %51 : vector<1x384xf32> to vector<16x384xf32>
    %54 = arith.addf %52, %53 : vector<16x384xf32>
    %cst_35 = arith.constant 0.000000e+00 : f32
    %55 = vector.broadcast %cst_35 : f32 to vector<16x384xf32>
    %56 = arith.maximumf %54, %55 : vector<16x384xf32>
    %57 = arith.truncf %56 : vector<16x384xf32> to vector<16x384xbf16>
    %c0_36 = arith.constant 0 : index
    %c0_37 = arith.constant 0 : index
    %58 = vector.load %arg9[%c0_36, %c0_37] : memref<384x640xbf16, #tpu.memory_space<vmem>>, vector<384x640xbf16>
    %c0_38 = arith.constant 0 : index
    %c1664 = arith.constant 1664 : index
    %59 = vector.load %arg11[%c0_38, %c1664] : memref<1x2432xf32, #tpu.memory_space<vmem>>, vector<1x640xf32>
    %cst_39 = arith.constant dense<0.000000e+00> : vector<16x640xf32>
    %60 = tpu.matmul %57, %58, %cst_39 {dimension_numbers = #tpu.dot_dimension_numbers<[1], [0], [0], [1], [0, 0, 1, 1], [], []>} : vector<16x384xbf16>, vector<384x640xbf16>, vector<16x640xf32> -> vector<16x640xf32>
    %61 = vector.broadcast %59 : vector<1x640xf32> to vector<16x640xf32>
    %62 = arith.addf %60, %61 : vector<16x640xf32>
    %cst_40 = arith.constant 0.000000e+00 : f32
    %63 = vector.broadcast %cst_40 : f32 to vector<16x640xf32>
    %64 = arith.maximumf %62, %63 : vector<16x640xf32>
    %65 = arith.truncf %64 : vector<16x640xf32> to vector<16x640xbf16>
    %c0_41 = arith.constant 0 : index
    %c0_42 = arith.constant 0 : index
    %66 = vector.load %arg10[%c0_41, %c0_42] : memref<640x128xbf16, #tpu.memory_space<vmem>>, vector<640x128xbf16>
    %c0_43 = arith.constant 0 : index
    %c2304 = arith.constant 2304 : index
    %67 = vector.load %arg11[%c0_43, %c2304] : memref<1x2432xf32, #tpu.memory_space<vmem>>, vector<1x128xf32>
    %cst_44 = arith.constant dense<0.000000e+00> : vector<16x128xf32>
    %68 = tpu.matmul %65, %66, %cst_44 {dimension_numbers = #tpu.dot_dimension_numbers<[1], [0], [0], [1], [0, 0, 1, 1], [], []>} : vector<16x640xbf16>, vector<640x128xbf16>, vector<16x128xf32> -> vector<16x128xf32>
    %69 = vector.broadcast %67 : vector<1x128xf32> to vector<16x128xf32>
    %70 = arith.addf %68, %69 : vector<16x128xf32>
    %c0_45 = arith.constant 0 : index
    %c0_46 = arith.constant 0 : index
    %71 = vector.load %arg12[%c0_45, %c0_46] : memref<16x128xf32, #tpu.memory_space<vmem>>, vector<16x128xf32>
    tpu.vector_store %arg12[%c0_45, %c0_46], %70 {strides = array<i32>} : memref<16x128xf32, #tpu.memory_space<vmem>>, vector<16x128xf32>,
    return
  }
  func.func @transform_0(%arg0: i32) -> (i32, i32) {
    %c0_i32 = arith.constant 0 : i32
    %c0_i32_0 = arith.constant 0 : i32
    return %arg0, %c0_i32 : i32, i32
  }
  func.func @transform_1(%arg0: i32) -> (i32, i32) {
    %c0_i32 = arith.constant 0 : i32
    %c0_i32_0 = arith.constant 0 : i32
    %c0_i32_1 = arith.constant 0 : i32
    return %c0_i32, %c0_i32_0 : i32, i32
  }
  func.func @transform_2(%arg0: i32) -> (i32, i32) {
    %c0_i32 = arith.constant 0 : i32
    %c0_i32_0 = arith.constant 0 : i32
    %c0_i32_1 = arith.constant 0 : i32
    return %c0_i32, %c0_i32_0 : i32, i32
  }
  func.func @transform_3(%arg0: i32) -> (i32, i32) {
    %c0_i32 = arith.constant 0 : i32
    %c0_i32_0 = arith.constant 0 : i32
    %c0_i32_1 = arith.constant 0 : i32
    return %c0_i32, %c0_i32_0 : i32, i32
  }
  func.func @transform_4(%arg0: i32) -> (i32, i32) {
    %c0_i32 = arith.constant 0 : i32
    %c0_i32_0 = arith.constant 0 : i32
    %c0_i32_1 = arith.constant 0 : i32
    return %c0_i32, %c0_i32_0 : i32, i32
  }
  func.func @transform_5(%arg0: i32) -> (i32, i32) {
    %c0_i32 = arith.constant 0 : i32
    %c0_i32_0 = arith.constant 0 : i32
    %c0_i32_1 = arith.constant 0 : i32
    return %c0_i32, %c0_i32_0 : i32, i32
  }
  func.func @transform_6(%arg0: i32) -> (i32, i32) {
    %c0_i32 = arith.constant 0 : i32
    %c0_i32_0 = arith.constant 0 : i32
    %c0_i32_1 = arith.constant 0 : i32
    return %c0_i32, %c0_i32_0 : i32, i32
  }
  func.func @transform_7(%arg0: i32) -> (i32, i32) {
    %c0_i32 = arith.constant 0 : i32
    %c0_i32_0 = arith.constant 0 : i32
    %c0_i32_1 = arith.constant 0 : i32
    return %c0_i32, %c0_i32_0 : i32, i32
  }
  func.func @transform_8(%arg0: i32) -> (i32, i32) {
    %c0_i32 = arith.constant 0 : i32
    %c0_i32_0 = arith.constant 0 : i32
    %c0_i32_1 = arith.constant 0 : i32
    return %c0_i32, %c0_i32_0 : i32, i32
  }
  func.func @transform_9(%arg0: i32) -> (i32, i32) {
    %c0_i32 = arith.constant 0 : i32
    %c0_i32_0 = arith.constant 0 : i32
    %c0_i32_1 = arith.constant 0 : i32
    return %c0_i32, %c0_i32_0 : i32, i32
  }
  func.func @transform_10(%arg0: i32) -> (i32, i32) {
    %c0_i32 = arith.constant 0 : i32
    %c0_i32_0 = arith.constant 0 : i32
    %c0_i32_1 = arith.constant 0 : i32
    return %c0_i32, %c0_i32_0 : i32, i32
  }
  func.func @transform_11(%arg0: i32) -> (i32, i32) {
    %c0_i32 = arith.constant 0 : i32
    %c0_i32_0 = arith.constant 0 : i32
    return %arg0, %c0_i32 : i32, i32
  }
}

module attributes {stable_mosaic.version = 11 : i64} {
  func.func @_autoencoder_kernel(%arg0: i32, %arg1: memref<16x640xf32, #tpu.memory_space<vmem>>, %arg2: memref<640x384xbf16, #tpu.memory_space<vmem>>, %arg3: memref<384x256xbf16, #tpu.memory_space<vmem>>, %arg4: memref<256x128xbf16, #tpu.memory_space<vmem>>, %arg5: memref<128x128xbf16, #tpu.memory_space<vmem>>, %arg6: memref<128x128xbf16, #tpu.memory_space<vmem>>, %arg7: memref<128x256xbf16, #tpu.memory_space<vmem>>, %arg8: memref<256x384xbf16, #tpu.memory_space<vmem>>, %arg9: memref<384x640xbf16, #tpu.memory_space<vmem>>, %arg10: memref<640x128xbf16, #tpu.memory_space<vmem>>, %arg11: memref<1x2432xf32, #tpu.memory_space<vmem>>, %arg12: memref<16x128xf32, #tpu.memory_space<vmem>>) attributes {dimension_semantics = [#tpu.dimension_semantics<parallel>], iteration_bounds = array<i64: 1>, scalar_prefetch = 0 : i64, scratch_operands = 0 : i64, tpu.core_type = #tpu.core_type<tc>, window_params = [{transform_indices = @transform_0, window_bounds = array<i64: 16, 640>}, {pipeline_mode = #tpu.pipeline_mode<synchronous>, transform_indices = @transform_1, window_bounds = array<i64: 640, 384>}, {pipeline_mode = #tpu.pipeline_mode<synchronous>, transform_indices = @transform_2, window_bounds = array<i64: 384, 256>}, {pipeline_mode = #tpu.pipeline_mode<synchronous>, transform_indices = @transform_3, window_bounds = array<i64: 256, 128>}, {pipeline_mode = #tpu.pipeline_mode<synchronous>, transform_indices = @transform_4, window_bounds = array<i64: 128, 128>}, {pipeline_mode = #tpu.pipeline_mode<synchronous>, transform_indices = @transform_5, window_bounds = array<i64: 128, 128>}, {pipeline_mode = #tpu.pipeline_mode<synchronous>, transform_indices = @transform_6, window_bounds = array<i64: 128, 256>}, {pipeline_mode = #tpu.pipeline_mode<synchronous>, transform_indices = @transform_7, window_bounds = array<i64: 256, 384>}, {pipeline_mode = #tpu.pipeline_mode<synchronous>, transform_indices = @transform_8, window_bounds = array<i64: 384, 640>}, {pipeline_mode = #tpu.pipeline_mode<synchronous>, transform_indices = @transform_9, window_bounds = array<i64: 640, 128>}, {pipeline_mode = #tpu.pipeline_mode<synchronous>, transform_indices = @transform_10, window_bounds = array<i64: 1, 2432>}, {transform_indices = @transform_11, window_bounds = array<i64: 16, 128>}]} {
    %c0 = arith.constant 0 : index
    %c0_0 = arith.constant 0 : index
    %0 = vector.load %arg1[%c0, %c0_0] : memref<16x640xf32, #tpu.memory_space<vmem>>, vector<16x640xf32>
    %1 = arith.truncf %0 : vector<16x640xf32> to vector<16x640xbf16>
    %c0_1 = arith.constant 0 : index
    %c0_2 = arith.constant 0 : index
    %2 = vector.load %arg2[%c0_1, %c0_2] : memref<640x384xbf16, #tpu.memory_space<vmem>>, vector<640x384xbf16>
    %c0_3 = arith.constant 0 : index
    %c0_4 = arith.constant 0 : index
    %3 = vector.load %arg11[%c0_3, %c0_4] : memref<1x2432xf32, #tpu.memory_space<vmem>>, vector<1x384xf32>
    %cst = arith.constant dense<0.000000e+00> : vector<16x384xf32>
    %4 = tpu.matmul %1, %2, %cst {dimension_numbers = #tpu.dot_dimension_numbers<[1], [0], [0], [1], [0, 0, 1, 1], [], []>} : vector<16x640xbf16>, vector<640x384xbf16>, vector<16x384xf32> -> vector<16x384xf32>
    %5 = vector.broadcast %3 : vector<1x384xf32> to vector<16x384xf32>
    %6 = arith.addf %4, %5 : vector<16x384xf32>
    %cst_5 = arith.constant 0.000000e+00 : f32
    %7 = vector.broadcast %cst_5 : f32 to vector<16x384xf32>
    %8 = arith.maximumf %6, %7 : vector<16x384xf32>
    %9 = arith.truncf %8 : vector<16x384xf32> to vector<16x384xbf16>
    %c0_6 = arith.constant 0 : index
    %c0_7 = arith.constant 0 : index
    %10 = vector.load %arg3[%c0_6, %c0_7] : memref<384x256xbf16, #tpu.memory_space<vmem>>, vector<384x256xbf16>
    %c0_8 = arith.constant 0 : index
    %c384 = arith.constant 384 : index
    %11 = vector.load %arg11[%c0_8, %c384] : memref<1x2432xf32, #tpu.memory_space<vmem>>, vector<1x256xf32>
    %cst_9 = arith.constant dense<0.000000e+00> : vector<16x256xf32>
    %12 = tpu.matmul %9, %10, %cst_9 {dimension_numbers = #tpu.dot_dimension_numbers<[1], [0], [0], [1], [0, 0, 1, 1], [], []>} : vector<16x384xbf16>, vector<384x256xbf16>, vector<16x256xf32> -> vector<16x256xf32>
    %13 = vector.broadcast %11 : vector<1x256xf32> to vector<16x256xf32>
    %14 = arith.addf %12, %13 : vector<16x256xf32>
    %cst_10 = arith.constant 0.000000e+00 : f32
    %15 = vector.broadcast %cst_10 : f32 to vector<16x256xf32>
    %16 = arith.maximumf %14, %15 : vector<16x256xf32>
    %17 = arith.truncf %16 : vector<16x256xf32> to vector<16x256xbf16>
    %c0_11 = arith.constant 0 : index
    %c0_12 = arith.constant 0 : index
    %18 = vector.load %arg4[%c0_11, %c0_12] : memref<256x128xbf16, #tpu.memory_space<vmem>>, vector<256x128xbf16>
    %c0_13 = arith.constant 0 : index
    %c640 = arith.constant 640 : index
    %19 = vector.load %arg11[%c0_13, %c640] : memref<1x2432xf32, #tpu.memory_space<vmem>>, vector<1x128xf32>
    %cst_14 = arith.constant dense<0.000000e+00> : vector<16x128xf32>
    %20 = tpu.matmul %17, %18, %cst_14 {dimension_numbers = #tpu.dot_dimension_numbers<[1], [0], [0], [1], [0, 0, 1, 1], [], []>} : vector<16x256xbf16>, vector<256x128xbf16>, vector<16x128xf32> -> vector<16x128xf32>
    %21 = vector.broadcast %19 : vector<1x128xf32> to vector<16x128xf32>
    %22 = arith.addf %20, %21 : vector<16x128xf32>
    %cst_15 = arith.constant 0.000000e+00 : f32
    %23 = vector.broadcast %cst_15 : f32 to vector<16x128xf32>
    %24 = arith.maximumf %22, %23 : vector<16x128xf32>
    %25 = arith.truncf %24 : vector<16x128xf32> to vector<16x128xbf16>
    %c0_16 = arith.constant 0 : index
    %c0_17 = arith.constant 0 : index
    %26 = vector.load %arg5[%c0_16, %c0_17] : memref<128x128xbf16, #tpu.memory_space<vmem>>, vector<128x128xbf16>
    %c0_18 = arith.constant 0 : index
    %c768 = arith.constant 768 : index
    %27 = vector.load %arg11[%c0_18, %c768] : memref<1x2432xf32, #tpu.memory_space<vmem>>, vector<1x128xf32>
    %cst_19 = arith.constant dense<0.000000e+00> : vector<16x128xf32>
    %28 = tpu.matmul %25, %26, %cst_19 {dimension_numbers = #tpu.dot_dimension_numbers<[1], [0], [0], [1], [0, 0, 1, 1], [], []>} : vector<16x128xbf16>, vector<128x128xbf16>, vector<16x128xf32> -> vector<16x128xf32>
    %29 = vector.broadcast %27 : vector<1x128xf32> to vector<16x128xf32>
    %30 = arith.addf %28, %29 : vector<16x128xf32>
    %cst_20 = arith.constant 0.000000e+00 : f32
    %31 = vector.broadcast %cst_20 : f32 to vector<16x128xf32>
    %32 = arith.maximumf %30, %31 : vector<16x128xf32>
    %33 = arith.truncf %32 : vector<16x128xf32> to vector<16x128xbf16>
    %c0_21 = arith.constant 0 : index
    %c0_22 = arith.constant 0 : index
    %34 = vector.load %arg6[%c0_21, %c0_22] : memref<128x128xbf16, #tpu.memory_space<vmem>>, vector<128x128xbf16>
    %c0_23 = arith.constant 0 : index
    %c896 = arith.constant 896 : index
    %35 = vector.load %arg11[%c0_23, %c896] : memref<1x2432xf32, #tpu.memory_space<vmem>>, vector<1x128xf32>
    %cst_24 = arith.constant dense<0.000000e+00> : vector<16x128xf32>
    %36 = tpu.matmul %33, %34, %cst_24 {dimension_numbers = #tpu.dot_dimension_numbers<[1], [0], [0], [1], [0, 0, 1, 1], [], []>} : vector<16x128xbf16>, vector<128x128xbf16>, vector<16x128xf32> -> vector<16x128xf32>
    %37 = vector.broadcast %35 : vector<1x128xf32> to vector<16x128xf32>
    %38 = arith.addf %36, %37 : vector<16x128xf32>
    %cst_25 = arith.constant 0.000000e+00 : f32
    %39 = vector.broadcast %cst_25 : f32 to vector<16x128xf32>
    %40 = arith.maximumf %38, %39 : vector<16x128xf32>
    %41 = arith.truncf %40 : vector<16x128xf32> to vector<16x128xbf16>
    %c0_26 = arith.constant 0 : index
    %c0_27 = arith.constant 0 : index
    %42 = vector.load %arg7[%c0_26, %c0_27] : memref<128x256xbf16, #tpu.memory_space<vmem>>, vector<128x256xbf16>
    %c0_28 = arith.constant 0 : index
    %c1024 = arith.constant 1024 : index
    %43 = vector.load %arg11[%c0_28, %c1024] : memref<1x2432xf32, #tpu.memory_space<vmem>>, vector<1x256xf32>
    %cst_29 = arith.constant dense<0.000000e+00> : vector<16x256xf32>
    %44 = tpu.matmul %41, %42, %cst_29 {dimension_numbers = #tpu.dot_dimension_numbers<[1], [0], [0], [1], [0, 0, 1, 1], [], []>} : vector<16x128xbf16>, vector<128x256xbf16>, vector<16x256xf32> -> vector<16x256xf32>
    %45 = vector.broadcast %43 : vector<1x256xf32> to vector<16x256xf32>
    %46 = arith.addf %44, %45 : vector<16x256xf32>
    %cst_30 = arith.constant 0.000000e+00 : f32
    %47 = vector.broadcast %cst_30 : f32 to vector<16x256xf32>
    %48 = arith.maximumf %46, %47 : vector<16x256xf32>
    %49 = arith.truncf %48 : vector<16x256xf32> to vector<16x256xbf16>
    %c0_31 = arith.constant 0 : index
    %c0_32 = arith.constant 0 : index
    %50 = vector.load %arg8[%c0_31, %c0_32] : memref<256x384xbf16, #tpu.memory_space<vmem>>, vector<256x384xbf16>
    %c0_33 = arith.constant 0 : index
    %c1280 = arith.constant 1280 : index
    %51 = vector.load %arg11[%c0_33, %c1280] : memref<1x2432xf32, #tpu.memory_space<vmem>>, vector<1x384xf32>
    %cst_34 = arith.constant dense<0.000000e+00> : vector<16x384xf32>
    %52 = tpu.matmul %49, %50, %cst_34 {dimension_numbers = #tpu.dot_dimension_numbers<[1], [0], [0], [1], [0, 0, 1, 1], [], []>} : vector<16x256xbf16>, vector<256x384xbf16>, vector<16x384xf32> -> vector<16x384xf32>
    %53 = vector.broadcast %51 : vector<1x384xf32> to vector<16x384xf32>
    %54 = arith.addf %52, %53 : vector<16x384xf32>
    %cst_35 = arith.constant 0.000000e+00 : f32
    %55 = vector.broadcast %cst_35 : f32 to vector<16x384xf32>
    %56 = arith.maximumf %54, %55 : vector<16x384xf32>
    %57 = arith.truncf %56 : vector<16x384xf32> to vector<16x384xbf16>
    %c0_36 = arith.constant 0 : index
    %c0_37 = arith.constant 0 : index
    %58 = vector.load %arg9[%c0_36, %c0_37] : memref<384x640xbf16, #tpu.memory_space<vmem>>, vector<384x640xbf16>
    %c0_38 = arith.constant 0 : index
    %c1664 = arith.constant 1664 : index
    %59 = vector.load %arg11[%c0_38, %c1664] : memref<1x2432xf32, #tpu.memory_space<vmem>>, vector<1x640xf32>
    %cst_39 = arith.constant dense<0.000000e+00> : vector<16x640xf32>
    %60 = tpu.matmul %57, %58, %cst_39 {dimension_numbers = #tpu.dot_dimension_numbers<[1], [0], [0], [1], [0, 0, 1, 1], [], []>} : vector<16x384xbf16>, vector<384x640xbf16>, vector<16x640xf32> -> vector<16x640xf32>
    %61 = vector.broadcast %59 : vector<1x640xf32> to vector<16x640xf32>
    %62 = arith.addf %60, %61 : vector<16x640xf32>
    %cst_40 = arith.constant 0.000000e+00 : f32
    %63 = vector.broadcast %cst_40 : f32 to vector<16x640xf32>
    %64 = arith.maximumf %62, %63 : vector<16x640xf32>
    %65 = arith.truncf %64 : vector<16x640xf32> to vector<16x640xbf16>
    %c0_41 = arith.constant 0 : index
    %c0_42 = arith.constant 0 : index
    %66 = vector.load %arg10[%c0_41, %c0_42] : memref<640x128xbf16, #tpu.memory_space<vmem>>, vector<640x128xbf16>
    %c0_43 = arith.constant 0 : index
    %c2304 = arith.constant 2304 : index
    %67 = vector.load %arg11[%c0_43, %c2304] : memref<1x2432xf32, #tpu.memory_space<vmem>>, vector<1x128xf32>
    %cst_44 = arith.constant dense<0.000000e+00> : vector<16x128xf32>
    %68 = tpu.matmul %65, %66, %cst_44 {dimension_numbers = #tpu.dot_dimension_numbers<[1], [0], [0], [1], [0, 0, 1, 1], [], []>} : vector<16x640xbf16>, vector<640x128xbf16>, vector<16x128xf32> -> vector<16x128xf32>
    %69 = vector.broadcast %67 : vector<1x128xf32> to vector<16x128xf32>
    %70 = arith.addf %68, %69 : vector<16x128xf32>
    %c0_45 = arith.constant 0 : index
    %c0_46 = arith.constant 0 : index
    %71 = vector.load %arg12[%c0_45, %c0_46] : memref<16x128xf32, #tpu.memory_space<vmem>>, vector<16x128xf32>
    tpu.vector_store %arg12[%c0_45, %c0_46], %70 {strides = array<i32>} : memref<16x128xf32, #tpu.memory_space<vmem>>, vector<16x128xf32>,
    return
  }
  func.func @transform_0(%arg0: i32) -> (i32, i32) {
    %c0_i32 = arith.constant 0 : i32
    %c0_i32_0 = arith.constant 0 : i32
    return %arg0, %c0_i32 : i32, i32
  }
  func.func @transform_1(%arg0: i32) -> (i32, i32) {
    %c0_i32 = arith.constant 0 : i32
    %c0_i32_0 = arith.constant 0 : i32
    %c0_i32_1 = arith.constant 0 : i32
    return %c0_i32, %c0_i32_0 : i32, i32
  }
  func.func @transform_2(%arg0: i32) -> (i32, i32) {
    %c0_i32 = arith.constant 0 : i32
    %c0_i32_0 = arith.constant 0 : i32
    %c0_i32_1 = arith.constant 0 : i32
    return %c0_i32, %c0_i32_0 : i32, i32
  }
  func.func @transform_3(%arg0: i32) -> (i32, i32) {
    %c0_i32 = arith.constant 0 : i32
    %c0_i32_0 = arith.constant 0 : i32
    %c0_i32_1 = arith.constant 0 : i32
    return %c0_i32, %c0_i32_0 : i32, i32
  }
  func.func @transform_4(%arg0: i32) -> (i32, i32) {
    %c0_i32 = arith.constant 0 : i32
    %c0_i32_0 = arith.constant 0 : i32
    %c0_i32_1 = arith.constant 0 : i32
    return %c0_i32, %c0_i32_0 : i32, i32
  }
  func.func @transform_5(%arg0: i32) -> (i32, i32) {
    %c0_i32 = arith.constant 0 : i32
    %c0_i32_0 = arith.constant 0 : i32
    %c0_i32_1 = arith.constant 0 : i32
    return %c0_i32, %c0_i32_0 : i32, i32
  }
  func.func @transform_6(%arg0: i32) -> (i32, i32) {
    %c0_i32 = arith.constant 0 : i32
    %c0_i32_0 = arith.constant 0 : i32
    %c0_i32_1 = arith.constant 0 : i32
    return %c0_i32, %c0_i32_0 : i32, i32
  }
  func.func @transform_7(%arg0: i32) -> (i32, i32) {
    %c0_i32 = arith.constant 0 : i32
    %c0_i32_0 = arith.constant 0 : i32
    %c0_i32_1 = arith.constant 0 : i32
    return %c0_i32, %c0_i32_0 : i32, i32
  }
  func.func @transform_8(%arg0: i32) -> (i32, i32) {
    %c0_i32 = arith.constant 0 : i32
    %c0_i32_0 = arith.constant 0 : i32
    %c0_i32_1 = arith.constant 0 : i32
    return %c0_i32, %c0_i32_0 : i32, i32
  }
  func.func @transform_9(%arg0: i32) -> (i32, i32) {
    %c0_i32 = arith.constant 0 : i32
    %c0_i32_0 = arith.constant 0 : i32
    %c0_i32_1 = arith.constant 0 : i32
    return %c0_i32, %c0_i32_0 : i32, i32
  }
  func.func @transform_10(%arg0: i32) -> (i32, i32) {
    %c0_i32 = arith.constant 0 : i32
    %c0_i32_0 = arith.constant 0 : i32
    %c0_i32_1 = arith.constant 0 : i32
    return %c0_i32, %c0_i32_0 : i32, i32
  }
  func.func @transform_11(%arg0: i32) -> (i32, i32) {
    %c0_i32 = arith.constant 0 : i32
    %c0_i32_0 = arith.constant 0 : i32
    return %arg0, %c0_i32 : i32, i32
  }
}

</mosaic_0001>

<bundles_post_ra>
// kernel: tpu_custom_call.1
= control target key start
LH: loop header
LB: loop body
LE: loop exit
PB: predicated region body
PF: predicated region fallthrough
CT: control target
= control target key end

     0   :  { %16 = vsyncpa [#allocation3], 0  ;;  %s6186_s0 = inlined_call_operand.hbm [shape: f32[16,640], index: 0, kind: input, shape index: {}]   ;;  %s6187_s1 = inlined_call_operand.hbm [shape: bf16[640,384], index: 1, kind: input, shape index: {}]   ;;  %s6188_s2 = inlined_call_operand.hbm [shape: bf16[384,256], index: 2, kind: input, shape index: {}]   ;;  %s6189_s3 = inlined_call_operand.hbm [shape: bf16[256,128], index: 3, kind: input, shape index: {}]   ;;  %s6190_s4 = inlined_call_operand.hbm [shape: bf16[128,128], index: 4, kind: input, shape index: {}]   ;;  %s6191_s5 = inlined_call_operand.hbm [shape: bf16[128,128], index: 5, kind: input, shape index: {}]   ;;  %s6192_s6 = inlined_call_operand.hbm [shape: bf16[128,256], index: 6, kind: input, shape index: {}]   ;;  %s6193_s7 = inlined_call_operand.hbm [shape: bf16[256,384], index: 7, kind: input, shape index: {}]   ;;  %s6194_s8 = inlined_call_operand.hbm [shape: bf16[384,640], index: 8, kind: input, shape index: {}]   ;;  %s6195_s9 = inlined_call_operand.hbm [shape: bf16[640,128], index: 9, kind: input, shape index: {}]   ;;  %s6196_s10 = inlined_call_operand.vmem [shape: f32[1,2432], index: 10, kind: input, shape index: {}]   ;;  %s6197_s11 = inlined_call_operand.hbm [shape: f32[16,128], index: 11, kind: output, shape index: {}]  }
   0x1   :  { %17 = vsyncpa [#allocation6], 0 }
   0x2   :  { %18 = vsyncpa [#allocation9], 0 }
   0x3   :  { %19 = vsyncpa [#allocation12], 0 }
   0x4   :  { %20 = vsyncpa [#allocation15], 0 }
   0x5   :  { %21 = vsyncpa [#allocation18], 0 }
   0x6   :  { %22 = vsyncpa [#allocation4], 0  ;;  %s5798_s17 = smov [#allocation5]   ;;  %s5542_s21 = scalar_lea.hbm %s6187_s1, 15360 }
   0x7   :  { %s40_s18 = sshll.u32 %s5798_s17, 4  ;;  %p5543_p0 = scmp.ne.s32.totalorder %s6187_s1, %s5542_s21  ;;  %s41_s18 = int_to_ptr.vmem [resolvable:$true] %s40_s18 }
   0x8   :  { %p5546_p1 = scmp.lt.u32.totalorder %s5542_s21, %s6187_s1 }
   0xa   :  { %p5548_p2 = pnand %p5546_p1, %p5543_p0 }
   0xc   :  { %5551 = shalt.err (!%p5548_p2)
}
   0xd   :  { %s5552_s26 = scalar_lea.vmem %s41_s18, 15360  ;;  %p5557_p4 = scmp.lt.s32.totalorder %s41_s18, %s41_s18 }
   0xe   :  { %p5553_p3 = scmp.ne.s32.totalorder %s41_s18, %s5552_s26  ;;  %p5558_p5 = scmp.lt.s32.totalorder %s5552_s26, %s5552_s26 }
  0x10   :  { %p5559_p6 = por %p5558_p5, %p5557_p4 }
  0x12   :  { %p5560_p7 = pnand %p5559_p6, %p5553_p3 }
  0x14   :  { %5563 = shalt.err (!%p5560_p7)
}
  0x15   :  { %s5799_s27 = smov 192   ;;  %s5800_s28 = smov 12  }
  0x16   :  { %46 = dma.hbm_to_vmem [thread:$0]  %s6187_s1, 15360, %s41_s18, [#allocation6], %s5799_s27, %s5799_s27, %s5800_s28  }
  0x17   :  { %s5801_s12 = smov [#allocation8]   ;;  %s5564_s16 = scalar_lea.hbm %s6189_s3, 2048 }
  0x18   :  { %s64_s13 = sshll.u32 %s5801_s12, 4  ;;  %p5565_p8 = scmp.ne.s32.totalorder %s6189_s3, %s5564_s16  ;;  %s65_s13 = int_to_ptr.vmem [resolvable:$true] %s64_s13 }
  0x19   :  { %p5568_p9 = scmp.lt.u32.totalorder %s5564_s16, %s6189_s3 }
  0x1b   :  { %p5570_p10 = pnand %p5568_p9, %p5565_p8 }
  0x1d   :  { %5573 = shalt.err (!%p5570_p10)
}
  0x1e   :  { %s5574_s22 = scalar_lea.vmem %s65_s13, 2048  ;;  %p5579_p12 = scmp.lt.s32.totalorder %s65_s13, %s65_s13 }
  0x1f   :  { %p5575_p11 = scmp.ne.s32.totalorder %s65_s13, %s5574_s22  ;;  %p5580_p13 = scmp.lt.s32.totalorder %s5574_s22, %s5574_s22 }
  0x21   :  { %p5581_p0 = por %p5580_p13, %p5579_p12 }
  0x23   :  { %p5582_p1 = pnand %p5581_p0, %p5575_p11 }
  0x25   :  { %5585 = shalt.err (!%p5582_p1)
}
  0x26   :  { %s5802_s1 = smov 64   ;;  %s5803_s18 = smov 4  }
  0x27   :  { %70 = dma.hbm_to_vmem [thread:$0]  %s6189_s3, 2048, %s65_s13, [#allocation9], %s5802_s1, %s5802_s1, %s5803_s18  }
  0x28   :  { %s5804_s25 = smov [#allocation11]   ;;  %s5805_s29 = smov [#allocation14]  }
  0x29   :  { %s88_s26 = sshll.u32 %s5804_s25, 4  ;;  %s112_s30 = sshll.u32 %s5805_s29, 4  ;;  %s89_s26 = int_to_ptr.vmem [resolvable:$true] %s88_s26  ;;  %s5912_s30 = int_to_ptr.vmem [resolvable:$true] %s112_s30 }
  0x2a   :  { %s5586_s15 = scalar_lea.hbm %s6191_s5, 1024 }
  0x2b   :  { %p5587_p2 = scmp.ne.s32.totalorder %s6191_s5, %s5586_s15  ;;  %p5590_p3 = scmp.lt.u32.totalorder %s5586_s15, %s6191_s5 }
  0x2d   :  { %p5592_p4 = pnand %p5590_p3, %p5587_p2 }
  0x2f   :  { %5595 = shalt.err (!%p5592_p4)
}
  0x30   :  { %s5596_s3 = scalar_lea.vmem %s89_s26, 1024  ;;  %p5601_p6 = scmp.lt.s32.totalorder %s89_s26, %s89_s26 }
  0x31   :  { %p5597_p5 = scmp.ne.s32.totalorder %s89_s26, %s5596_s3  ;;  %p5602_p7 = scmp.lt.s32.totalorder %s5596_s3, %s5596_s3 }
  0x33   :  { %p5603_p8 = por %p5602_p7, %p5601_p6 }
  0x35   :  { %p5604_p9 = pnand %p5603_p8, %p5597_p5 }
  0x37   :  { %5607 = shalt.err (!%p5604_p9)
}
  0x38   :  { %94 = dma.hbm_to_vmem [thread:$0]  %s6191_s5, 1024, %s89_s26, [#allocation12], %s5802_s1, %s5802_s1, %s5803_s18  }
  0x39   :  { %s5608_s24 = scalar_lea.hbm %s6193_s7, 6144 }
  0x3a   :  { %p5609_p10 = scmp.ne.s32.totalorder %s6193_s7, %s5608_s24  ;;  %p5612_p11 = scmp.lt.u32.totalorder %s5608_s24, %s6193_s7 }
  0x3c   :  { %p5614_p12 = pnand %p5612_p11, %p5609_p10 }
  0x3e   :  { %5617 = shalt.err (!%p5614_p12)
}
  0x3f   :  { %s5618_s15 = scalar_lea.vmem %s5912_s30, 6144  ;;  %p5623_p0 = scmp.lt.s32.totalorder %s5912_s30, %s5912_s30 }
  0x40   :  { %p5619_p13 = scmp.ne.s32.totalorder %s5912_s30, %s5618_s15  ;;  %p5624_p1 = scmp.lt.s32.totalorder %s5618_s15, %s5618_s15 }
  0x42   :  { %p5625_p2 = por %p5624_p1, %p5623_p0 }
  0x44   :  { %p5626_p3 = pnand %p5625_p2, %p5619_p13 }
  0x46   :  { %5629 = shalt.err (!%p5626_p3)
}
  0x47   :  { %118 = dma.hbm_to_vmem [thread:$0]  %s6193_s7, 6144, %s5912_s30, [#allocation15], %s5799_s27, %s5799_s27, %s5800_s28  }
  0x48   :  { %s5806_s16 = smov [#allocation2]   ;;  %s5630_s3 = scalar_lea.hbm %s6186_s0, 1280 }
  0x49   :  { %s28_s17 = sshll.u32 %s5806_s16, 4  ;;  %p5631_p4 = scmp.ne.s32.totalorder %s6186_s0, %s5630_s3  ;;  %s29_s17 = int_to_ptr.vmem [resolvable:$true] %s28_s17 }
  0x4a   :  { %p5634_p5 = scmp.lt.u32.totalorder %s5630_s3, %s6186_s0 }
  0x4c   :  { %p5636_p6 = pnand %p5634_p5, %p5631_p4 }
  0x4e   :  { %5639 = shalt.err (!%p5636_p6)
}
  0x4f   :  { %s5640_s24 = scalar_lea.vmem %s29_s17, 1280  ;;  %p5645_p8 = scmp.lt.s32.totalorder %s29_s17, %s29_s17 }
  0x50   :  { %p5641_p7 = scmp.ne.s32.totalorder %s29_s17, %s5640_s24  ;;  %p5646_p9 = scmp.lt.s32.totalorder %s5640_s24, %s5640_s24 }
  0x52   :  { %p5647_p10 = por %p5646_p9, %p5645_p8 }
  0x54   :  { %p5648_p11 = pnand %p5647_p10, %p5641_p7 }
  0x56   :  { %5651 = shalt.err (!%p5648_p11)
}
  0x57   :  { %s5807_s7 = smov 640   ;;  %s5808_s27 = smov 40  }
  0x58   :  { %34 = dma.hbm_to_vmem [thread:$0]  %s6186_s0, 1280, %s29_s17, [#allocation3], %s5807_s7, %s5807_s7, %s5808_s27  }
  0x59   :  { %s5809_s25 = smov [#allocation7]   ;;  %s5652_s15 = scalar_lea.hbm %s6188_s2, 6144 }
  0x5a   :  { %s52_s29 = sshll.u32 %s5809_s25, 4  ;;  %p5653_p12 = scmp.ne.s32.totalorder %s6188_s2, %s5652_s15  ;;  %s53_s29 = int_to_ptr.vmem [resolvable:$true] %s52_s29 }
  0x5b   :  { %p5656_p13 = scmp.lt.u32.totalorder %s5652_s15, %s6188_s2 }
  0x5d   :  { %p5658_p0 = pnand %p5656_p13, %p5653_p12 }
  0x5f   :  { %5661 = shalt.err (!%p5658_p0)
}
  0x60   :  { %s5662_s20 = scalar_lea.vmem %s53_s29, 6144  ;;  %p5667_p2 = scmp.lt.s32.totalorder %s53_s29, %s53_s29 }
  0x61   :  { %p5663_p1 = scmp.ne.s32.totalorder %s53_s29, %s5662_s20  ;;  %p5668_p3 = scmp.lt.s32.totalorder %s5662_s20, %s5662_s20 }
  0x63   :  { %p5669_p4 = por %p5668_p3, %p5667_p2 }
  0x65   :  { %p5670_p5 = pnand %p5669_p4, %p5663_p1 }
  0x67   :  { %5673 = shalt.err (!%p5670_p5)
}
  0x68   :  { %s5810_s0 = smov 128   ;;  %s5811_s17 = smov 8  }
  0x69   :  { %58 = dma.hbm_to_vmem [thread:$0]  %s6188_s2, 6144, %s53_s29, [#allocation6], %s5810_s0, %s5810_s0, %s5811_s17  }
  0x6a   :  { %s5812_s21 = smov [#allocation10]   ;;  %s5813_s23 = smov [#allocation13]  }
  0x6b   :  { %s76_s22 = sshll.u32 %s5812_s21, 4  ;;  %s100_s24 = sshll.u32 %s5813_s23, 4  ;;  %s77_s22 = int_to_ptr.vmem [resolvable:$true] %s76_s22  ;;  %s5976_s24 = int_to_ptr.vmem [resolvable:$true] %s100_s24 }
  0x6c   :  { %s5674_s28 = scalar_lea.hbm %s6190_s4, 1024 }
  0x6d   :  { %p5675_p6 = scmp.ne.s32.totalorder %s6190_s4, %s5674_s28  ;;  %p5678_p7 = scmp.lt.u32.totalorder %s5674_s28, %s6190_s4 }
  0x6f   :  { %p5680_p8 = pnand %p5678_p7, %p5675_p6 }
  0x71   :  { %5683 = shalt.err (!%p5680_p8)
}
  0x72   :  { %s5684_s2 = scalar_lea.vmem %s77_s22, 1024  ;;  %p5689_p10 = scmp.lt.s32.totalorder %s77_s22, %s77_s22 }
  0x73   :  { %p5685_p9 = scmp.ne.s32.totalorder %s77_s22, %s5684_s2  ;;  %p5690_p11 = scmp.lt.s32.totalorder %s5684_s2, %s5684_s2 }
  0x75   :  { %p5691_p12 = por %p5690_p11, %p5689_p10 }
  0x77   :  { %p5692_p13 = pnand %p5691_p12, %p5685_p9 }
  0x79   :  { %5695 = shalt.err (!%p5692_p13)
}
  0x7a   :  { %82 = dma.hbm_to_vmem [thread:$0]  %s6190_s4, 1024, %s77_s22, [#allocation9], %s5802_s1, %s5802_s1, %s5803_s18  }
  0x7b   :  { %s5696_s16 = scalar_lea.hbm %s6192_s6, 2048 }
  0x7c   :  { %p5697_p0 = scmp.ne.s32.totalorder %s6192_s6, %s5696_s16  ;;  %p5700_p1 = scmp.lt.u32.totalorder %s5696_s16, %s6192_s6 }
  0x7e   :  { %p5702_p2 = pnand %p5700_p1, %p5697_p0 }
  0x80   :  { %5705 = shalt.err (!%p5702_p2)
}
  0x81   :  { %s5706_s21 = scalar_lea.vmem %s5976_s24, 2048  ;;  %p5711_p4 = scmp.lt.s32.totalorder %s5976_s24, %s5976_s24 }
  0x82   :  { %p5707_p3 = scmp.ne.s32.totalorder %s5976_s24, %s5706_s21  ;;  %p5712_p5 = scmp.lt.s32.totalorder %s5706_s21, %s5706_s21 }
  0x84   :  { %p5713_p6 = por %p5712_p5, %p5711_p4 }
  0x86   :  { %p5714_p7 = pnand %p5713_p6, %p5707_p3 }
  0x88   :  { %5717 = shalt.err (!%p5714_p7)
}
  0x89   :  { %106 = dma.hbm_to_vmem [thread:$0]  %s6192_s6, 2048, %s5976_s24, [#allocation12], %s5810_s0, %s5810_s0, %s5811_s17  }
  0x8a   :  { %s5814_s23 = smov [#allocation16]   ;;  %s5718_s30 = scalar_lea.hbm %s6194_s8, 15360 }
  0x8b   :  { %s124_s7 = sshll.u32 %s5814_s23, 4  ;;  %p5719_p8 = scmp.ne.s32.totalorder %s6194_s8, %s5718_s30  ;;  %s125_s7 = int_to_ptr.vmem [resolvable:$true] %s124_s7 }
  0x8c   :  { %p5722_p9 = scmp.lt.u32.totalorder %s5718_s30, %s6194_s8 }
  0x8e   :  { %p5724_p10 = pnand %p5722_p9, %p5719_p8 }
  0x90   :  { %5727 = shalt.err (!%p5724_p10)
}
  0x91   :  { %s5728_s29 = scalar_lea.vmem %s125_s7, 15360  ;;  %p5733_p12 = scmp.lt.s32.totalorder %s125_s7, %s125_s7 }
  0x92   :  { %p5729_p11 = scmp.ne.s32.totalorder %s125_s7, %s5728_s29  ;;  %p5734_p13 = scmp.lt.s32.totalorder %s5728_s29, %s5728_s29 }
  0x94   :  { %p5735_p0 = por %p5734_p13, %p5733_p12 }
  0x96   :  { %p5736_p1 = pnand %p5735_p0, %p5729_p11 }
  0x98   :  { %5739 = shalt.err (!%p5736_p1)
}
  0x99   :  { %s5815_s6 = smov 320   ;;  %s5816_s24 = smov 20  }
  0x9a   :  { %130 = dma.hbm_to_vmem [thread:$0]  %s6194_s8, 15360, %s125_s7, [#allocation15], %s5815_s6, %s5815_s6, %s5816_s24  }
  0x9b   :  { %s5817_s26 = smov [#allocation17]   ;;  %s5740_s3 = scalar_lea.hbm %s6195_s9, 5120 }
  0x9c   :  { %s136_s16 = sshll.u32 %s5817_s26, 4  ;;  %p5741_p2 = scmp.ne.s32.totalorder %s6195_s9, %s5740_s3  ;;  %s137_s16 = int_to_ptr.vmem [resolvable:$true] %s136_s16 }
  0x9d   :  { %p5744_p3 = scmp.lt.u32.totalorder %s5740_s3, %s6195_s9 }
  0x9f   :  { %p5746_p4 = pnand %p5744_p3, %p5741_p2 }
  0xa1   :  { %5749 = shalt.err (!%p5746_p4)
}
  0xa2   :  { %s5750_s23 = scalar_lea.vmem %s137_s16, 5120  ;;  %p5755_p6 = scmp.lt.s32.totalorder %s137_s16, %s137_s16 }
  0xa3   :  { %p5751_p5 = scmp.ne.s32.totalorder %s137_s16, %s5750_s23  ;;  %p5756_p7 = scmp.lt.s32.totalorder %s5750_s23, %s5750_s23 }
  0xa5   :  { %p5757_p8 = por %p5756_p7, %p5755_p6 }
  0xa7   :  { %p5758_p9 = pnand %p5757_p8, %p5751_p5 }
  0xa9   :  { %5761 = shalt.err (!%p5758_p9)
}
  0xaa   :  { %142 = dma.hbm_to_vmem [thread:$0]  %s6195_s9, 5120, %s137_s16, [#allocation18], %s5802_s1, %s5802_s1, %s5803_s18  }
  0xab   :  { %5784 = dma.done.wait [#allocation3], 1280  }
  0xac   :  { %5785 = vsyncadd [#allocation3], 4294966016 }
  0xad   :  { %5786 = dma.done.wait [#allocation6], 21504  }
  0xae   :  { %5787 = vsyncadd [#allocation6], 4294945792 }
  0xaf   :  { %5788 = dma.done.wait [#allocation9], 3072  }
  0xb0   :  { %5789 = vsyncadd [#allocation9], 4294964224 }
  0xb1   :  { %5790 = dma.done.wait [#allocation12], 3072  }
  0xb2   :  { %5791 = vsyncadd [#allocation12], 4294964224 }
  0xb3   :  { %5792 = dma.done.wait [#allocation15], 21504  }
  0xb4   :  { %5793 = vsyncadd [#allocation15], 4294945792 }
  0xb5   :  { %5794 = dma.done.wait [#allocation18], 5120  }
  0xb6   :  { %5795 = vsyncadd [#allocation18], 4294962176  ;;  %v4982_v0 = vld [vmem:[#allocation5 + $0x4] ss:$12 sps:$4 sm:$0xff]   ;;  %v4984_v1 = vld [vmem:[#allocation5] ss:$12 sps:$4 sm:$0xff]  }
  0xb7   :  { %1008 = vmatprep.subr.bf16.mxu0 %v4982_v0  ;;  %v4985_v2 = vld [vmem:[#allocation5 + $0x1c] ss:$12 sps:$4 sm:$0xff]   ;;  %v4987_v3 = vld [vmem:[#allocation5 + $0x18] ss:$12 sps:$4 sm:$0xff]   ;;  %v4988_v4 = vld [vmem:[#allocation5 + $0x34] ss:$12 sps:$4 sm:$0xff]  }
  0xb8   :  { %1009 = vmatpush1.bf16.msra.mxu0 %v4984_v1  ;;  %v4990_v5 = vld [vmem:[#allocation5 + $0x30] ss:$12 sps:$4 sm:$0xff]   ;;  %v4991_v6 = vld [vmem:[#allocation5 + $0x4c] ss:$12 sps:$4 sm:$0xff]   ;;  %v4993_v7 = vld [vmem:[#allocation5 + $0x48] ss:$12 sps:$4 sm:$0xff]  }
  0xb9   :  { %1010 = vmatprep.subr.bf16.mxu0 %v4985_v2  ;;  %v4994_v8 = vld [vmem:[#allocation5 + $0x64] ss:$12 sps:$4 sm:$0xff]   ;;  %v4996_v9 = vld [vmem:[#allocation5 + $0x60] ss:$12 sps:$4 sm:$0xff]   ;;  %v5012_v10 = vld [vmem:[#allocation5 + $0xc8] ss:$12 sps:$4 sm:$0xff]  }
  0xba   :  { %v5013_v11 = vld [vmem:[#allocation5 + $0x8] ss:$12 sps:$4 sm:$0xff]   ;;  %4623 = vmatprep.subr.bf16.mxu1 %v5012_v10  ;;  %v5017_v13 = vld [vmem:[#allocation5 + $0xe0] ss:$12 sps:$4 sm:$0xff]   ;;  %v4999_v15 = vld [vmem:[#allocation5 + $0x78] ss:$12 sps:$4 sm:$0xff]  }
  0xbb   :  { %v4997_v12 = vld [vmem:[#allocation5 + $0x7c] ss:$12 sps:$4 sm:$0xff]   ;;  %4624 = vmatpush3.bf16.msra.mxu1 %v5013_v11  ;;  %v5018_v14 = vld [vmem:[#allocation5 + $0x20] ss:$12 sps:$4 sm:$0xff]   ;;  %v5022_v17 = vld [vmem:[#allocation5 + $0xf8] ss:$12 sps:$4 sm:$0xff]  }
  0xbc   :  { %1011 = vmatpush1.bf16.msra.mxu0 %v4987_v3  ;;  %v5000_v16 = vld [vmem:[#allocation5 + $0x94] ss:$12 sps:$4 sm:$0xff]   ;;  %4625 = vmatprep.subr.bf16.mxu1 %v5017_v13  ;;  %v5023_v18 = vld [vmem:[#allocation5 + $0x38] ss:$12 sps:$4 sm:$0xff]   ;;  %v5002_v19 = vld [vmem:[#allocation5 + $0x90] ss:$12 sps:$4 sm:$0xff]  }
  0xbd   :  { %1012 = vmatprep.subr.bf16.mxu0 %v4988_v4  ;;  %v5003_v20 = vld [vmem:[#allocation5 + $0xac] ss:$12 sps:$4 sm:$0xff]   ;;  %v5027_v21 = vld [vmem:[#allocation5 + $0x110] ss:$12 sps:$4 sm:$0xff]   ;;  %v5005_v23 = vld [vmem:[#allocation5 + $0xa8] ss:$12 sps:$4 sm:$0xff]  }
  0xbe   :  { %v5028_v22 = vld [vmem:[#allocation5 + $0x50] ss:$12 sps:$4 sm:$0xff]   ;;  %v5032_v24 = vld [vmem:[#allocation5 + $0x128] ss:$12 sps:$4 sm:$0xff]   ;;  %v5037_v27 = vld [vmem:[#allocation5 + $0x140] ss:$12 sps:$4 sm:$0xff]  }
  0xbf   :  { %4626 = vmatpush3.bf16.msra.mxu1 %v5018_v14  ;;  %v5006_v25 = vld [vmem:[#allocation5 + $0xc4] ss:$12 sps:$4 sm:$0xff]   ;;  %v5033_v26 = vld [vmem:[#allocation5 + $0x68] ss:$12 sps:$4 sm:$0xff]   ;;  %v5008_v28 = vld [vmem:[#allocation5 + $0xc0] ss:$12 sps:$4 sm:$0xff]  }
  0xc0   :  { %1013 = vmatpush1.bf16.msra.mxu0 %v4990_v5  ;;  %4627 = vmatprep.subr.bf16.mxu1 %v5022_v17  ;;  %v5009_v29 = vld [vmem:[#allocation5 + $0xdc] ss:$12 sps:$4 sm:$0xff]   ;;  %v5038_v30 = vld [vmem:[#allocation5 + $0x80] ss:$12 sps:$4 sm:$0xff]   ;;  %v5042_v31 = vld [vmem:[#allocation5 + $0x158] ss:$12 sps:$4 sm:$0xff]  }
  0xc1   :  { %1014 = vmatprep.subr.bf16.mxu0 %v4991_v6  ;;  %v5011_v32 = vld [vmem:[#allocation5 + $0xd8] ss:$12 sps:$4 sm:$0xff]   ;;  %v5014_v35 = vld [vmem:[#allocation5 + $0xf4] ss:$12 sps:$4 sm:$0xff]   ;;  %v5047_v38 = vld [vmem:[#allocation5 + $0x170] ss:$12 sps:$4 sm:$0xff]  }
  0xc2   :  { %v177_v33 = vld [vmem:[#allocation2 + $0x8] sm:$0xff]  ;;  %v182_v34 = vld [vmem:[#allocation2 + $0x30] sm:$0xff]  ;;  %v5021_v41 = vld [vmem:[#allocation5 + $0x108] ss:$12 sps:$4 sm:$0xff]   ;;  %vm5819_vm0 = vmmov 0   ;;  %s5821_s20 = smov [#allocation19]  }
  0xc3   :  { %4628 = vmatpush3.bf16.msra.mxu1 %v5023_v18  ;;  %v187_v36 = vpack.c.bf16 %v182_v34, %v177_v33  ;;  %v5043_v37 = vld [vmem:[#allocation5 + $0x98] ss:$12 sps:$4 sm:$0xff]   ;;  %v5016_v39 = vld [vmem:[#allocation5 + $0xf0] ss:$12 sps:$4 sm:$0xff]   ;;  %v5052_v44 = vld [vmem:[#allocation5 + $0x248] ss:$12 sps:$4 sm:$0xff]  }
  0xc4   :  { %1015 = vmatpush1.bf16.msra.mxu0 %v4993_v7  ;;  %4629 = vmatprep.subr.bf16.mxu1 %v5027_v21  ;;  %v5019_v40 = vld [vmem:[#allocation5 + $0x10c] ss:$12 sps:$4 sm:$0xff]   ;;  %v176_v42 = vld [vmem:[#allocation2] sm:$0xff]  ;;  %v5029_v51 = vld [vmem:[#allocation5 + $0x13c] ss:$12 sps:$4 sm:$0xff]   ;;  %s4178_s3 = sshll.u32 %s5821_s20, 4  ;;  %s4179_s3 = int_to_ptr.vmem [resolvable:$true] %s4178_s3 }
  0xc5   :  { %1016 = vmatprep.subr.bf16.mxu0 %v4994_v8  ;;  %1040 = vmatprep.mubr.bf16.mxu0 %v187_v36  ;;  %v5048_v43 = vld [vmem:[#allocation5 + $0xb0] ss:$12 sps:$4 sm:$0xff]   ;;  %v5053_v47 = vld [vmem:[#allocation5 + $0x188] ss:$12 sps:$4 sm:$0xff]   ;;  %v5057_v49 = vld [vmem:[#allocation5 + $0x260] ss:$12 sps:$4 sm:$0xff]   ;;  %p5767_p11 = scmp.lt.s32.totalorder %s4179_s3, %s4179_s3 }
  0xc6   :  { %1169 = vmatprep.mubr.bf16.mxu1 %v187_v36  ;;  %v181_v45 = vld [vmem:[#allocation2 + $0x28] sm:$0xff]  ;;  %v5024_v46 = vld [vmem:[#allocation5 + $0x124] ss:$12 sps:$4 sm:$0xff]   ;;  %v5026_v50 = vld [vmem:[#allocation5 + $0x120] ss:$12 sps:$4 sm:$0xff]  }
  0xc7   :  { %4630 = vmatpush3.bf16.msra.mxu1 %v5028_v22  ;;  %v186_v48 = vpack.c.bf16 %v181_v45, %v176_v42  ;;  %v5058_v52 = vld [vmem:[#allocation5 + $0x1a0] ss:$12 sps:$4 sm:$0xff]   ;;  %v5062_v53 = vld [vmem:[#allocation5 + $0x278] ss:$12 sps:$4 sm:$0xff]   ;;  %v5067_v57 = vld [vmem:[#allocation5 + $0x290] ss:$12 sps:$4 sm:$0xff]  }
  0xc8   :  { %1017 = vmatpush1.bf16.msra.mxu0 %v4996_v9  ;;  %4631 = vmatprep.subr.bf16.mxu1 %v5032_v24  ;;  %v5031_v54 = vld [vmem:[#allocation5 + $0x138] ss:$12 sps:$4 sm:$0xff]   ;;  %v5034_v55 = vld [vmem:[#allocation5 + $0x154] ss:$12 sps:$4 sm:$0xff]   ;;  %v5036_v58 = vld [vmem:[#allocation5 + $0x150] ss:$12 sps:$4 sm:$0xff]  }
  0xc9   :  { %1018 = vmatprep.subr.bf16.mxu0 %v4997_v12  ;;  %v5063_v56 = vld [vmem:[#allocation5 + $0x1b8] ss:$12 sps:$4 sm:$0xff]   ;;  %v5068_v60 = vld [vmem:[#allocation5 + $0x1d0] ss:$12 sps:$4 sm:$0xff]   ;;  %v5072_v61 = vld [vmem:[#allocation5 + $0x2a8] ss:$12 sps:$4 sm:$0xff]  }
  0xca   :  { %v5039_v59 = vld [vmem:[#allocation5 + $0x16c] ss:$12 sps:$4 sm:$0xff]   ;;  %v5041_v62 = vld [vmem:[#allocation5 + $0x168] ss:$12 sps:$4 sm:$0xff]   ;;  %v5046_v63 = vld [vmem:[#allocation5 + $0x184] ss:$12 sps:$4 sm:$0xff]  }
  0xcb   :  { %4632 = vmatpush3.bf16.msra.mxu1 %v5033_v26  ;;  %v5073_v0 = vld [vmem:[#allocation5 + $0x1e8] ss:$12 sps:$4 sm:$0xff]   ;;  %v5077_v1 = vld [vmem:[#allocation5 + $0x2c0] ss:$12 sps:$4 sm:$0xff]   ;;  %v5082_v5 = vld [vmem:[#allocation5 + $0x2d8] ss:$12 sps:$4 sm:$0xff]  }
  0xcc   :  { %1019 = vmatpush1.bf16.msra.mxu0 %v4999_v15  ;;  %4633 = vmatprep.subr.bf16.mxu1 %v5037_v27  ;;  %v5044_v2 = vld [vmem:[#allocation5 + $0x180] ss:$12 sps:$4 sm:$0xff]   ;;  %v5051_v3 = vld [vmem:[#allocation5 + $0x19c] ss:$12 sps:$4 sm:$0xff]   ;;  %v5049_v6 = vld [vmem:[#allocation5 + $0x198] ss:$12 sps:$4 sm:$0xff]  }
  0xcd   :  { %1020 = vmatprep.subr.bf16.mxu0 %v5000_v16  ;;  %v5078_v4 = vld [vmem:[#allocation5 + $0x200] ss:$12 sps:$4 sm:$0xff]   ;;  %v184_v9 = vld [vmem:[#allocation2 + $0x40] sm:$0xff]  ;;  %v5083_v10 = vld [vmem:[#allocation5 + $0x218] ss:$12 sps:$4 sm:$0xff]   ;;  %v5818_v22 = vmov 0.0  }
  0xce   :  { %v5056_v7 = vld [vmem:[#allocation5 + $0x1b4] ss:$12 sps:$4 sm:$0xff]   ;;  %v179_v8 = vld [vmem:[#allocation2 + $0x18] sm:$0xff]  ;;  %v5087_v12 = vld [vmem:[#allocation5 + $0x2f0] ss:$12 sps:$4 sm:$0xff]  }
  0xcf   :  { %4634 = vmatpush3.bf16.msra.mxu1 %v5038_v30  ;;  %v189_v11 = vpack.c.bf16 %v184_v9, %v179_v8  ;;  %v5054_v13 = vld [vmem:[#allocation5 + $0x1b0] ss:$12 sps:$4 sm:$0xff]   ;;  %v5061_v14 = vld [vmem:[#allocation5 + $0x1cc] ss:$12 sps:$4 sm:$0xff]   ;;  %v178_v16 = vld [vmem:[#allocation2 + $0x10] sm:$0xff] }
  0xd0   :  { %1021 = vmatpush1.bf16.msra.mxu0 %v5002_v19  ;;  %4635 = vmatprep.subr.bf16.mxu1 %v5042_v31  ;;  %v5088_v15 = vld [vmem:[#allocation5 + $0x230] ss:$12 sps:$4 sm:$0xff]   ;;  %v183_v17 = vld [vmem:[#allocation2 + $0x38] sm:$0xff]  ;;  %v5069_v26 = vld [vmem:[#allocation5 + $0x1f8] ss:$12 sps:$4 sm:$0xff]  }
  0xd1   :  { %1022 = vmatprep.subr.bf16.mxu0 %v5003_v20  ;;  %v5059_v18 = vld [vmem:[#allocation5 + $0x1c8] ss:$12 sps:$4 sm:$0xff]   ;;  %v5066_v19 = vld [vmem:[#allocation5 + $0x1e4] ss:$12 sps:$4 sm:$0xff]   ;;  %v6040_v20 = vpack.c.bf16 %v183_v17, %v178_v16  ;;  %v5081_v30 = vld [vmem:[#allocation5 + $0x22c] ss:$12 sps:$4 sm:$0xff]  }
  0xd2   :  { %v5092_v21 = vld [vmem:[#allocation5 + $0x308] ss:$12 sps:$4 sm:$0xff]   ;;  %v5104_v31 = vld [vmem:[#allocation5 + $0x350] ss:$12 sps:$4 sm:$0xff]   ;;  %v5099_v42 = vld [vmem:[#allocation5 + $0x28c] ss:$12 sps:$4 sm:$0xff]  }
  0xd3   :  { %4636 = vmatpush3.bf16.msra.mxu1 %v5043_v37  ;;  %v5071_v24 = vld [vmem:[#allocation5 + $0x1fc] ss:$12 sps:$4 sm:$0xff]   ;;  %v5076_v27 = vld [vmem:[#allocation5 + $0x214] ss:$12 sps:$4 sm:$0xff]   ;;  %v5086_v33 = vld [vmem:[#allocation5 + $0x244] ss:$12 sps:$4 sm:$0xff]  }
  0xd4   :  { %1023 = vmatpush1.bf16.msra.mxu0 %v5005_v23  ;;  %4637 = vmatprep.subr.bf16.mxu1 %v5047_v38  ;;  %v5064_v23 = vld [vmem:[#allocation5 + $0x1e0] ss:$12 sps:$4 sm:$0xff]   ;;  %v5108_v34 = vld [vmem:[#allocation5 + $0x368] ss:$12 sps:$4 sm:$0xff]   ;;  %v5089_v38 = vld [vmem:[#allocation5 + $0x258] ss:$12 sps:$4 sm:$0xff]  }
  0xd5   :  { %1024 = vmatprep.subr.bf16.mxu0 %v5006_v25  ;;  %v5096_v25 = vld [vmem:[#allocation5 + $0x320] ss:$12 sps:$4 sm:$0xff]   ;;  %v5091_v36 = vld [vmem:[#allocation5 + $0x25c] ss:$12 sps:$4 sm:$0xff]   ;;  %v5133_v16 = vld [vmem:[#allocation5 + $0x378] ss:$12 sps:$4 sm:$0xff]  }
  0xd6   :  { %v5112_v37 = vld [vmem:[#allocation5 + $0x380] ss:$12 sps:$4 sm:$0xff]   ;;  %v185_v45 = vld [vmem:[#allocation2 + $0x48] sm:$0xff] }
  0xd7   :  { %4638 = vmatpush3.bf16.msra.mxu1 %v5048_v43  ;;  %v5120_v43 = vld [vmem:[#allocation5 + $0x3b0] ss:$12 sps:$4 sm:$0xff]   ;;  %v5129_v9 = vld [vmem:[#allocation5 + $0x34c] ss:$12 sps:$4 sm:$0xff]   ;;  %v5138_v17 = vld [vmem:[#allocation5 + $0x394] ss:$12 sps:$4 sm:$0xff]  }
  0xd8   :  { %1025 = vmatpush1.bf16.msra.mxu0 %v5008_v28  ;;  %4645 = vmatprep.subr.bf16.mxu1 %v5052_v44  ;;  %v5100_v28 = vld [vmem:[#allocation5 + $0x338] ss:$12 sps:$4 sm:$0xff]   ;;  %v180_v44 = vld [vmem:[#allocation2 + $0x20] sm:$0xff] }
  0xd9   :  { %1026 = vmatprep.subr.bf16.mxu0 %v5009_v29  ;;  %v5074_v29 = vld [vmem:[#allocation5 + $0x210] ss:$12 sps:$4 sm:$0xff]  }
  0xda   :  { %1170 = vmatmul.mubr.bf16.vlgmr.msra.gmra.mrb[0].mxu1 %v186_v48  ;;  %v5124_v8 = vld [vmem:[#allocation5 + $0x330] ss:$12 sps:$4 sm:$0xff]  }
  0xdb   :  { %4646 = vmatpush3.bf16.msra.mxu1 %v5053_v47  ;;  %1210 = vmatprep.mubr.bf16.mxu1 %v189_v11  ;;  %v5097_v47 = vld [vmem:[#allocation5 + $0x288] ss:$12 sps:$4 sm:$0xff]  }
  0xdc   :  { %1027 = vmatpush1.bf16.msra.mxu0 %v5011_v32  ;;  %4647 = vmatprep.subr.bf16.mxu1 %v5057_v49  ;;  %v5079_v32 = vld [vmem:[#allocation5 + $0x228] ss:$12 sps:$4 sm:$0xff]  }
  0xdd   :  { %1028 = vmatprep.subr.bf16.mxu0 %v5014_v35  ;;  %v5084_v35 = vld [vmem:[#allocation5 + $0x240] ss:$12 sps:$4 sm:$0xff]  }
  0xde   :  { %v5142_v49 = vld [vmem:[#allocation7] ss:$8 sps:$4 sm:$0xff]  }
  0xdf   :  { %4648 = vmatpush3.bf16.msra.mxu1 %v5058_v52  ;;  %v5101_v52 = vld [vmem:[#allocation5 + $0x2a0] ss:$12 sps:$4 sm:$0xff]  }
  0xe0   :  { %1029 = vmatpush1.bf16.msra.mxu0 %v5016_v39  ;;  %4649 = vmatprep.subr.bf16.mxu1 %v5062_v53  ;;  %v5095_v39 = vld [vmem:[#allocation5 + $0x274] ss:$12 sps:$4 sm:$0xff]   ;;  %v5107_v53 = vld [vmem:[#allocation5 + $0x2bc] ss:$12 sps:$4 sm:$0xff]  }
  0xe1   :  { %1030 = vmatprep.subr.bf16.mxu0 %v5019_v40  ;;  %v5093_v40 = vld [vmem:[#allocation5 + $0x270] ss:$12 sps:$4 sm:$0xff]  }
  0xe3   :  { %4650 = vmatpush3.bf16.msra.mxu1 %v5063_v56  ;;  %v5105_v56 = vld [vmem:[#allocation5 + $0x2b8] ss:$12 sps:$4 sm:$0xff]  }
  0xe4   :  { %1031 = vmatpush1.bf16.msra.mxu0 %v5021_v41  ;;  %4651 = vmatprep.subr.bf16.mxu1 %v5067_v57  ;;  %v5116_v41 = vld [vmem:[#allocation5 + $0x398] ss:$12 sps:$4 sm:$0xff]   ;;  %v5111_v57 = vld [vmem:[#allocation5 + $0x2d4] ss:$12 sps:$4 sm:$0xff]  }
  0xe5   :  { %1032 = vmatprep.subr.bf16.mxu0 %v5024_v46  ;;  %v5144_v46 = vld [vmem:[#allocation7 + $0x4] ss:$8 sps:$4 sm:$0xff]  }
  0xe7   :  { %4652 = vmatpush3.bf16.msra.mxu1 %v5068_v60  ;;  %v5109_v60 = vld [vmem:[#allocation5 + $0x2d0] ss:$12 sps:$4 sm:$0xff]  }
  0xe8   :  { %1033 = vmatpush1.bf16.msra.mxu0 %v5026_v50  ;;  %4653 = vmatprep.subr.bf16.mxu1 %v5072_v61  ;;  %v6053_v50 = vpack.c.bf16 %v185_v45, %v180_v44  ;;  %v5115_v61 = vld [vmem:[#allocation5 + $0x2ec] ss:$12 sps:$4 sm:$0xff]  }
  0xe9   :  { %1034 = vmatprep.subr.bf16.mxu0 %v5029_v51  ;;  %v5147_v51 = vld [vmem:[#allocation7 + $0x14] ss:$8 sps:$4 sm:$0xff]  }
  0xeb   :  { %4654 = vmatpush3.bf16.msra.mxu1 %v5073_v0  ;;  %v5113_v0 = vld [vmem:[#allocation5 + $0x2e8] ss:$12 sps:$4 sm:$0xff]  }
  0xec   :  { %1035 = vmatpush1.bf16.msra.mxu0 %v5031_v54  ;;  %4655 = vmatprep.subr.bf16.mxu1 %v5077_v1  ;;  %v5145_v54 = vld [vmem:[#allocation7 + $0x10] ss:$8 sps:$4 sm:$0xff]  }
  0xed   :  { %1036 = vmatprep.subr.bf16.mxu0 %v5034_v55  ;;  %v5150_v55 = vld [vmem:[#allocation7 + $0x24] ss:$8 sps:$4 sm:$0xff]  }
  0xee   :  { %v5119_v1 = vld [vmem:[#allocation5 + $0x304] ss:$12 sps:$4 sm:$0xff]  }
  0xef   :  { %4656 = vmatpush3.bf16.msra.mxu1 %v5078_v4  ;;  %v5123_v4 = vld [vmem:[#allocation5 + $0x31c] ss:$12 sps:$4 sm:$0xff]  }
  0xf0   :  { %1037 = vmatpush1.bf16.msra.mxu0 %v5036_v58  ;;  %4657 = vmatprep.subr.bf16.mxu1 %v5082_v5  ;;  %v5148_v58 = vld [vmem:[#allocation7 + $0x20] ss:$8 sps:$4 sm:$0xff]   ;;  %v5121_v5 = vld [vmem:[#allocation5 + $0x318] ss:$12 sps:$4 sm:$0xff]  }
  0xf1   :  { %1038 = vmatprep.subr.bf16.mxu0 %v5039_v59  ;;  %v5153_v59 = vld [vmem:[#allocation7 + $0x34] ss:$8 sps:$4 sm:$0xff]  }
  0xf3   :  { %4658 = vmatpush3.bf16.msra.mxu1 %v5083_v10  ;;  %v5157_v10 = vld [vmem:[#allocation7 + $0x50] ss:$8 sps:$4 sm:$0xff]  }
  0xf4   :  { %1039 = vmatpush1.bf16.msra.mxu0 %v5041_v62  ;;  %4659 = vmatprep.subr.bf16.mxu1 %v5087_v12  ;;  %v5151_v62 = vld [vmem:[#allocation7 + $0x30] ss:$8 sps:$4 sm:$0xff]   ;;  %v5127_v12 = vld [vmem:[#allocation5 + $0x348] ss:$12 sps:$4 sm:$0xff]  }
  0xf5   :  { %1051 = vmatprep.subr.bf16.mxu0 %v5046_v63  ;;  %v5156_v63 = vld [vmem:[#allocation7 + $0x44] ss:$8 sps:$4 sm:$0xff]  }
  0xf7   :  { %1041 = vmatmul.mubr.bf16.vlgmr.msra.gmra.mrb[0].mxu0 %v186_v48  ;;  %4660 = vmatpush3.bf16.msra.mxu1 %v5088_v15  ;;  %v5103_v48 = vld [vmem:[#allocation5 + $0x2a4] ss:$12 sps:$4 sm:$0xff]   ;;  %v5135_v15 = vld [vmem:[#allocation5 + $0x37c] ss:$12 sps:$4 sm:$0xff]  }
  0xf8   :  { %1052 = vmatpush1.bf16.msra.mxu0 %v5044_v2  ;;  %1083 = vmatprep.mubr.bf16.mxu0 %v189_v11  ;;  %v5154_v2 = vld [vmem:[#allocation7 + $0x40] ss:$8 sps:$4 sm:$0xff]   ;;  %v5159_v11 = vld [vmem:[#allocation7 + $0x54] ss:$8 sps:$4 sm:$0xff]  }
  0xf9   :  { %1053 = vmatprep.subr.bf16.mxu0 %v5051_v3  ;;  %4822 = vmatprep.subr.bf16.mxu1 %v5818_v22  ;;  %v5117_v3 = vld [vmem:[#allocation5 + $0x300] ss:$12 sps:$4 sm:$0xff]  }
  0xfa   :  { %1211 = vmatmul.mubr.bf16.vlgmr.msra.gmra.mrb[4].mxu1 %v6040_v20 }
  0xfb   :  { %4823 = vmatpush3.bf16.msra.mxu1 %v5092_v21  ;;  %4838 = vmatprep.mubr.msk.bf16.mxu1 %vm5819_vm0, %v5818_v22  ;;  %v5160_v21 = vld [vmem:[#allocation7 + $0x60] ss:$8 sps:$4 sm:$0xff]  }
  0xfc   :  { %1054 = vmatpush1.bf16.msra.mxu0 %v5049_v6  ;;  %4824 = vmatprep.subr.bf16.mxu1 %v5818_v22  ;;  %v5126_v6 = vld [vmem:[#allocation5 + $0x334] ss:$12 sps:$4 sm:$0xff]  }
  0xfd   :  { %1055 = vmatprep.subr.bf16.mxu0 %v5056_v7  ;;  %v5820_v7 = vmov 0  }
  0xff   :  { %4825 = vmatpush3.bf16.msra.mxu1 %v5096_v25  ;;  %v5165_v25 = vld [vmem:[#allocation7 + $0x74] ss:$8 sps:$4 sm:$0xff]  }
 0x100   :  { %1056 = vmatpush1.bf16.msra.mxu0 %v5054_v13  ;;  %4826 = vmatprep.subr.bf16.mxu1 %v5818_v22  ;;  %v5132_v13 = vld [vmem:[#allocation5 + $0x364] ss:$12 sps:$4 sm:$0xff]  }
 0x101   :  { %1057 = vmatprep.subr.bf16.mxu0 %v5061_v14  ;;  %v5130_v14 = vld [vmem:[#allocation5 + $0x360] ss:$12 sps:$4 sm:$0xff]  }
 0x103   :  { %4827 = vmatpush3.bf16.msra.mxu1 %v5100_v28  ;;  %v5171_v28 = vld [vmem:[#allocation7 + $0x94] ss:$8 sps:$4 sm:$0xff]  }
 0x104   :  { %1058 = vmatpush1.bf16.msra.mxu0 %v5059_v18  ;;  %4828 = vmatprep.subr.bf16.mxu1 %v5818_v22  ;;  %v5136_v18 = vld [vmem:[#allocation5 + $0x390] ss:$12 sps:$4 sm:$0xff]  }
 0x105   :  { %1059 = vmatprep.subr.bf16.mxu0 %v5066_v19  ;;  %v5141_v19 = vld [vmem:[#allocation5 + $0x3ac] ss:$12 sps:$4 sm:$0xff]  }
 0x107   :  { %4829 = vmatpush3.bf16.msra.mxu1 %v5104_v31  ;;  %v5172_v31 = vld [vmem:[#allocation7 + $0xa0] ss:$8 sps:$4 sm:$0xff]  }
 0x108   :  { %1060 = vmatpush1.bf16.msra.mxu0 %v5064_v23  ;;  %4830 = vmatprep.subr.bf16.mxu1 %v5818_v22  ;;  %v5162_v23 = vld [vmem:[#allocation7 + $0x64] ss:$8 sps:$4 sm:$0xff]  }
 0x109   :  { %1061 = vmatprep.subr.bf16.mxu0 %v5071_v24  ;;  %v5163_v24 = vld [vmem:[#allocation7 + $0x70] ss:$8 sps:$4 sm:$0xff]  }
 0x10b   :  { %4831 = vmatpush3.bf16.msra.mxu1 %v5108_v34  ;;  %v5180_v34 = vld [vmem:[#allocation7 + $0xc4] ss:$8 sps:$4 sm:$0xff]  }
 0x10c   :  { %1062 = vmatpush1.bf16.msra.mxu0 %v5069_v26  ;;  %4832 = vmatprep.subr.bf16.mxu1 %v5818_v22  ;;  %v5166_v26 = vld [vmem:[#allocation7 + $0x80] ss:$8 sps:$4 sm:$0xff]  }
 0x10d   :  { %1063 = vmatprep.subr.bf16.mxu0 %v5076_v27  ;;  %v5168_v27 = vld [vmem:[#allocation7 + $0x84] ss:$8 sps:$4 sm:$0xff]  }
 0x10f   :  { %4833 = vmatpush3.bf16.msra.mxu1 %v5112_v37  ;;  %v5181_v37 = vld [vmem:[#allocation7 + $0xd0] ss:$8 sps:$4 sm:$0xff]  }
 0x110   :  { %1064 = vmatpush1.bf16.msra.mxu0 %v5074_v29  ;;  %4834 = vmatprep.subr.bf16.mxu1 %v5818_v22  ;;  %v5169_v29 = vld [vmem:[#allocation7 + $0x90] ss:$8 sps:$4 sm:$0xff]  }
 0x111   :  { %1065 = vmatprep.subr.bf16.mxu0 %v5081_v30  ;;  %v5174_v30 = vld [vmem:[#allocation7 + $0xa4] ss:$8 sps:$4 sm:$0xff]  }
 0x113   :  { %4835 = vmatpush3.bf16.msra.mxu1 %v5116_v41  ;;  %v5187_v41 = vld [vmem:[#allocation7 + $0xf0] ss:$8 sps:$4 sm:$0xff]  }
 0x114   :  { %1066 = vmatpush1.bf16.msra.mxu0 %v5079_v32  ;;  %4836 = vmatprep.subr.bf16.mxu1 %v5818_v22  ;;  %v5177_v32 = vld [vmem:[#allocation7 + $0xb4] ss:$8 sps:$4 sm:$0xff]  }
 0x115   :  { %1067 = vmatprep.subr.bf16.mxu0 %v5086_v33  ;;  %v5175_v33 = vld [vmem:[#allocation7 + $0xb0] ss:$8 sps:$4 sm:$0xff]  }
 0x117   :  { %4837 = vmatpush3.bf16.msra.mxu1 %v5120_v43 }
 0x118   :  { %1068 = vmatpush1.bf16.msra.mxu0 %v5084_v35  ;;  %1569 = vmatprep.subr.bf16.mxu1 %v5144_v46  ;;  %v5178_v35 = vld [vmem:[#allocation7 + $0xc0] ss:$8 sps:$4 sm:$0xff]  }
 0x119   :  { %1069 = vmatprep.subr.bf16.mxu0 %v5091_v36  ;;  %v5183_v36 = vld [vmem:[#allocation7 + $0xd4] ss:$8 sps:$4 sm:$0xff]  }
 0x11a   :  { %4839 = vmatmul.mubr.bf16.vlgmr.msra.gmra.mrb[8].mxu1 %v6053_v50 }
 0x11b   :  { %1570 = vmatpush1.bf16.msra.mxu1 %v5142_v49  ;;  %v353_v49 = vlaneseq }
 0x11c   :  { %1070 = vmatpush1.bf16.msra.mxu0 %v5089_v38  ;;  %1571 = vmatprep.subr.bf16.mxu1 %v5147_v51  ;;  %v5186_v38 = vld [vmem:[#allocation7 + $0xe4] ss:$8 sps:$4 sm:$0xff]  }
 0x11d   :  { %1071 = vmatprep.subr.bf16.mxu0 %v5095_v39  ;;  %v5184_v39 = vld [vmem:[#allocation7 + $0xe0] ss:$8 sps:$4 sm:$0xff]  }
 0x11f   :  { %1572 = vmatpush1.bf16.msra.mxu1 %v5145_v54  ;;  %v5214_v54 = vld [vmem:[#allocation8 + $0x40] sm:$0xff]  }
 0x120   :  { %1072 = vmatpush1.bf16.msra.mxu0 %v5093_v40  ;;  %1573 = vmatprep.subr.bf16.mxu1 %v5150_v55  ;;  %v5189_v40 = vld [vmem:[#allocation7 + $0xf4] ss:$8 sps:$4 sm:$0xff]   ;;  %v5215_v55 = vld [vmem:[#allocation8] sm:$0xff]  }
 0x121   :  { %1073 = vmatprep.subr.bf16.mxu0 %v5099_v42  ;;  %v5192_v42 = vld [vmem:[#allocation7 + $0x104] ss:$8 sps:$4 sm:$0xff]  }
 0x123   :  { %1574 = vmatpush1.bf16.msra.mxu1 %v5148_v58 }
 0x124   :  { %1074 = vmatpush1.bf16.msra.mxu0 %v5097_v47  ;;  %1575 = vmatprep.subr.bf16.mxu1 %v5153_v59  ;;  %v5217_v59 = vld [vmem:[#allocation8 + $0x8] sm:$0xff]  }
 0x125   :  { %1075 = vmatprep.subr.bf16.mxu0 %v5103_v48 }
 0x127   :  { %1576 = vmatpush1.bf16.msra.mxu1 %v5151_v62 }
 0x128   :  { %1076 = vmatpush1.bf16.msra.mxu0 %v5101_v52  ;;  %1577 = vmatprep.subr.bf16.mxu1 %v5156_v63  ;;  %v351_v52 = vld [vmem:[%s6196_s10] sm:$0x7] }
 0x129   :  { %1077 = vmatprep.subr.bf16.mxu0 %v5107_v53 }
 0x12b   :  { %1578 = vmatpush1.bf16.msra.mxu1 %v5154_v2 }
 0x12c   :  { %1078 = vmatpush1.bf16.msra.mxu0 %v5105_v56  ;;  %1579 = vmatprep.subr.bf16.mxu1 %v5159_v11  ;;  %v5216_v56 = vld [vmem:[#allocation8 + $0x48] sm:$0xff]  }
 0x12d   :  { %1079 = vmatprep.subr.bf16.mxu0 %v5111_v57  ;;  %v5224_v11 = vld [vmem:[#allocation8 + $0x68] sm:$0xff]  }
 0x12f   :  { %1580 = vmatpush1.bf16.msra.mxu1 %v5157_v10  ;;  %v5223_v10 = vld [vmem:[#allocation8 + $0x20] sm:$0xff]  }
 0x130   :  { %1080 = vmatpush1.bf16.msra.mxu0 %v5109_v60  ;;  %1581 = vmatprep.subr.bf16.mxu1 %v5162_v23 }
 0x131   :  { %1081 = vmatprep.subr.bf16.mxu0 %v5115_v61  ;;  %v5218_v61 = vld [vmem:[#allocation8 + $0x50] sm:$0xff]  }
 0x133   :  { %1582 = vmatpush1.bf16.msra.mxu1 %v5160_v21 }
 0x134   :  { %1082 = vmatpush1.bf16.msra.mxu0 %v5113_v0  ;;  %1583 = vmatprep.subr.bf16.mxu1 %v5165_v25 }
 0x135   :  { %1094 = vmatprep.subr.bf16.mxu0 %v5119_v1 }
 0x137   :  { %1084 = vmatmul.mubr.bf16.vlgmr.msra.gmra.mrb[0].mxu0 %v6040_v20  ;;  %v5139_v20 = vld [vmem:[#allocation5 + $0x3a8] ss:$12 sps:$4 sm:$0xff]   ;;  %1584 = vmatpush1.bf16.msra.mxu1 %v5163_v24 }
 0x138   :  { %1095 = vmatpush1.bf16.msra.mxu0 %v5117_v3  ;;  %1126 = vmatprep.mubr.bf16.mxu0 %v5820_v7 }
 0x139   :  { %1096 = vmatprep.subr.bf16.mxu0 %v5123_v4  ;;  %1585 = vmatprep.subr.bf16.mxu1 %v5168_v27  ;;  %v5219_v4 = vld [vmem:[#allocation8 + $0x10] sm:$0xff]  }
 0x13b   :  { %1586 = vmatpush1.bf16.msra.mxu1 %v5166_v26 }
 0x13c   :  { %1097 = vmatpush1.bf16.msra.mxu0 %v5121_v5  ;;  %1587 = vmatprep.subr.bf16.mxu1 %v5171_v28  ;;  %v5220_v5 = vld [vmem:[#allocation8 + $0x58] sm:$0xff]  }
 0x13d   :  { %1098 = vmatprep.subr.bf16.mxu0 %v5126_v6 }
 0x13f   :  { %1588 = vmatpush1.bf16.msra.mxu1 %v5169_v29 }
 0x140   :  { %1099 = vmatpush1.bf16.msra.mxu0 %v5124_v8  ;;  %1589 = vmatprep.subr.bf16.mxu1 %v5174_v30  ;;  %v5221_v8 = vld [vmem:[#allocation8 + $0x18] sm:$0xff]  }
 0x141   :  { %1100 = vmatprep.subr.bf16.mxu0 %v5129_v9  ;;  %v5222_v9 = vld [vmem:[#allocation8 + $0x60] sm:$0xff]  }
 0x143   :  { %1590 = vmatpush1.bf16.msra.mxu1 %v5172_v31 }
 0x144   :  { %1101 = vmatpush1.bf16.msra.mxu0 %v5127_v12  ;;  %1591 = vmatprep.subr.bf16.mxu1 %v5177_v32 }
 0x145   :  { %1102 = vmatprep.subr.bf16.mxu0 %v5132_v13 }
 0x147   :  { %1592 = vmatpush1.bf16.msra.mxu1 %v5175_v33 }
 0x148   :  { %1103 = vmatpush1.bf16.msra.mxu0 %v5130_v14  ;;  %1593 = vmatprep.subr.bf16.mxu1 %v5180_v34 }
 0x149   :  { %1104 = vmatprep.subr.bf16.mxu0 %v5135_v15 }
 0x14b   :  { %1594 = vmatpush1.bf16.msra.mxu1 %v5178_v35 }
 0x14c   :  { %1105 = vmatpush1.bf16.msra.mxu0 %v5133_v16  ;;  %1595 = vmatprep.subr.bf16.mxu1 %v5183_v36 }
 0x14d   :  { %1106 = vmatprep.subr.bf16.mxu0 %v5138_v17 }
 0x14f   :  { %1596 = vmatpush1.bf16.msra.mxu1 %v5181_v37 }
 0x150   :  { %1107 = vmatpush1.bf16.msra.mxu0 %v5136_v18  ;;  %1597 = vmatprep.subr.bf16.mxu1 %v5186_v38 }
 0x151   :  { %1108 = vmatprep.subr.bf16.mxu0 %v5141_v19 }
 0x153   :  { %1598 = vmatpush1.bf16.msra.mxu1 %v5184_v39 }
 0x154   :  { %1109 = vmatpush1.bf16.msra.mxu0 %v5139_v20  ;;  %1599 = vmatprep.subr.bf16.mxu1 %v5189_v40  ;;  %v5190_v40 = vld [vmem:[#allocation7 + $0x100] ss:$8 sps:$4 sm:$0xff]  }
 0x155   :  { %4676 = vmatprep.subr.bf16.mxu0 %v5214_v54  ;;  %v5208_v54 = vld [vmem:[#allocation7 + $0x160] ss:$8 sps:$4 sm:$0xff]  }
 0x157   :  { %1127 = vmatmul.mubr.bf16.vlgmr.msra.gmra.mrb[0].mxu0 %v6053_v50  ;;  %1600 = vmatpush1.bf16.msra.mxu1 %v5187_v41  ;;  %v6059_v50 = vshrl.u32 %v353_v49, 7  ;;  %v5195_v41 = vld [vmem:[#allocation7 + $0x114] ss:$8 sps:$4 sm:$0xff]  }
 0x158   :  { %1612 = vmatprep.subr.bf16.mxu1 %v5192_v42  ;;  %4677 = vmatpush3.bf16.msra.mxu0 %v5215_v55  ;;  %v5193_v42 = vld [vmem:[#allocation7 + $0x110] ss:$8 sps:$4 sm:$0xff]   ;;  %v5207_v49 = vld [vmem:[#allocation7 + $0x154] ss:$8 sps:$4 sm:$0xff]  }
 0x159   :  { %v6062_v51 = vsub.s32 2, %v6059_v50  ;;  %4678 = vmatprep.subr.bf16.mxu0 %v5216_v56  ;;  %v6069_v21 = vsub.s32 0, %v6059_v50  ;;  %v6072_v23 = vsub.s32 1, %v6059_v50  ;;  %v5213_v55 = vld [vmem:[#allocation7 + $0x174] ss:$8 sps:$4 sm:$0xff]  }
 0x15a   :  { %v5211_v56 = vld [vmem:[#allocation7 + $0x170] ss:$8 sps:$4 sm:$0xff]  }
 0x15b   :  { %v364_v53 = vrot.slane %v351_v52, %v6062_v51  ;;  %v356_v24 = vrot.slane %v351_v52, %v6069_v21  ;;  %v360_v25 = vrot.slane %v351_v52, %v6072_v23  ;;  %v5205_v52 = vld [vmem:[#allocation7 + $0x150] ss:$8 sps:$4 sm:$0xff]  }
 0x15c   :  { %4679 = vmatpush3.bf16.msra.mxu0 %v5217_v59  ;;  %v5227_v59 = vld [vmem:[#allocation8 + $0x30] sm:$0xff]  }
 0x15d   :  { %4680 = vmatprep.subr.bf16.mxu0 %v5218_v61  ;;  %v5229_v61 = vld [vmem:[#allocation8 + $0x38] sm:$0xff]  }
 0x160   :  { %4681 = vmatpush3.bf16.msra.mxu0 %v5219_v4 }
 0x161   :  { %4682 = vmatprep.subr.bf16.mxu0 %v5220_v5 }
 0x164   :  { %4683 = vmatpush3.bf16.msra.mxu0 %v5221_v8 }
 0x165   :  { %4684 = vmatprep.subr.bf16.mxu0 %v5222_v9 }
 0x168   :  { %4685 = vmatpush3.bf16.msra.mxu0 %v5223_v10 }
 0x169   :  { %4686 = vmatprep.subr.bf16.mxu0 %v5224_v11 }
 0x1ad   :  { %v4639_v43 = vpop.f32.mrb[0].mxu1 }
 0x1ae   :  { %v4640_v44 = vpop.f32.mrb[1].mxu1 }
 0x1af   :  { %v4641_v45 = vadd.f32 %v4640_v44, %v4639_v43  ;;  %v4642_v46 = vpop.f32.mrb[2].mxu1  ;;  %v5198_v43 = vld [vmem:[#allocation7 + $0x124] ss:$8 sps:$4 sm:$0xff]   ;;  %v5196_v44 = vld [vmem:[#allocation7 + $0x120] ss:$8 sps:$4 sm:$0xff]  }
 0x1b0   :  { %v4643_v47 = vpop.f32.mrb[3].mxu1 }
 0x1b1   :  { %v4644_v48 = vadd.f32 %v4643_v47, %v4642_v46  ;;  %v1172_v57 = vadd.f32 %v4641_v45, %v364_v53  ;;  %v5201_v45 = vld [vmem:[#allocation7 + $0x134] ss:$8 sps:$4 sm:$0xff]   ;;  %v5199_v46 = vld [vmem:[#allocation7 + $0x130] ss:$8 sps:$4 sm:$0xff]   ;;  %v5204_v47 = vld [vmem:[#allocation7 + $0x144] ss:$8 sps:$4 sm:$0xff]  }
 0x1b3   :  { %v1175_v62 = vadd.f32 %v4644_v48, %v364_v53  ;;  %v5202_v48 = vld [vmem:[#allocation7 + $0x140] ss:$8 sps:$4 sm:$0xff]   ;;  %v5210_v53 = vld [vmem:[#allocation7 + $0x164] ss:$8 sps:$4 sm:$0xff]  }
 0x1cd   :  { %v4661_v58 = vpop.f32.mrb[4].mxu1 }
 0x1ce   :  { %v4662_v60 = vpop.f32.mrb[5].mxu1 }
 0x1cf   :  { %v4663_v63 = vadd.f32 %v4662_v60, %v4661_v58  ;;  %v4664_v0 = vpop.f32.mrb[6].mxu1  ;;  %v5226_v58 = vld [vmem:[#allocation8 + $0x70] sm:$0xff]   ;;  %v5228_v60 = vld [vmem:[#allocation8 + $0x78] sm:$0xff]  }
 0x1d0   :  { %v4665_v1 = vpop.f32.mrb[7].mxu1 }
 0x1d1   :  { %v4666_v2 = vadd.f32 %v4665_v1, %v4664_v0  ;;  %v1213_v3 = vadd.f32 %v4663_v63, %v1172_v57  ;;  %v5225_v57 = vld [vmem:[#allocation8 + $0x28] sm:$0xff]  }
 0x1d2   :  { %4687 = vmatpush3.bf16.msra.mxu0 %v5225_v57  ;;  %v5260_v57 = vld [vmem:[#allocation13 + $0x44] ss:$8 sps:$4 sm:$0xff]  }
 0x1d3   :  { %v1216_v6 = vadd.f32 %v4666_v2, %v1175_v62  ;;  %4688 = vmatprep.subr.bf16.mxu0 %v5226_v58  ;;  %v1317_v62 = vld [vmem:[%s6196_s10 + $0x3] sm:$0x3]  ;;  %v5258_v58 = vld [vmem:[#allocation13 + $0x40] ss:$8 sps:$4 sm:$0xff]  }
 0x1d4   :  { %v1322_v63 = vrot.slane %v1317_v62, %v6069_v21  ;;  %v1326_v0 = vrot.slane %v1317_v62, %v6072_v23 }
 0x1d6   :  { %4689 = vmatpush3.bf16.msra.mxu0 %v5227_v59  ;;  %v5263_v59 = vld [vmem:[#allocation13 + $0x54] ss:$8 sps:$4 sm:$0xff]  }
 0x1d7   :  { %4690 = vmatprep.subr.bf16.mxu0 %v5228_v60  ;;  %v5261_v60 = vld [vmem:[#allocation13 + $0x50] ss:$8 sps:$4 sm:$0xff]  }
 0x1da   :  { %4691 = vmatpush3.bf16.msra.mxu0 %v5229_v61  ;;  %v4380_v61 = vld [vmem:[%s6196_s10 + $0x6] ss:$0 sm:$0xff] }
 0x1db   :  { %4842 = vmatprep.subr.bf16.mxu0 %v5818_v22 }
 0x1ed   :  { %v1253_v12 = vpop.f32.mrb[8].mxu1 }
 0x1ee   :  { %v1254_v13 = vadd.f32 %v1253_v12, %v1213_v3  ;;  %v4840_v14 = vpop.f32.mrb[9].mxu1 }
 0x1ef   :  { %v1256_v15 = vpop.f32.mrb[10].mxu1 }
 0x1f0   :  { %v1262_v16 = vmax.f32 %v1254_v13, 0.0  ;;  %v1257_v17 = vadd.f32 %v1256_v15, %v1216_v6  ;;  %v4841_v18 = vpop.f32.mrb[11].mxu1 }
 0x1f1   :  { %v5232_v18 = vld [vmem:[#allocation10 + $0x10] sm:$0xff]  }
 0x1f2   :  { %v1265_v19 = vmax.f32 %v1257_v17, 0.0  ;;  %v5231_v17 = vld [vmem:[#allocation10 + $0x8] sm:$0xff]  }
 0x1f4   :  { %v1268_v20 = vpack.c.bf16 %v1265_v19, %v1262_v16  ;;  %v5230_v16 = vld [vmem:[#allocation10] sm:$0xff]   ;;  %v5233_v19 = vld [vmem:[#allocation10 + $0x18] sm:$0xff]  }
 0x22a   :  { %v1128_v26 = vpop.f32.mrb[0].mxu0 }
 0x22b   :  { %v4922_v27 = vadd.f32 %v1128_v26, %v356_v24  ;;  %v1130_v28 = vpop.f32.mrb[1].mxu0  ;;  %v5237_v26 = vld [vmem:[#allocation10 + $0x38] sm:$0xff]  }
 0x22c   :  { %v4923_v29 = vadd.f32 %v1130_v28, %v360_v25  ;;  %v1132_v30 = vpop.f32.mrb[2].mxu0  ;;  %v5239_v28 = vld [vmem:[#allocation11 + $0x8] sm:$0xff]  }
 0x22d   :  { %v4924_v31 = vadd.f32 %v1132_v30, %v356_v24  ;;  %v1134_v32 = vpop.f32.mrb[3].mxu0  ;;  %v1260_v34 = vmax.f32 %v4922_v27, 0.0  ;;  %v5235_v24 = vld [vmem:[#allocation10 + $0x28] sm:$0xff]   ;;  %v5238_v27 = vld [vmem:[#allocation11] sm:$0xff]   ;;  %v5241_v30 = vld [vmem:[#allocation11 + $0x18] sm:$0xff]  }
 0x22e   :  { %v4925_v33 = vadd.f32 %v1134_v32, %v360_v25  ;;  %v1261_v36 = vmax.f32 %v4923_v29, 0.0  ;;  %v5236_v25 = vld [vmem:[#allocation10 + $0x30] sm:$0xff]   ;;  %v5243_v32 = vld [vmem:[#allocation11 + $0x28] sm:$0xff]  }
 0x22f   :  { %v1263_v35 = vmax.f32 %v4924_v31, 0.0  ;;  %v5240_v29 = vld [vmem:[#allocation11 + $0x10] sm:$0xff]   ;;  %v5242_v31 = vld [vmem:[#allocation11 + $0x20] sm:$0xff]  }
 0x230   :  { %v1264_v37 = vmax.f32 %v4925_v33, 0.0 }
 0x231   :  { %v1266_v38 = vpack.c.bf16 %v1263_v35, %v1260_v34  ;;  %v4363_v34 = vld [vmem:[%s6196_s10 + $0x5] ss:$0 sm:$0xff] }
 0x232   :  { %v1267_v39 = vpack.c.bf16 %v1264_v37, %v1261_v36 }
 0x234   :  { %1601 = vmatprep.mubr.bf16.mxu1 %v1267_v39 }
 0x235   :  { %1602 = vmatmul.mubr.bf16.vlgmr.msra.gmra.mrb[12].mxu1 %v1266_v38 }
 0x236   :  { %1613 = vmatpush1.bf16.msra.mxu1 %v5190_v40  ;;  %1644 = vmatprep.mubr.bf16.mxu1 %v5820_v7 }
 0x237   :  { %1614 = vmatprep.subr.bf16.mxu1 %v5195_v41 }
 0x23a   :  { %1615 = vmatpush1.bf16.msra.mxu1 %v5193_v42 }
 0x23b   :  { %1616 = vmatprep.subr.bf16.mxu1 %v5198_v43 }
 0x23e   :  { %1617 = vmatpush1.bf16.msra.mxu1 %v5196_v44 }
 0x23f   :  { %1618 = vmatprep.subr.bf16.mxu1 %v5201_v45  ;;  %v5244_v45 = vld [vmem:[#allocation11 + $0x30] sm:$0xff]  }
 0x242   :  { %1619 = vmatpush1.bf16.msra.mxu1 %v5199_v46  ;;  %v5245_v46 = vld [vmem:[#allocation11 + $0x38] sm:$0xff]  }
 0x243   :  { %1620 = vmatprep.subr.bf16.mxu1 %v5204_v47  ;;  %v5246_v47 = vld [vmem:[#allocation13] ss:$8 sps:$4 sm:$0xff]  }
 0x246   :  { %1621 = vmatpush1.bf16.msra.mxu1 %v5202_v48  ;;  %v5248_v48 = vld [vmem:[#allocation13 + $0x4] ss:$8 sps:$4 sm:$0xff]  }
 0x247   :  { %1622 = vmatprep.subr.bf16.mxu1 %v5207_v49  ;;  %v5251_v49 = vld [vmem:[#allocation13 + $0x14] ss:$8 sps:$4 sm:$0xff]  }
 0x24a   :  { %1623 = vmatpush1.bf16.msra.mxu1 %v5205_v52  ;;  %v5249_v52 = vld [vmem:[#allocation13 + $0x10] ss:$8 sps:$4 sm:$0xff]  }
 0x24b   :  { %1624 = vmatprep.subr.bf16.mxu1 %v5210_v53  ;;  %v5254_v53 = vld [vmem:[#allocation13 + $0x24] ss:$8 sps:$4 sm:$0xff]  }
 0x24e   :  { %1625 = vmatpush1.bf16.msra.mxu1 %v5208_v54  ;;  %v5252_v54 = vld [vmem:[#allocation13 + $0x20] ss:$8 sps:$4 sm:$0xff]  }
 0x24f   :  { %1626 = vmatprep.subr.bf16.mxu1 %v5213_v55  ;;  %v5257_v55 = vld [vmem:[#allocation13 + $0x34] ss:$8 sps:$4 sm:$0xff]  }
 0x252   :  { %1627 = vmatpush1.bf16.msra.mxu1 %v5211_v56  ;;  %v5255_v56 = vld [vmem:[#allocation13 + $0x30] ss:$8 sps:$4 sm:$0xff]  }
 0x253   :  { %4862 = vmatprep.subr.bf16.mxu1 %v5818_v22 }
 0x255   :  { %1645 = vmatmul.mubr.bf16.vlgmr.msra.gmra.mrb[12].mxu1 %v1268_v20  ;;  %v5234_v20 = vld [vmem:[#allocation10 + $0x20] sm:$0xff]  }
 0x256   :  { %4878 = vmatprep.mubr.msk.bf16.mxu1 %vm5819_vm0, %v5818_v22  ;;  %4863 = vmatpush3.bf16.msra.mxu1 %v5238_v27  ;;  %v5285_v27 = vld [vmem:[#allocation14 + $0x78] ss:$12 sps:$4 sm:$0xff]  }
 0x257   :  { %4864 = vmatprep.subr.bf16.mxu1 %v5818_v22 }
 0x25a   :  { %4865 = vmatpush3.bf16.msra.mxu1 %v5239_v28  ;;  %v5290_v28 = vld [vmem:[#allocation14 + $0x94] ss:$12 sps:$4 sm:$0xff]  }
 0x25b   :  { %4866 = vmatprep.subr.bf16.mxu1 %v5818_v22 }
 0x25e   :  { %4867 = vmatpush3.bf16.msra.mxu1 %v5240_v29  ;;  %v5288_v29 = vld [vmem:[#allocation14 + $0x90] ss:$12 sps:$4 sm:$0xff]  }
 0x25f   :  { %4868 = vmatprep.subr.bf16.mxu1 %v5818_v22 }
 0x262   :  { %4869 = vmatpush3.bf16.msra.mxu1 %v5241_v30  ;;  %v5293_v30 = vld [vmem:[#allocation14 + $0xac] ss:$12 sps:$4 sm:$0xff]  }
 0x263   :  { %4870 = vmatprep.subr.bf16.mxu1 %v5818_v22 }
 0x266   :  { %4871 = vmatpush3.bf16.msra.mxu1 %v5242_v31  ;;  %v5291_v31 = vld [vmem:[#allocation14 + $0xa8] ss:$12 sps:$4 sm:$0xff]  }
 0x267   :  { %4872 = vmatprep.subr.bf16.mxu1 %v5818_v22 }
 0x26a   :  { %4873 = vmatpush3.bf16.msra.mxu1 %v5243_v32  ;;  %v5296_v32 = vld [vmem:[#allocation14 + $0xc4] ss:$12 sps:$4 sm:$0xff]  }
 0x26b   :  { %4874 = vmatprep.subr.bf16.mxu1 %v5818_v22 }
 0x26e   :  { %4875 = vmatpush3.bf16.msra.mxu1 %v5244_v45 }
 0x26f   :  { %4876 = vmatprep.subr.bf16.mxu1 %v5818_v22 }
 0x272   :  { %4877 = vmatpush3.bf16.msra.mxu1 %v5245_v46 }
 0x328   :  { %v1646_v1 = vpop.f32.mrb[12].mxu1 }
 0x329   :  { %v4926_v2 = vadd.f32 %v1646_v1, %v1322_v63  ;;  %v1648_v3 = vpop.f32.mrb[13].mxu1 }
 0x32a   :  { %v4927_v4 = vadd.f32 %v1648_v3, %v1326_v0  ;;  %v1650_v5 = vpop.f32.mrb[14].mxu1 }
 0x32b   :  { %v4928_v6 = vadd.f32 %v1650_v5, %v1322_v63  ;;  %v1652_v8 = vpop.f32.mrb[15].mxu1  ;;  %v1655_v10 = vmax.f32 %v4926_v2, 0.0 }
 0x32c   :  { %v4929_v9 = vadd.f32 %v1652_v8, %v1326_v0  ;;  %v1656_v12 = vmax.f32 %v4927_v4, 0.0  ;;  %v5266_v8 = vld [vmem:[#allocation13 + $0x64] ss:$8 sps:$4 sm:$0xff]  }
 0x32d   :  { %v1657_v11 = vmax.f32 %v4928_v6, 0.0 }
 0x32e   :  { %v1658_v13 = vmax.f32 %v4929_v9, 0.0  ;;  %v5264_v9 = vld [vmem:[#allocation13 + $0x60] ss:$8 sps:$4 sm:$0xff]  }
 0x32f   :  { %v1659_v14 = vpack.c.bf16 %v1657_v11, %v1655_v10  ;;  %v5269_v10 = vld [vmem:[#allocation13 + $0x74] ss:$8 sps:$4 sm:$0xff]   ;;  %v5267_v11 = vld [vmem:[#allocation13 + $0x70] ss:$8 sps:$4 sm:$0xff]  }
 0x330   :  { %v1660_v15 = vpack.c.bf16 %v1658_v13, %v1656_v12  ;;  %v5270_v12 = vld [vmem:[#allocation14] ss:$12 sps:$4 sm:$0xff]   ;;  %v5272_v13 = vld [vmem:[#allocation14 + $0x4] ss:$12 sps:$4 sm:$0xff]  }
 0x331   :  { %2564 = vmatprep.subr.bf16.mxu1 %v5272_v13  ;;  %v5339_v13 = vld [vmem:[#allocation16 + $0xc] ss:$20 sps:$4 sm:$0xff]  }
 0x332   :  { %1828 = vmatprep.mubr.bf16.mxu0 %v1660_v15  ;;  %v5273_v15 = vld [vmem:[#allocation14 + $0x18] ss:$12 sps:$4 sm:$0xff]  }
 0x333   :  { %1829 = vmatmul.mubr.bf16.vlgmr.msra.gmra.mrb[4].mxu0 %v1659_v14  ;;  %v5275_v14 = vld [vmem:[#allocation14 + $0x1c] ss:$12 sps:$4 sm:$0xff]  }
 0x334   :  { %4843 = vmatpush3.bf16.msra.mxu0 %v5230_v16  ;;  %4858 = vmatprep.mubr.msk.bf16.mxu0 %vm5819_vm0, %v5818_v22  ;;  %v5278_v16 = vld [vmem:[#allocation14 + $0x34] ss:$12 sps:$4 sm:$0xff]  }
 0x335   :  { %4844 = vmatprep.subr.bf16.mxu0 %v5818_v22 }
 0x338   :  { %4845 = vmatpush3.bf16.msra.mxu0 %v5231_v17  ;;  %v5297_v17 = vld [vmem:[#allocation14 + $0xc8] ss:$12 sps:$4 sm:$0xff]  }
 0x339   :  { %4846 = vmatprep.subr.bf16.mxu0 %v5818_v22 }
 0x33c   :  { %4847 = vmatpush3.bf16.msra.mxu0 %v5232_v18  ;;  %v5276_v18 = vld [vmem:[#allocation14 + $0x30] ss:$12 sps:$4 sm:$0xff]  }
 0x33d   :  { %4848 = vmatprep.subr.bf16.mxu0 %v5818_v22 }
 0x340   :  { %4849 = vmatpush3.bf16.msra.mxu0 %v5233_v19  ;;  %v5281_v19 = vld [vmem:[#allocation14 + $0x4c] ss:$12 sps:$4 sm:$0xff]  }
 0x341   :  { %4850 = vmatprep.subr.bf16.mxu0 %v5818_v22 }
 0x344   :  { %4851 = vmatpush3.bf16.msra.mxu0 %v5234_v20  ;;  %v5279_v20 = vld [vmem:[#allocation14 + $0x48] ss:$12 sps:$4 sm:$0xff]  }
 0x345   :  { %4852 = vmatprep.subr.bf16.mxu0 %v5818_v22 }
 0x348   :  { %4853 = vmatpush3.bf16.msra.mxu0 %v5235_v24  ;;  %v5284_v24 = vld [vmem:[#allocation14 + $0x64] ss:$12 sps:$4 sm:$0xff]  }
 0x349   :  { %4854 = vmatprep.subr.bf16.mxu0 %v5818_v22 }
 0x34c   :  { %4855 = vmatpush3.bf16.msra.mxu0 %v5236_v25  ;;  %v5282_v25 = vld [vmem:[#allocation14 + $0x60] ss:$12 sps:$4 sm:$0xff]  }
 0x34d   :  { %4856 = vmatprep.subr.bf16.mxu0 %v5818_v22 }
 0x350   :  { %4857 = vmatpush3.bf16.msra.mxu0 %v5237_v26  ;;  %v5287_v26 = vld [vmem:[#allocation14 + $0x7c] ss:$12 sps:$4 sm:$0xff]  }
 0x351   :  { %2178 = vmatprep.subr.bf16.mxu0 %v5248_v48 }
 0x406   :  { %v4692_v33 = vpop.f32.mrb[4].mxu0 }
 0x407   :  { %v4693_v35 = vpop.f32.mrb[5].mxu0 }
 0x408   :  { %v4694_v36 = vadd.f32 %v4693_v35, %v4692_v33  ;;  %v4695_v37 = vpop.f32.mrb[6].mxu0  ;;  %v5294_v33 = vld [vmem:[#allocation14 + $0xc0] ss:$12 sps:$4 sm:$0xff]   ;;  %v5299_v35 = vld [vmem:[#allocation14 + $0xd8] ss:$12 sps:$4 sm:$0xff]  }
 0x409   :  { %v4696_v38 = vpop.f32.mrb[7].mxu0 }
 0x40a   :  { %v1831_v39 = vadd.f32 %v4694_v36, %v4363_v34  ;;  %v4697_v40 = vadd.f32 %v4696_v38, %v4695_v37  ;;  %v5306_v36 = vld [vmem:[#allocation14 + $0xf4] ss:$12 sps:$4 sm:$0xff]   ;;  %v5304_v37 = vld [vmem:[#allocation14 + $0xf0] ss:$12 sps:$4 sm:$0xff]   ;;  %v5311_v38 = vld [vmem:[#allocation14 + $0x10c] ss:$12 sps:$4 sm:$0xff]  }
 0x40c   :  { %v1834_v41 = vadd.f32 %v4697_v40, %v4363_v34  ;;  %v1837_v42 = vmax.f32 %v1831_v39, 0.0  ;;  %v5301_v34 = vld [vmem:[#allocation14 + $0xdc] ss:$12 sps:$4 sm:$0xff]   ;;  %v5316_v40 = vld [vmem:[#allocation14 + $0x124] ss:$12 sps:$4 sm:$0xff]  }
 0x40d   :  { %v5309_v39 = vld [vmem:[#allocation14 + $0x108] ss:$12 sps:$4 sm:$0xff]  }
 0x40e   :  { %v1838_v43 = vmax.f32 %v1834_v41, 0.0  ;;  %v5314_v41 = vld [vmem:[#allocation14 + $0x120] ss:$12 sps:$4 sm:$0xff]  }
 0x410   :  { %v1839_v44 = vpack.c.bf16 %v1838_v43, %v1837_v42  ;;  %v5321_v42 = vld [vmem:[#allocation14 + $0x13c] ss:$12 sps:$4 sm:$0xff]   ;;  %v5319_v43 = vld [vmem:[#allocation14 + $0x138] ss:$12 sps:$4 sm:$0xff]  }
 0x412   :  { %4859 = vmatmul.mubr.bf16.vlgmr.msra.gmra.mrb[8].mxu0 %v1839_v44  ;;  %v4389_v44 = vld [vmem:[%s6196_s10 + $0x7] ss:$0 sm:$0xff] }
 0x413   :  { %2210 = vmatprep.mubr.bf16.mxu0 %v5820_v7  ;;  %2179 = vmatpush1.bf16.msra.mxu0 %v5246_v47 }
 0x414   :  { %2180 = vmatprep.subr.bf16.mxu0 %v5251_v49 }
 0x417   :  { %2181 = vmatpush1.bf16.msra.mxu0 %v5249_v52 }
 0x418   :  { %2182 = vmatprep.subr.bf16.mxu0 %v5254_v53 }
 0x41b   :  { %2183 = vmatpush1.bf16.msra.mxu0 %v5252_v54 }
 0x41c   :  { %2184 = vmatprep.subr.bf16.mxu0 %v5257_v55  ;;  %v5298_v55 = vld [vmem:[#allocation14 + $0x8] ss:$12 sps:$4 sm:$0xff]  }
 0x41f   :  { %2185 = vmatpush1.bf16.msra.mxu0 %v5255_v56 }
 0x420   :  { %2186 = vmatprep.subr.bf16.mxu0 %v5260_v57  ;;  %v5302_v57 = vld [vmem:[#allocation14 + $0xe0] ss:$12 sps:$4 sm:$0xff]  }
 0x423   :  { %2187 = vmatpush1.bf16.msra.mxu0 %v5258_v58  ;;  %v5303_v58 = vld [vmem:[#allocation14 + $0x20] ss:$12 sps:$4 sm:$0xff]  }
 0x424   :  { %2188 = vmatprep.subr.bf16.mxu0 %v5263_v59  ;;  %v5307_v59 = vld [vmem:[#allocation14 + $0xf8] ss:$12 sps:$4 sm:$0xff]  }
 0x427   :  { %2189 = vmatpush1.bf16.msra.mxu0 %v5261_v60  ;;  %v5308_v60 = vld [vmem:[#allocation14 + $0x38] ss:$12 sps:$4 sm:$0xff]  }
 0x428   :  { %2190 = vmatprep.subr.bf16.mxu0 %v5266_v8  ;;  %v5331_v8 = vld [vmem:[#allocation14 + $0x16c] ss:$12 sps:$4 sm:$0xff]  }
 0x42b   :  { %2191 = vmatpush1.bf16.msra.mxu0 %v5264_v9  ;;  %v5332_v9 = vld [vmem:[#allocation14 + $0x170] ss:$12 sps:$4 sm:$0xff]  }
 0x42c   :  { %2192 = vmatprep.subr.bf16.mxu0 %v5269_v10  ;;  %v5329_v10 = vld [vmem:[#allocation14 + $0x168] ss:$12 sps:$4 sm:$0xff]  }
 0x42f   :  { %2193 = vmatpush1.bf16.msra.mxu0 %v5267_v11  ;;  %v5333_v11 = vld [vmem:[#allocation14 + $0xb0] ss:$12 sps:$4 sm:$0xff]  }
 0x430   :  { %4716 = vmatprep.subr.bf16.mxu0 %v5297_v17 }
 0x4e5   :  { %v1945_v62 = vpop.f32.mrb[8].mxu0 }
 0x4e6   :  { %v1946_v63 = vadd.f32 %v4380_v61, %v1945_v62  ;;  %v4860_v0 = vpop.f32.mrb[9].mxu0  ;;  %v5313_v62 = vld [vmem:[#allocation14 + $0x50] ss:$12 sps:$4 sm:$0xff]  }
 0x4e7   :  { %v1948_v1 = vpop.f32.mrb[10].mxu0  ;;  %v5318_v0 = vld [vmem:[#allocation14 + $0x68] ss:$12 sps:$4 sm:$0xff]  }
 0x4e8   :  { %v1949_v2 = vadd.f32 %v4380_v61, %v1948_v1  ;;  %v4861_v3 = vpop.f32.mrb[11].mxu0  ;;  %v1952_v4 = vmax.f32 %v1946_v63, 0.0  ;;  %v5312_v61 = vld [vmem:[#allocation14 + $0x110] ss:$12 sps:$4 sm:$0xff]   ;;  %v5317_v63 = vld [vmem:[#allocation14 + $0x128] ss:$12 sps:$4 sm:$0xff]  }
 0x4e9   :  { %v5322_v1 = vld [vmem:[#allocation14 + $0x140] ss:$12 sps:$4 sm:$0xff]  }
 0x4ea   :  { %v1953_v5 = vmax.f32 %v1949_v2, 0.0  ;;  %v5323_v2 = vld [vmem:[#allocation14 + $0x80] ss:$12 sps:$4 sm:$0xff]  }
 0x4eb   :  { %v5326_v3 = vld [vmem:[#allocation14 + $0x154] ss:$12 sps:$4 sm:$0xff]  }
 0x4ec   :  { %v1954_v6 = vpack.c.bf16 %v1953_v5, %v1952_v4  ;;  %v5327_v4 = vld [vmem:[#allocation14 + $0x158] ss:$12 sps:$4 sm:$0xff]   ;;  %v5324_v5 = vld [vmem:[#allocation14 + $0x150] ss:$12 sps:$4 sm:$0xff]  }
 0x4ee   :  { %4879 = vmatmul.mubr.bf16.vlgmr.msra.gmra.mrb[16].mxu1 %v1954_v6  ;;  %v5328_v6 = vld [vmem:[#allocation14 + $0x98] ss:$12 sps:$4 sm:$0xff]  }
 0x4ef   :  { %2565 = vmatpush1.bf16.msra.mxu1 %v5270_v12  ;;  %v5336_v12 = vld [vmem:[#allocation16 + $0x4] ss:$20 sps:$4 sm:$0xff]  }
 0x4f0   :  { %2566 = vmatprep.subr.bf16.mxu1 %v5275_v14  ;;  %v2086_v14 = vld [vmem:[%s6196_s10 + $0x8] sm:$0x3] }
 0x4f3   :  { %2567 = vmatpush1.bf16.msra.mxu1 %v5273_v15  ;;  %v2091_v15 = vrot.slane %v2086_v14, %v6069_v21 }
 0x4f4   :  { %2568 = vmatprep.subr.bf16.mxu1 %v5278_v16  ;;  %v2095_v16 = vrot.slane %v2086_v14, %v6072_v23  ;;  %v5397_v14 = vld [vmem:[#allocation16 + $0x198] ss:$20 sps:$4 sm:$0xff]  }
 0x4f7   :  { %2569 = vmatpush1.bf16.msra.mxu1 %v5276_v18 }
 0x4f8   :  { %2570 = vmatprep.subr.bf16.mxu1 %v5281_v19 }
 0x4fb   :  { %2571 = vmatpush1.bf16.msra.mxu1 %v5279_v20 }
 0x4fc   :  { %2572 = vmatprep.subr.bf16.mxu1 %v5284_v24 }
 0x4ff   :  { %2573 = vmatpush1.bf16.msra.mxu1 %v5282_v25 }
 0x500   :  { %2574 = vmatprep.subr.bf16.mxu1 %v5287_v26 }
 0x503   :  { %2575 = vmatpush1.bf16.msra.mxu1 %v5285_v27 }
 0x504   :  { %2576 = vmatprep.subr.bf16.mxu1 %v5290_v28 }
 0x507   :  { %2577 = vmatpush1.bf16.msra.mxu1 %v5288_v29 }
 0x508   :  { %2578 = vmatprep.subr.bf16.mxu1 %v5293_v30 }
 0x50b   :  { %2579 = vmatpush1.bf16.msra.mxu1 %v5291_v31 }
 0x50c   :  { %2580 = vmatprep.subr.bf16.mxu1 %v5296_v32 }
 0x50f   :  { %2581 = vmatpush1.bf16.msra.mxu1 %v5294_v33 }
 0x510   :  { %2582 = vmatprep.subr.bf16.mxu1 %v5301_v34  ;;  %v5334_v34 = vld [vmem:[#allocation16] ss:$20 sps:$4 sm:$0xff]  }
 0x513   :  { %2583 = vmatpush1.bf16.msra.mxu1 %v5299_v35  ;;  %v5337_v35 = vld [vmem:[#allocation16 + $0x8] ss:$20 sps:$4 sm:$0xff]  }
 0x514   :  { %2584 = vmatprep.subr.bf16.mxu1 %v5306_v36  ;;  %v5342_v36 = vld [vmem:[#allocation16 + $0x2c] ss:$20 sps:$4 sm:$0xff]  }
 0x517   :  { %2585 = vmatpush1.bf16.msra.mxu1 %v5304_v37  ;;  %v5345_v37 = vld [vmem:[#allocation16 + $0x34] ss:$20 sps:$4 sm:$0xff]  }
 0x518   :  { %2586 = vmatprep.subr.bf16.mxu1 %v5311_v38  ;;  %v5340_v38 = vld [vmem:[#allocation16 + $0x28] ss:$20 sps:$4 sm:$0xff]  }
 0x51b   :  { %2587 = vmatpush1.bf16.msra.mxu1 %v5309_v39  ;;  %v5343_v39 = vld [vmem:[#allocation16 + $0x30] ss:$20 sps:$4 sm:$0xff]  }
 0x51c   :  { %2588 = vmatprep.subr.bf16.mxu1 %v5316_v40  ;;  %v5348_v40 = vld [vmem:[#allocation16 + $0x54] ss:$20 sps:$4 sm:$0xff]  }
 0x51f   :  { %2589 = vmatpush1.bf16.msra.mxu1 %v5314_v41  ;;  %v5351_v41 = vld [vmem:[#allocation16 + $0x5c] ss:$20 sps:$4 sm:$0xff]  }
 0x520   :  { %2590 = vmatprep.subr.bf16.mxu1 %v5321_v42  ;;  %v5346_v42 = vld [vmem:[#allocation16 + $0x50] ss:$20 sps:$4 sm:$0xff]  }
 0x523   :  { %2591 = vmatpush1.bf16.msra.mxu1 %v5319_v43  ;;  %v5349_v43 = vld [vmem:[#allocation16 + $0x58] ss:$20 sps:$4 sm:$0xff]  }
 0x524   :  { %2592 = vmatprep.subr.bf16.mxu1 %v5326_v3  ;;  %v5387_v3 = vld [vmem:[#allocation16 + $0x14c] ss:$20 sps:$4 sm:$0xff]  }
 0x527   :  { %2593 = vmatpush1.bf16.msra.mxu1 %v5324_v5  ;;  %v5385_v5 = vld [vmem:[#allocation16 + $0x148] ss:$20 sps:$4 sm:$0xff]  }
 0x528   :  { %2594 = vmatprep.subr.bf16.mxu1 %v5331_v8  ;;  %v5393_v8 = vld [vmem:[#allocation16 + $0x174] ss:$20 sps:$4 sm:$0xff]  }
 0x52b   :  { %2595 = vmatpush1.bf16.msra.mxu1 %v5329_v10  ;;  %v5391_v10 = vld [vmem:[#allocation16 + $0x170] ss:$20 sps:$4 sm:$0xff]  }
 0x52c   :  { %3538 = vmatprep.subr.bf16.mxu1 %v5339_v13  ;;  %v5394_v13 = vld [vmem:[#allocation16 + $0x190] ss:$20 sps:$4 sm:$0xff]  }
 0x5c1   :  { %v2060_v45 = vpop.f32.mrb[16].mxu1 }
 0x5c2   :  { %v2061_v46 = vadd.f32 %v4389_v44, %v2060_v45  ;;  %v4880_v47 = vpop.f32.mrb[17].mxu1  ;;  %v5357_v45 = vld [vmem:[#allocation16 + $0x84] ss:$20 sps:$4 sm:$0xff]  }
 0x5c3   :  { %v2063_v48 = vpop.f32.mrb[18].mxu1  ;;  %v5355_v47 = vld [vmem:[#allocation16 + $0x80] ss:$20 sps:$4 sm:$0xff]  }
 0x5c4   :  { %v2064_v49 = vadd.f32 %v4389_v44, %v2063_v48  ;;  %v4881_v52 = vpop.f32.mrb[19].mxu1  ;;  %v2067_v53 = vmax.f32 %v2061_v46, 0.0  ;;  %v5354_v44 = vld [vmem:[#allocation16 + $0x7c] ss:$20 sps:$4 sm:$0xff]   ;;  %v5352_v46 = vld [vmem:[#allocation16 + $0x78] ss:$20 sps:$4 sm:$0xff]  }
 0x5c5   :  { %v5360_v48 = vld [vmem:[#allocation16 + $0xa4] ss:$20 sps:$4 sm:$0xff]   ;;  %v5358_v52 = vld [vmem:[#allocation16 + $0xa0] ss:$20 sps:$4 sm:$0xff]  }
 0x5c6   :  { %v2068_v54 = vmax.f32 %v2064_v49, 0.0  ;;  %v5363_v49 = vld [vmem:[#allocation16 + $0xac] ss:$20 sps:$4 sm:$0xff]  }
 0x5c8   :  { %v2069_v56 = vpack.c.bf16 %v2068_v54, %v2067_v53  ;;  %v5361_v53 = vld [vmem:[#allocation16 + $0xa8] ss:$20 sps:$4 sm:$0xff]   ;;  %v5366_v54 = vld [vmem:[#allocation16 + $0xcc] ss:$20 sps:$4 sm:$0xff]  }
 0x5ca   :  { %2211 = vmatmul.mubr.bf16.vlgmr.msra.gmra.mrb[12].mxu0 %v2069_v56  ;;  %v5364_v56 = vld [vmem:[#allocation16 + $0xc8] ss:$20 sps:$4 sm:$0xff]  }
 0x5cb   :  { %4717 = vmatpush3.bf16.msra.mxu0 %v5298_v55  ;;  %v5369_v55 = vld [vmem:[#allocation16 + $0xd4] ss:$20 sps:$4 sm:$0xff]  }
 0x5cc   :  { %4718 = vmatprep.subr.bf16.mxu0 %v5302_v57  ;;  %v5367_v57 = vld [vmem:[#allocation16 + $0xd0] ss:$20 sps:$4 sm:$0xff]  }
 0x5cf   :  { %4719 = vmatpush3.bf16.msra.mxu0 %v5303_v58  ;;  %v5372_v58 = vld [vmem:[#allocation16 + $0xf4] ss:$20 sps:$4 sm:$0xff]  }
 0x5d0   :  { %4720 = vmatprep.subr.bf16.mxu0 %v5307_v59  ;;  %v5375_v59 = vld [vmem:[#allocation16 + $0xfc] ss:$20 sps:$4 sm:$0xff]  }
 0x5d3   :  { %4721 = vmatpush3.bf16.msra.mxu0 %v5308_v60  ;;  %v5370_v60 = vld [vmem:[#allocation16 + $0xf0] ss:$20 sps:$4 sm:$0xff]  }
 0x5d4   :  { %4722 = vmatprep.subr.bf16.mxu0 %v5312_v61  ;;  %v5373_v61 = vld [vmem:[#allocation16 + $0xf8] ss:$20 sps:$4 sm:$0xff]  }
 0x5d7   :  { %4723 = vmatpush3.bf16.msra.mxu0 %v5313_v62  ;;  %v5378_v62 = vld [vmem:[#allocation16 + $0x11c] ss:$20 sps:$4 sm:$0xff]  }
 0x5d8   :  { %4724 = vmatprep.subr.bf16.mxu0 %v5317_v63  ;;  %v5381_v63 = vld [vmem:[#allocation16 + $0x124] ss:$20 sps:$4 sm:$0xff]  }
 0x5db   :  { %4725 = vmatpush3.bf16.msra.mxu0 %v5318_v0  ;;  %v5376_v0 = vld [vmem:[#allocation16 + $0x118] ss:$20 sps:$4 sm:$0xff]  }
 0x5dc   :  { %4726 = vmatprep.subr.bf16.mxu0 %v5322_v1  ;;  %v5379_v1 = vld [vmem:[#allocation16 + $0x120] ss:$20 sps:$4 sm:$0xff]  }
 0x5df   :  { %4727 = vmatpush3.bf16.msra.mxu0 %v5323_v2  ;;  %v5384_v2 = vld [vmem:[#allocation16 + $0x144] ss:$20 sps:$4 sm:$0xff]  }
 0x5e0   :  { %4728 = vmatprep.subr.bf16.mxu0 %v5327_v4  ;;  %v5382_v4 = vld [vmem:[#allocation16 + $0x140] ss:$20 sps:$4 sm:$0xff]  }
 0x5e3   :  { %4729 = vmatpush3.bf16.msra.mxu0 %v5328_v6  ;;  %v5390_v6 = vld [vmem:[#allocation16 + $0x16c] ss:$20 sps:$4 sm:$0xff]  }
 0x5e4   :  { %4730 = vmatprep.subr.bf16.mxu0 %v5332_v9  ;;  %v5388_v9 = vld [vmem:[#allocation16 + $0x168] ss:$20 sps:$4 sm:$0xff]  }
 0x5e7   :  { %4731 = vmatpush3.bf16.msra.mxu0 %v5333_v11  ;;  %v5396_v11 = vld [vmem:[#allocation16 + $0x194] ss:$20 sps:$4 sm:$0xff]  }
 0x5e8   :  { %3452 = vmatprep.subr.bf16.mxu0 %v5336_v12  ;;  %v5399_v12 = vld [vmem:[#allocation16 + $0x19c] ss:$20 sps:$4 sm:$0xff]  }
 0x69d   :  { %v2212_v17 = vpop.f32.mrb[12].mxu0 }
 0x69e   :  { %v2213_v18 = vadd.f32 %v2212_v17, %v2091_v15  ;;  %v2214_v19 = vpop.f32.mrb[13].mxu0  ;;  %v5400_v17 = vld [vmem:[#allocation16 + $0x1b8] ss:$20 sps:$4 sm:$0xff]  }
 0x69f   :  { %v2215_v20 = vadd.f32 %v2214_v19, %v2095_v16  ;;  %v2216_v24 = vpop.f32.mrb[14].mxu0  ;;  %v5408_v19 = vld [vmem:[#allocation16 + $0x1e4] ss:$20 sps:$4 sm:$0xff]  }
 0x6a0   :  { %v2217_v25 = vadd.f32 %v2216_v24, %v2091_v15  ;;  %v2218_v26 = vpop.f32.mrb[15].mxu0  ;;  %v2221_v28 = vmax.f32 %v2213_v18, 0.0  ;;  %v5402_v15 = vld [vmem:[#allocation16 + $0x1bc] ss:$20 sps:$4 sm:$0xff]   ;;  %v5403_v18 = vld [vmem:[#allocation16 + $0x1c0] ss:$20 sps:$4 sm:$0xff]  }
 0x6a1   :  { %v2219_v27 = vadd.f32 %v2218_v26, %v2095_v16  ;;  %v2222_v30 = vmax.f32 %v2215_v20, 0.0  ;;  %v5405_v16 = vld [vmem:[#allocation16 + $0x1c4] ss:$20 sps:$4 sm:$0xff]   ;;  %v5411_v20 = vld [vmem:[#allocation16 + $0x1ec] ss:$20 sps:$4 sm:$0xff]  }
 0x6a2   :  { %v2223_v29 = vmax.f32 %v2217_v25, 0.0  ;;  %v5406_v24 = vld [vmem:[#allocation16 + $0x1e0] ss:$20 sps:$4 sm:$0xff]   ;;  %v5409_v25 = vld [vmem:[#allocation16 + $0x1e8] ss:$20 sps:$4 sm:$0xff]  }
 0x6a3   :  { %v2224_v31 = vmax.f32 %v2219_v27, 0.0  ;;  %v5414_v26 = vld [vmem:[#allocation16 + $0x20c] ss:$20 sps:$4 sm:$0xff]   ;;  %v5417_v27 = vld [vmem:[#allocation16 + $0x214] ss:$20 sps:$4 sm:$0xff]  }
 0x6a4   :  { %v2225_v32 = vpack.c.bf16 %v2223_v29, %v2221_v28  ;;  %v5412_v28 = vld [vmem:[#allocation16 + $0x208] ss:$20 sps:$4 sm:$0xff]   ;;  %v5415_v29 = vld [vmem:[#allocation16 + $0x210] ss:$20 sps:$4 sm:$0xff]  }
 0x6a5   :  { %v2226_v33 = vpack.c.bf16 %v2224_v31, %v2222_v30  ;;  %v5420_v30 = vld [vmem:[#allocation16 + $0x234] ss:$20 sps:$4 sm:$0xff]   ;;  %v5423_v31 = vld [vmem:[#allocation16 + $0x23c] ss:$20 sps:$4 sm:$0xff]  }
 0x6a7   :  { %2596 = vmatprep.mubr.bf16.mxu1 %v2226_v33  ;;  %2639 = vmatprep.mubr.bf16.mxu0 %v2226_v33  ;;  %v5421_v33 = vld [vmem:[#allocation16 + $0x238] ss:$20 sps:$4 sm:$0xff]  }
 0x6a8   :  { %2597 = vmatmul.mubr.bf16.vlgmr.msra.gmra.mrb[20].mxu1 %v2225_v32  ;;  %2640 = vmatmul.mubr.bf16.vlgmr.msra.gmra.mrb[16].mxu0 %v2225_v32  ;;  %v5418_v32 = vld [vmem:[#allocation16 + $0x230] ss:$20 sps:$4 sm:$0xff]  }
 0x6a9   :  { %3453 = vmatpush1.bf16.msra.mxu0 %v5334_v34  ;;  %3539 = vmatpush1.bf16.msra.mxu1 %v5337_v35  ;;  %v5426_v34 = vld [vmem:[#allocation16 + $0x25c] ss:$20 sps:$4 sm:$0xff]   ;;  %v5429_v35 = vld [vmem:[#allocation16 + $0x264] ss:$20 sps:$4 sm:$0xff]  }
 0x6aa   :  { %3454 = vmatprep.subr.bf16.mxu0 %v5342_v36  ;;  %3540 = vmatprep.subr.bf16.mxu1 %v5345_v37  ;;  %v5424_v36 = vld [vmem:[#allocation16 + $0x258] ss:$20 sps:$4 sm:$0xff]   ;;  %v5427_v37 = vld [vmem:[#allocation16 + $0x260] ss:$20 sps:$4 sm:$0xff]  }
 0x6ad   :  { %3455 = vmatpush1.bf16.msra.mxu0 %v5340_v38  ;;  %3541 = vmatpush1.bf16.msra.mxu1 %v5343_v39  ;;  %v5432_v38 = vld [vmem:[#allocation16 + $0x284] ss:$20 sps:$4 sm:$0xff]   ;;  %v5435_v39 = vld [vmem:[#allocation16 + $0x28c] ss:$20 sps:$4 sm:$0xff]  }
 0x6ae   :  { %3456 = vmatprep.subr.bf16.mxu0 %v5348_v40  ;;  %3542 = vmatprep.subr.bf16.mxu1 %v5351_v41  ;;  %v2291_v40 = vld [vmem:[%s6196_s10 + $0xa] sm:$0x7] }
 0x6af   :  { %v2296_v41 = vrot.slane %v2291_v40, %v6069_v21 }
 0x6b1   :  { %3457 = vmatpush1.bf16.msra.mxu0 %v5346_v42  ;;  %3543 = vmatpush1.bf16.msra.mxu1 %v5349_v43  ;;  %v2300_v42 = vrot.slane %v2291_v40, %v6072_v23 }
 0x6b2   :  { %3458 = vmatprep.subr.bf16.mxu0 %v5354_v44  ;;  %3544 = vmatprep.subr.bf16.mxu1 %v5357_v45  ;;  %v2304_v45 = vrot.slane %v2291_v40, %v6062_v51  ;;  %v5478_v40 = vld [vmem:[#allocation16 + $0x150] ss:$20 sps:$4 sm:$0xff]  }
 0x6b5   :  { %3459 = vmatpush1.bf16.msra.mxu0 %v5352_v46  ;;  %3545 = vmatpush1.bf16.msra.mxu1 %v5355_v47 }
 0x6b6   :  { %3460 = vmatprep.subr.bf16.mxu0 %v5360_v48  ;;  %3546 = vmatprep.subr.bf16.mxu1 %v5363_v49 }
 0x6b9   :  { %3461 = vmatpush1.bf16.msra.mxu0 %v5358_v52  ;;  %3547 = vmatpush1.bf16.msra.mxu1 %v5361_v53 }
 0x6ba   :  { %3462 = vmatprep.subr.bf16.mxu0 %v5366_v54  ;;  %3548 = vmatprep.subr.bf16.mxu1 %v5369_v55 }
 0x6bd   :  { %3463 = vmatpush1.bf16.msra.mxu0 %v5364_v56  ;;  %3549 = vmatpush1.bf16.msra.mxu1 %v5367_v57 }
 0x6be   :  { %3464 = vmatprep.subr.bf16.mxu0 %v5372_v58  ;;  %3550 = vmatprep.subr.bf16.mxu1 %v5375_v59 }
 0x6c1   :  { %3465 = vmatpush1.bf16.msra.mxu0 %v5370_v60  ;;  %3551 = vmatpush1.bf16.msra.mxu1 %v5373_v61 }
 0x6c2   :  { %3466 = vmatprep.subr.bf16.mxu0 %v5378_v62  ;;  %3552 = vmatprep.subr.bf16.mxu1 %v5381_v63 }
 0x6c5   :  { %3467 = vmatpush1.bf16.msra.mxu0 %v5376_v0  ;;  %3553 = vmatpush1.bf16.msra.mxu1 %v5379_v1 }
 0x6c6   :  { %3468 = vmatprep.subr.bf16.mxu0 %v5384_v2  ;;  %3554 = vmatprep.subr.bf16.mxu1 %v5387_v3 }
 0x6c9   :  { %3469 = vmatpush1.bf16.msra.mxu0 %v5382_v4  ;;  %3555 = vmatpush1.bf16.msra.mxu1 %v5385_v5 }
 0x6ca   :  { %3470 = vmatprep.subr.bf16.mxu0 %v5390_v6  ;;  %3556 = vmatprep.subr.bf16.mxu1 %v5393_v8  ;;  %v5430_v6 = vld [vmem:[#allocation16 + $0x280] ss:$20 sps:$4 sm:$0xff]   ;;  %v5433_v8 = vld [vmem:[#allocation16 + $0x288] ss:$20 sps:$4 sm:$0xff]  }
 0x6cd   :  { %3471 = vmatpush1.bf16.msra.mxu0 %v5388_v9  ;;  %3557 = vmatpush1.bf16.msra.mxu1 %v5391_v10  ;;  %v5438_v9 = vld [vmem:[#allocation16 + $0x2ac] ss:$20 sps:$4 sm:$0xff]   ;;  %v5441_v10 = vld [vmem:[#allocation16 + $0x2b4] ss:$20 sps:$4 sm:$0xff]  }
 0x6ce   :  { %3472 = vmatprep.subr.bf16.mxu0 %v5396_v11  ;;  %3558 = vmatprep.subr.bf16.mxu1 %v5399_v12  ;;  %v5436_v12 = vld [vmem:[#allocation16 + $0x2a8] ss:$20 sps:$4 sm:$0xff]  }
 0x6d1   :  { %3473 = vmatpush1.bf16.msra.mxu0 %v5394_v13  ;;  %3559 = vmatpush1.bf16.msra.mxu1 %v5397_v14  ;;  %v5439_v13 = vld [vmem:[#allocation16 + $0x2b0] ss:$20 sps:$4 sm:$0xff]   ;;  %v5444_v14 = vld [vmem:[#allocation16 + $0x2d4] ss:$20 sps:$4 sm:$0xff]  }
 0x6d2   :  { %3474 = vmatprep.subr.bf16.mxu0 %v5402_v15  ;;  %3560 = vmatprep.subr.bf16.mxu1 %v5405_v16  ;;  %v5447_v15 = vld [vmem:[#allocation16 + $0x2dc] ss:$20 sps:$4 sm:$0xff]  }
 0x6d3   :  { %v5442_v16 = vld [vmem:[#allocation16 + $0x2d0] ss:$20 sps:$4 sm:$0xff]  }
 0x6d5   :  { %3475 = vmatpush1.bf16.msra.mxu0 %v5400_v17  ;;  %3561 = vmatpush1.bf16.msra.mxu1 %v5403_v18  ;;  %v5445_v17 = vld [vmem:[#allocation16 + $0x2d8] ss:$20 sps:$4 sm:$0xff]   ;;  %v5450_v18 = vld [vmem:[#allocation16 + $0x2fc] ss:$20 sps:$4 sm:$0xff]  }
 0x6d6   :  { %3476 = vmatprep.subr.bf16.mxu0 %v5408_v19  ;;  %3562 = vmatprep.subr.bf16.mxu1 %v5411_v20  ;;  %v5453_v19 = vld [vmem:[#allocation16 + $0x304] ss:$20 sps:$4 sm:$0xff]  }
 0x6d7   :  { %v5448_v20 = vld [vmem:[#allocation16 + $0x2f8] ss:$20 sps:$4 sm:$0xff]  }
 0x6d9   :  { %3477 = vmatpush1.bf16.msra.mxu0 %v5406_v24  ;;  %3563 = vmatpush1.bf16.msra.mxu1 %v5409_v25  ;;  %v5451_v24 = vld [vmem:[#allocation16 + $0x300] ss:$20 sps:$4 sm:$0xff]   ;;  %v5456_v25 = vld [vmem:[#allocation16 + $0x324] ss:$20 sps:$4 sm:$0xff]  }
 0x6da   :  { %3478 = vmatprep.subr.bf16.mxu0 %v5414_v26  ;;  %3564 = vmatprep.subr.bf16.mxu1 %v5417_v27  ;;  %v5459_v26 = vld [vmem:[#allocation16 + $0x32c] ss:$20 sps:$4 sm:$0xff]  }
 0x6db   :  { %v5454_v27 = vld [vmem:[#allocation16 + $0x320] ss:$20 sps:$4 sm:$0xff]  }
 0x6dd   :  { %3479 = vmatpush1.bf16.msra.mxu0 %v5412_v28  ;;  %3565 = vmatpush1.bf16.msra.mxu1 %v5415_v29  ;;  %v5462_v28 = vld [vmem:[#allocation16 + $0x34c] ss:$20 sps:$4 sm:$0xff]   ;;  %v5465_v29 = vld [vmem:[#allocation16 + $0x354] ss:$20 sps:$4 sm:$0xff]  }
 0x6de   :  { %3480 = vmatprep.subr.bf16.mxu0 %v5420_v30  ;;  %3566 = vmatprep.subr.bf16.mxu1 %v5423_v31  ;;  %v5460_v30 = vld [vmem:[#allocation16 + $0x348] ss:$20 sps:$4 sm:$0xff]   ;;  %v5463_v31 = vld [vmem:[#allocation16 + $0x350] ss:$20 sps:$4 sm:$0xff]  }
 0x6e1   :  { %3481 = vmatpush1.bf16.msra.mxu0 %v5418_v32  ;;  %3567 = vmatpush1.bf16.msra.mxu1 %v5421_v33  ;;  %v5468_v32 = vld [vmem:[#allocation16 + $0x374] ss:$20 sps:$4 sm:$0xff]   ;;  %v5471_v33 = vld [vmem:[#allocation16 + $0x37c] ss:$20 sps:$4 sm:$0xff]  }
 0x6e2   :  { %3482 = vmatprep.subr.bf16.mxu0 %v5426_v34  ;;  %3568 = vmatprep.subr.bf16.mxu1 %v5429_v35  ;;  %v5466_v34 = vld [vmem:[#allocation16 + $0x370] ss:$20 sps:$4 sm:$0xff]   ;;  %v5469_v35 = vld [vmem:[#allocation16 + $0x378] ss:$20 sps:$4 sm:$0xff]  }
 0x6e5   :  { %3483 = vmatpush1.bf16.msra.mxu0 %v5424_v36  ;;  %3569 = vmatpush1.bf16.msra.mxu1 %v5427_v37  ;;  %v5474_v36 = vld [vmem:[#allocation16 + $0x39c] ss:$20 sps:$4 sm:$0xff]   ;;  %v5477_v37 = vld [vmem:[#allocation16 + $0x3a4] ss:$20 sps:$4 sm:$0xff]  }
 0x6e6   :  { %3495 = vmatprep.subr.bf16.mxu0 %v5432_v38  ;;  %3581 = vmatprep.subr.bf16.mxu1 %v5435_v39  ;;  %v5472_v38 = vld [vmem:[#allocation16 + $0x398] ss:$20 sps:$4 sm:$0xff]   ;;  %v5475_v39 = vld [vmem:[#allocation16 + $0x3a0] ss:$20 sps:$4 sm:$0xff]  }
 0x77b   :  { %v2598_v43 = vpop.f32.mrb[20].mxu1  ;;  %v4732_v44 = vpop.f32.mrb[16].mxu0 }
 0x77c   :  { %v2599_v46 = vadd.f32 %v2598_v43, %v2296_v41  ;;  %v2600_v47 = vpop.f32.mrb[21].mxu1  ;;  %v4733_v48 = vpop.f32.mrb[17].mxu0  ;;  %v5481_v43 = vld [vmem:[#allocation16 + $0x178] ss:$20 sps:$4 sm:$0xff]  }
 0x77d   :  { %v2601_v49 = vadd.f32 %v2600_v47, %v2300_v42  ;;  %v4734_v52 = vadd.f32 %v4733_v48, %v4732_v44  ;;  %v2602_v53 = vpop.f32.mrb[22].mxu1  ;;  %v4735_v54 = vpop.f32.mrb[18].mxu0  ;;  %v5482_v44 = vld [vmem:[#allocation16 + $0x38] ss:$20 sps:$4 sm:$0xff]   ;;  %v5485_v47 = vld [vmem:[#allocation16 + $0x60] ss:$20 sps:$4 sm:$0xff]  }
 0x77e   :  { %v2603_v55 = vadd.f32 %v2602_v53, %v2296_v41  ;;  %v2604_v56 = vpop.f32.mrb[23].mxu1  ;;  %v4736_v57 = vpop.f32.mrb[19].mxu0  ;;  %v2648_v61 = vmax.f32 %v2599_v46, 0.0  ;;  %v5479_v41 = vld [vmem:[#allocation16 + $0x10] ss:$20 sps:$4 sm:$0xff]  }
 0x77f   :  { %v2642_v58 = vadd.f32 %v4734_v52, %v2304_v45  ;;  %v2605_v59 = vadd.f32 %v2604_v56, %v2300_v42  ;;  %v4737_v60 = vadd.f32 %v4736_v57, %v4735_v54  ;;  %v2649_v63 = vmax.f32 %v2601_v49, 0.0  ;;  %v5480_v42 = vld [vmem:[#allocation16 + $0x290] ss:$20 sps:$4 sm:$0xff]   ;;  %v5484_v46 = vld [vmem:[#allocation16 + $0x1a0] ss:$20 sps:$4 sm:$0xff]  }
 0x780   :  { %v2651_v62 = vmax.f32 %v2603_v55, 0.0  ;;  %v5486_v48 = vld [vmem:[#allocation16 + $0x2e0] ss:$20 sps:$4 sm:$0xff]   ;;  %v5487_v49 = vld [vmem:[#allocation16 + $0x1c8] ss:$20 sps:$4 sm:$0xff]  }
 0x781   :  { %v2652_v0 = vmax.f32 %v2605_v59, 0.0  ;;  %v2645_v1 = vadd.f32 %v4737_v60, %v2304_v45  ;;  %v2650_v3 = vmax.f32 %v2642_v58, 0.0  ;;  %v5483_v45 = vld [vmem:[#allocation16 + $0x2b8] ss:$20 sps:$4 sm:$0xff]   ;;  %v5488_v52 = vld [vmem:[#allocation16 + $0x88] ss:$20 sps:$4 sm:$0xff]  }
 0x782   :  { %v6123_v2 = vpack.c.bf16 %v2651_v62, %v2648_v61  ;;  %v5489_v53 = vld [vmem:[#allocation16 + $0x308] ss:$20 sps:$4 sm:$0xff]   ;;  %v5490_v54 = vld [vmem:[#allocation16 + $0x1f0] ss:$20 sps:$4 sm:$0xff]   ;;  %v5493_v57 = vld [vmem:[#allocation16 + $0x218] ss:$20 sps:$4 sm:$0xff]  }
 0x783   :  { %v6125_v4 = vpack.c.bf16 %v2652_v0, %v2649_v63  ;;  %v2653_v5 = vmax.f32 %v2645_v1, 0.0  ;;  %v5491_v55 = vld [vmem:[#allocation16 + $0xb0] ss:$20 sps:$4 sm:$0xff]   ;;  %v5494_v58 = vld [vmem:[#allocation16 + $0xd8] ss:$20 sps:$4 sm:$0xff]  }
 0x784   :  { %v5492_v56 = vld [vmem:[#allocation16 + $0x330] ss:$20 sps:$4 sm:$0xff]   ;;  %v5495_v59 = vld [vmem:[#allocation16 + $0x358] ss:$20 sps:$4 sm:$0xff]   ;;  %v5496_v60 = vld [vmem:[#allocation16 + $0x240] ss:$20 sps:$4 sm:$0xff]  }
 0x785   :  { %v6127_v11 = vpack.c.bf16 %v2653_v5, %v2650_v3  ;;  %3484 = vmatprep.mubr.bf16.mxu0 %v6125_v4  ;;  %3570 = vmatprep.mubr.bf16.mxu1 %v6125_v4  ;;  %v5497_v61 = vld [vmem:[#allocation16 + $0x100] ss:$20 sps:$4 sm:$0xff]   ;;  %v5499_v63 = vld [vmem:[#allocation16 + $0x268] ss:$20 sps:$4 sm:$0xff]  }
 0x786   :  { %3485 = vmatmul.mubr.bf16.vlgmr.msra.gmra.mrb[20].mxu0 %v6123_v2  ;;  %3571 = vmatmul.mubr.bf16.vlgmr.msra.gmra.mrb[24].mxu1 %v6123_v2  ;;  %v5498_v62 = vld [vmem:[#allocation16 + $0x380] ss:$20 sps:$4 sm:$0xff]   ;;  %v5500_v0 = vld [vmem:[#allocation16 + $0x128] ss:$20 sps:$4 sm:$0xff]  }
 0x787   :  { %3496 = vmatpush1.bf16.msra.mxu0 %v5430_v6  ;;  %3582 = vmatpush1.bf16.msra.mxu1 %v5433_v8  ;;  %v5501_v1 = vld [vmem:[#allocation16 + $0x3a8] ss:$20 sps:$4 sm:$0xff]   ;;  %v5502_v3 = vld [vmem:[#allocation17 + $0x40] sm:$0xff]  }
 0x788   :  { %3497 = vmatprep.subr.bf16.mxu0 %v5438_v9  ;;  %3583 = vmatprep.subr.bf16.mxu1 %v5441_v10  ;;  %v5504_v5 = vld [vmem:[#allocation17] sm:$0xff]   ;;  %v5506_v8 = vld [vmem:[#allocation17 + $0x48] sm:$0xff]  }
 0x789   :  { %3527 = vmatprep.mubr.bf16.mxu0 %v5820_v7  ;;  %3613 = vmatprep.mubr.bf16.mxu1 %v5820_v7  ;;  %v5457_v7 = vld [vmem:[#allocation16 + $0x328] ss:$20 sps:$4 sm:$0xff]   ;;  %v5505_v6 = vld [vmem:[#allocation17 + $0x80] sm:$0xff]  }
 0x78a   :  { %v5507_v9 = vld [vmem:[#allocation17 + $0xc8] sm:$0xff]  }
 0x78b   :  { %3498 = vmatpush1.bf16.msra.mxu0 %v5436_v12  ;;  %3584 = vmatpush1.bf16.msra.mxu1 %v5439_v13  ;;  %v5508_v10 = vld [vmem:[#allocation17 + $0x8] sm:$0xff]   ;;  %v5510_v13 = vld [vmem:[#allocation17 + $0x50] sm:$0xff]  }
 0x78c   :  { %3499 = vmatprep.subr.bf16.mxu0 %v5444_v14  ;;  %3585 = vmatprep.subr.bf16.mxu1 %v5447_v15  ;;  %v5509_v12 = vld [vmem:[#allocation17 + $0x88] sm:$0xff]   ;;  %v5511_v14 = vld [vmem:[#allocation17 + $0xd0] sm:$0xff]  }
 0x78d   :  { %v5512_v15 = vld [vmem:[#allocation17 + $0x10] sm:$0xff]  }
 0x78f   :  { %3500 = vmatpush1.bf16.msra.mxu0 %v5442_v16  ;;  %3586 = vmatpush1.bf16.msra.mxu1 %v5445_v17  ;;  %v5513_v16 = vld [vmem:[#allocation17 + $0x90] sm:$0xff]   ;;  %v5514_v17 = vld [vmem:[#allocation17 + $0x58] sm:$0xff]  }
 0x790   :  { %3501 = vmatprep.subr.bf16.mxu0 %v5450_v18  ;;  %3587 = vmatprep.subr.bf16.mxu1 %v5453_v19  ;;  %v5515_v18 = vld [vmem:[#allocation17 + $0xd8] sm:$0xff]   ;;  %v5518_v19 = vld [vmem:[#allocation17 + $0x60] sm:$0xff]  }
 0x793   :  { %3502 = vmatpush1.bf16.msra.mxu0 %v5448_v20  ;;  %3588 = vmatpush1.bf16.msra.mxu1 %v5451_v24  ;;  %v5519_v20 = vld [vmem:[#allocation17 + $0xe0] sm:$0xff]  }
 0x794   :  { %3503 = vmatprep.subr.bf16.mxu0 %v5456_v25  ;;  %3589 = vmatprep.subr.bf16.mxu1 %v5459_v26  ;;  %v5520_v24 = vld [vmem:[#allocation17 + $0x20] sm:$0xff]   ;;  %v5522_v26 = vld [vmem:[#allocation17 + $0x68] sm:$0xff]  }
 0x795   :  { %v5521_v25 = vld [vmem:[#allocation17 + $0xa0] sm:$0xff]  }
 0x797   :  { %3504 = vmatpush1.bf16.msra.mxu0 %v5454_v27  ;;  %3590 = vmatpush1.bf16.msra.mxu1 %v5457_v7  ;;  %v5523_v27 = vld [vmem:[#allocation17 + $0xe8] sm:$0xff]  }
 0x798   :  { %3505 = vmatprep.subr.bf16.mxu0 %v5462_v28  ;;  %3591 = vmatprep.subr.bf16.mxu1 %v5465_v29  ;;  %v5524_v7 = vld [vmem:[#allocation17 + $0x28] sm:$0xff]   ;;  %v5526_v29 = vld [vmem:[#allocation17 + $0x70] sm:$0xff]  }
 0x799   :  { %v5525_v28 = vld [vmem:[#allocation17 + $0xa8] sm:$0xff]  }
 0x79b   :  { %3506 = vmatpush1.bf16.msra.mxu0 %v5460_v30  ;;  %3592 = vmatpush1.bf16.msra.mxu1 %v5463_v31  ;;  %v5527_v30 = vld [vmem:[#allocation17 + $0xf0] sm:$0xff]  }
 0x79c   :  { %3507 = vmatprep.subr.bf16.mxu0 %v5468_v32  ;;  %3593 = vmatprep.subr.bf16.mxu1 %v5471_v33  ;;  %v5528_v31 = vld [vmem:[#allocation17 + $0x30] sm:$0xff]   ;;  %v5530_v33 = vld [vmem:[#allocation17 + $0x78] sm:$0xff]  }
 0x79d   :  { %v5529_v32 = vld [vmem:[#allocation17 + $0xb0] sm:$0xff]  }
 0x79f   :  { %3508 = vmatpush1.bf16.msra.mxu0 %v5466_v34  ;;  %3594 = vmatpush1.bf16.msra.mxu1 %v5469_v35  ;;  %v5531_v34 = vld [vmem:[#allocation17 + $0xf8] sm:$0xff]  }
 0x7a0   :  { %3509 = vmatprep.subr.bf16.mxu0 %v5474_v36  ;;  %3595 = vmatprep.subr.bf16.mxu1 %v5477_v37  ;;  %v5532_v35 = vld [vmem:[#allocation17 + $0x38] sm:$0xff]  }
 0x7a1   :  { %v5533_v36 = vld [vmem:[#allocation17 + $0xb8] sm:$0xff]  }
 0x7a2   :  { %v2801_v37 = vld [vmem:[%s6196_s10 + $0xd] sm:$0x1f] }
 0x7a3   :  { %3510 = vmatpush1.bf16.msra.mxu0 %v5472_v38  ;;  %3596 = vmatpush1.bf16.msra.mxu1 %v5475_v39  ;;  %v2817_v38 = vsub.s32 3, %v6059_v50  ;;  %v2806_v39 = vrot.slane %v2801_v37, %v6069_v21 }
 0x7a4   :  { %4738 = vmatprep.subr.bf16.mxu0 %v5478_v40  ;;  %4882 = vmatprep.subr.bf16.mxu1 %v5818_v22  ;;  %v2814_v40 = vrot.slane %v2801_v37, %v6062_v51 }
 0x7a6   :  { %3528 = vmatmul.mubr.bf16.vlgmr.msra.gmra.mrb[20].mxu0 %v6127_v11  ;;  %3614 = vmatmul.mubr.bf16.vlgmr.msra.gmra.mrb[24].mxu1 %v6127_v11 }
 0x7a7   :  { %4739 = vmatpush3.bf16.msra.mxu0 %v5479_v41  ;;  %3656 = vmatprep.mubr.bf16.mxu0 %v6125_v4  ;;  %v5503_v4 = vld [vmem:[#allocation17 + $0xc0] sm:$0xff]   ;;  %v2810_v41 = vrot.slane %v2801_v37, %v6072_v23 }
 0x7a8   :  { %4883 = vmatpush3.bf16.msra.mxu1 %v5480_v42  ;;  %4740 = vmatprep.subr.bf16.mxu0 %v5481_v43  ;;  %v2818_v42 = vrot.slane %v2801_v37, %v2817_v38 }
 0x7a9   :  { %4884 = vmatprep.subr.bf16.mxu1 %v5818_v22  ;;  %4898 = vmatprep.mubr.msk.bf16.mxu1 %vm5819_vm0, %v5818_v22 }
 0x7ab   :  { %4741 = vmatpush3.bf16.msra.mxu0 %v5482_v44 }
 0x7ac   :  { %4885 = vmatpush3.bf16.msra.mxu1 %v5483_v45  ;;  %4742 = vmatprep.subr.bf16.mxu0 %v5484_v46 }
 0x7ad   :  { %4886 = vmatprep.subr.bf16.mxu1 %v5818_v22 }
 0x7af   :  { %4743 = vmatpush3.bf16.msra.mxu0 %v5485_v47 }
 0x7b0   :  { %4887 = vmatpush3.bf16.msra.mxu1 %v5486_v48  ;;  %4744 = vmatprep.subr.bf16.mxu0 %v5487_v49 }
 0x7b1   :  { %4888 = vmatprep.subr.bf16.mxu1 %v5818_v22 }
 0x7b3   :  { %4745 = vmatpush3.bf16.msra.mxu0 %v5488_v52 }
 0x7b4   :  { %4889 = vmatpush3.bf16.msra.mxu1 %v5489_v53  ;;  %4746 = vmatprep.subr.bf16.mxu0 %v5490_v54 }
 0x7b5   :  { %4890 = vmatprep.subr.bf16.mxu1 %v5818_v22 }
 0x7b7   :  { %4747 = vmatpush3.bf16.msra.mxu0 %v5491_v55 }
 0x7b8   :  { %4891 = vmatpush3.bf16.msra.mxu1 %v5492_v56  ;;  %4748 = vmatprep.subr.bf16.mxu0 %v5493_v57 }
 0x7b9   :  { %4892 = vmatprep.subr.bf16.mxu1 %v5818_v22 }
 0x7bb   :  { %4749 = vmatpush3.bf16.msra.mxu0 %v5494_v58 }
 0x7bc   :  { %4893 = vmatpush3.bf16.msra.mxu1 %v5495_v59  ;;  %4750 = vmatprep.subr.bf16.mxu0 %v5496_v60 }
 0x7bd   :  { %4894 = vmatprep.subr.bf16.mxu1 %v5818_v22 }
 0x7bf   :  { %4751 = vmatpush3.bf16.msra.mxu0 %v5497_v61 }
 0x7c0   :  { %4895 = vmatpush3.bf16.msra.mxu1 %v5498_v62  ;;  %4752 = vmatprep.subr.bf16.mxu0 %v5499_v63 }
 0x7c1   :  { %4896 = vmatprep.subr.bf16.mxu1 %v5818_v22 }
 0x7c3   :  { %4753 = vmatpush3.bf16.msra.mxu0 %v5500_v0 }
 0x7c4   :  { %4897 = vmatpush3.bf16.msra.mxu1 %v5501_v1  ;;  %4769 = vmatprep.subr.bf16.mxu0 %v5502_v3 }
 0x7c5   :  { %4791 = vmatprep.subr.bf16.mxu1 %v5503_v4 }
 0x7c6   :  { %3657 = vmatmul.mubr.bf16.vlgmr.msra.gmra.mrb[24].mxu0 %v6123_v2  ;;  %v5516_v2 = vld [vmem:[#allocation17 + $0x18] sm:$0xff]  }
 0x7c7   :  { %4899 = vmatmul.mubr.bf16.vlgmr.msra.gmra.mrb[28].mxu1 %v6127_v11  ;;  %4770 = vmatpush3.bf16.msra.mxu0 %v5504_v5  ;;  %v5517_v11 = vld [vmem:[#allocation17 + $0x98] sm:$0xff]  }
 0x7c8   :  { %4792 = vmatpush3.bf16.msra.mxu1 %v5505_v6  ;;  %4771 = vmatprep.subr.bf16.mxu0 %v5506_v8  ;;  %v5534_v8 = vld [vmem:[#allocation17 + $0x100] sm:$0xff]  }
 0x7c9   :  { %4793 = vmatprep.subr.bf16.mxu1 %v5507_v9  ;;  %v5535_v9 = vld [vmem:[#allocation17 + $0x108] sm:$0xff]  }
 0x7cb   :  { %4772 = vmatpush3.bf16.msra.mxu0 %v5508_v10  ;;  %v5536_v10 = vld [vmem:[#allocation17 + $0x110] sm:$0xff]  }
 0x7cc   :  { %4794 = vmatpush3.bf16.msra.mxu1 %v5509_v12  ;;  %4773 = vmatprep.subr.bf16.mxu0 %v5510_v13  ;;  %v5537_v12 = vld [vmem:[#allocation17 + $0x118] sm:$0xff]   ;;  %v5538_v13 = vld [vmem:[#allocation17 + $0x120] sm:$0xff]  }
 0x7cd   :  { %4795 = vmatprep.subr.bf16.mxu1 %v5511_v14  ;;  %v2821_v14 = vsub.s32 4, %v6059_v50  ;;  %v5541_v50 = vld [vmem:[#allocation17 + $0x138] sm:$0xff]  }
 0x7cf   :  { %4774 = vmatpush3.bf16.msra.mxu0 %v5512_v15  ;;  %v5539_v15 = vld [vmem:[#allocation17 + $0x128] sm:$0xff]  }
 0x7d0   :  { %4796 = vmatpush3.bf16.msra.mxu1 %v5513_v16  ;;  %4775 = vmatprep.subr.bf16.mxu0 %v5514_v17  ;;  %v2822_v17 = vrot.slane %v2801_v37, %v2821_v14  ;;  %v4582_v37 = vld [vmem:[%s6196_s10 + $0x12] ss:$0 sm:$0xff]  ;;  %s5762_s10 = scalar_lea.vmem %s4179_s3, 256 }
 0x7d1   :  { %4797 = vmatprep.subr.bf16.mxu1 %v5515_v18  ;;  %v5540_v18 = vld [vmem:[#allocation17 + $0x130] sm:$0xff]   ;;  %p5763_p10 = scmp.ne.s32.totalorder %s4179_s3, %s5762_s10  ;;  %p5768_p12 = scmp.lt.s32.totalorder %s5762_s10, %s5762_s10 }
 0x7d3   :  { %4776 = vmatpush3.bf16.msra.mxu0 %v5516_v2  ;;  %p5769_p13 = por %p5768_p12, %p5767_p11 }
 0x7d4   :  { %4798 = vmatpush3.bf16.msra.mxu1 %v5517_v11  ;;  %4777 = vmatprep.subr.bf16.mxu0 %v5518_v19 }
 0x7d5   :  { %4799 = vmatprep.subr.bf16.mxu1 %v5519_v20  ;;  %p5770_p0 = pnand %p5769_p13, %p5763_p10 }
 0x7d7   :  { %4778 = vmatpush3.bf16.msra.mxu0 %v5520_v24 }
 0x7d8   :  { %4800 = vmatpush3.bf16.msra.mxu1 %v5521_v25  ;;  %4779 = vmatprep.subr.bf16.mxu0 %v5522_v26 }
 0x7d9   :  { %4801 = vmatprep.subr.bf16.mxu1 %v5523_v27 }
 0x7db   :  { %4780 = vmatpush3.bf16.msra.mxu0 %v5524_v7 }
 0x7dc   :  { %4802 = vmatpush3.bf16.msra.mxu1 %v5525_v28  ;;  %4781 = vmatprep.subr.bf16.mxu0 %v5526_v29 }
 0x7dd   :  { %4803 = vmatprep.subr.bf16.mxu1 %v5527_v30 }
 0x7df   :  { %4782 = vmatpush3.bf16.msra.mxu0 %v5528_v31 }
 0x7e0   :  { %4804 = vmatpush3.bf16.msra.mxu1 %v5529_v32  ;;  %4783 = vmatprep.subr.bf16.mxu0 %v5530_v33 }
 0x7e1   :  { %4805 = vmatprep.subr.bf16.mxu1 %v5531_v34 }
 0x7e3   :  { %4784 = vmatpush3.bf16.msra.mxu0 %v5532_v35 }
 0x7e4   :  { %4806 = vmatpush3.bf16.msra.mxu1 %v5533_v36  ;;  %4902 = vmatprep.subr.bf16.mxu0 %v5818_v22 }
 0x879   :  { %v3529_v43 = vpop.f32.mrb[20].mxu0  ;;  %v3615_v44 = vpop.f32.mrb[24].mxu1 }
 0x87a   :  { %v4930_v45 = vadd.f32 %v3529_v43, %v2806_v39  ;;  %v4934_v46 = vadd.f32 %v3615_v44, %v2814_v40  ;;  %v3531_v47 = vpop.f32.mrb[21].mxu0  ;;  %v3617_v48 = vpop.f32.mrb[25].mxu1 }
 0x87b   :  { %v4931_v49 = vadd.f32 %v3531_v47, %v2810_v41  ;;  %v4935_v52 = vadd.f32 %v3617_v48, %v2818_v42  ;;  %v3533_v53 = vpop.f32.mrb[22].mxu0  ;;  %v3619_v54 = vpop.f32.mrb[26].mxu1 }
 0x87c   :  { %v4932_v55 = vadd.f32 %v3533_v53, %v2806_v39  ;;  %v4936_v56 = vadd.f32 %v3619_v54, %v2814_v40  ;;  %v3535_v57 = vpop.f32.mrb[23].mxu0  ;;  %v3621_v58 = vpop.f32.mrb[27].mxu1  ;;  %v3706_v51 = vmax.f32 %v4930_v45, 0.0  ;;  %v3708_v60 = vmax.f32 %v4934_v46, 0.0 }
 0x87d   :  { %v4933_v21 = vadd.f32 %v3535_v57, %v2810_v41  ;;  %v4937_v59 = vadd.f32 %v3621_v58, %v2818_v42  ;;  %v3707_v62 = vmax.f32 %v4931_v49, 0.0  ;;  %v3709_v63 = vmax.f32 %v4935_v52, 0.0 }
 0x87e   :  { %v3711_v23 = vmax.f32 %v4932_v55, 0.0  ;;  %v3713_v61 = vmax.f32 %v4936_v56, 0.0 }
 0x87f   :  { %v3712_v0 = vmax.f32 %v4933_v21, 0.0  ;;  %v3714_v1 = vmax.f32 %v4937_v59, 0.0 }
 0x880   :  { %v3716_v3 = vpack.c.bf16 %v3711_v23, %v3706_v51  ;;  %v3718_v4 = vpack.c.bf16 %v3713_v61, %v3708_v60 }
 0x881   :  { %v3717_v5 = vpack.c.bf16 %v3712_v0, %v3707_v62  ;;  %v3719_v6 = vpack.c.bf16 %v3714_v1, %v3709_v63 }
 0x883   :  { %4080 = vmatprep.mubr.bf16.mxu0 %v3717_v5  ;;  %4121 = vmatprep.mubr.bf16.mxu1 %v3719_v6 }
 0x884   :  { %4081 = vmatmul.mubr.bf16.vlgmr.msra.gmra.mrb[28].mxu0 %v3716_v3  ;;  %4122 = vmatmul.mubr.bf16.vlgmr.msra.gmra.mrb[32].mxu1 %v3718_v4 }
 0x885   :  { %4903 = vmatpush3.bf16.msra.mxu0 %v5534_v8  ;;  %4918 = vmatprep.mubr.msk.bf16.mxu0 %vm5819_vm0, %v5818_v22 }
 0x886   :  { %4904 = vmatprep.subr.bf16.mxu0 %v5818_v22 }
 0x889   :  { %4905 = vmatpush3.bf16.msra.mxu0 %v5535_v9 }
 0x88a   :  { %4906 = vmatprep.subr.bf16.mxu0 %v5818_v22 }
 0x88d   :  { %4907 = vmatpush3.bf16.msra.mxu0 %v5536_v10 }
 0x88e   :  { %4908 = vmatprep.subr.bf16.mxu0 %v5818_v22 }
 0x891   :  { %4909 = vmatpush3.bf16.msra.mxu0 %v5537_v12 }
 0x892   :  { %4910 = vmatprep.subr.bf16.mxu0 %v5818_v22 }
 0x895   :  { %4911 = vmatpush3.bf16.msra.mxu0 %v5538_v13 }
 0x896   :  { %4912 = vmatprep.subr.bf16.mxu0 %v5818_v22 }
 0x899   :  { %v4754_v16 = vpop.f32.mrb[24].mxu0  ;;  %4913 = vmatpush3.bf16.msra.mxu0 %v5539_v15 }
 0x89a   :  { %v3699_v2 = vpop.f32.mrb[28].mxu1  ;;  %v4755_v11 = vpop.f32.mrb[25].mxu0  ;;  %4914 = vmatprep.subr.bf16.mxu0 %v5818_v22 }
 0x89b   :  { %v4756_v19 = vadd.f32 %v4755_v11, %v4754_v16  ;;  %v4900_v20 = vpop.f32.mrb[29].mxu1  ;;  %v4757_v24 = vpop.f32.mrb[26].mxu0 }
 0x89c   :  { %v3702_v25 = vpop.f32.mrb[30].mxu1  ;;  %v4758_v26 = vpop.f32.mrb[27].mxu0 }
 0x89d   :  { %v3659_v27 = vadd.f32 %v4756_v19, %v2822_v17  ;;  %v4759_v7 = vadd.f32 %v4758_v26, %v4757_v24  ;;  %v4901_v28 = vpop.f32.mrb[31].mxu1  ;;  %4915 = vmatpush3.bf16.msra.mxu0 %v5540_v18 }
 0x89e   :  { %4916 = vmatprep.subr.bf16.mxu0 %v5818_v22 }
 0x89f   :  { %v3700_v29 = vadd.f32 %v3699_v2, %v3659_v27  ;;  %v3662_v30 = vadd.f32 %v4759_v7, %v2822_v17 }
 0x8a1   :  { %v3703_v31 = vadd.f32 %v3702_v25, %v3662_v30  ;;  %4917 = vmatpush3.bf16.msra.mxu0 %v5541_v50  ;;  %v3710_v32 = vmax.f32 %v3700_v29, 0.0 }
 0x8a3   :  { %v3715_v33 = vmax.f32 %v3703_v31, 0.0 }
 0x8a5   :  { %v3720_v34 = vpack.c.bf16 %v3715_v33, %v3710_v32 }
 0x8a7   :  { %4919 = vmatmul.mubr.bf16.vlgmr.msra.gmra.mrb[32].mxu0 %v3720_v34 }
 0x957   :  { %v4785_v35 = vpop.f32.mrb[28].mxu0  ;;  %v4807_v36 = vpop.f32.mrb[32].mxu1 }
 0x958   :  { %v4786_v38 = vpop.f32.mrb[29].mxu0  ;;  %v4808_v39 = vpop.f32.mrb[33].mxu1 }
 0x959   :  { %v4787_v40 = vadd.f32 %v4786_v38, %v4785_v35  ;;  %v4809_v41 = vadd.f32 %v4808_v39, %v4807_v36  ;;  %v4788_v42 = vpop.f32.mrb[30].mxu0  ;;  %v4810_v22 = vpop.f32.mrb[34].mxu1 }
 0x95a   :  { %v4789_v43 = vpop.f32.mrb[31].mxu0  ;;  %v4811_v44 = vpop.f32.mrb[35].mxu1 }
 0x95b   :  { %v4083_v45 = vadd.f32 %v4787_v40, %v4582_v37  ;;  %v4790_v46 = vadd.f32 %v4789_v43, %v4788_v42  ;;  %v4812_v47 = vadd.f32 %v4811_v44, %v4810_v22 }
 0x95d   :  { %v4086_v48 = vadd.f32 %v4790_v46, %v4582_v37  ;;  %v4124_v49 = vadd.f32 %v4809_v41, %v4083_v45 }
 0x95f   :  { %v4127_v52 = vadd.f32 %v4812_v47, %v4086_v48 }
 0x97a   :  { %v4164_v53 = vpop.f32.mrb[32].mxu0 }
 0x97b   :  { %v4165_v54 = vadd.f32 %v4164_v53, %v4124_v49  ;;  %v4920_v55 = vpop.f32.mrb[33].mxu0 }
 0x97c   :  { %v4167_v56 = vpop.f32.mrb[34].mxu0 }
 0x97d   :  { %4171 = vst [vmem:[#allocation19] sm:$0xff] %v4165_v54  ;;  %v4168_v57 = vadd.f32 %v4167_v56, %v4127_v52  ;;  %v4921_v58 = vpop.f32.mrb[35].mxu0 }
 0x97f   :  { %4172 = vst [vmem:[#allocation19 + $0x8] sm:$0xff] %v4168_v57 }
 0x980   :  { %5773 = shalt.err (!%p5770_p0)
}
 0x981   :  { %s5774_s4 = scalar_lea.hbm %s6197_s11, 256 }
 0x982   :  { %p5775_p1 = scmp.ne.s32.totalorder %s6197_s11, %s5774_s4  ;;  %p5778_p2 = scmp.lt.u32.totalorder %s5774_s4, %s6197_s11 }
 0x984   :  { %p5780_p3 = pnand %p5778_p2, %p5775_p1 }
 0x986   :  { %5783 = shalt.err (!%p5780_p3)
}
 0x987   :  { %4184 = dma.vmem_to_hbm [thread:$0]  %s4179_s3, 256, %s6197_s11, [#allocation4], %s5810_s0, %s5810_s0, %s5811_s17  }
 0x988   :  { %5796 = dma.done.wait [#allocation4], 256  }
 0x989   :  { %5797 = vsyncadd [#allocation4], 4294967040 }
 0x98a   :  { %4188 = vsyncpa [#allocation3], 1 }
 0x98b   :  { %4189 = vsyncpa [#allocation6], 1 }
 0x98c   :  { %4190 = vsyncpa [#allocation9], 1 }
 0x98d   :  { %4191 = vsyncpa [#allocation12], 1 }
 0x98e   :  { %4192 = vsyncpa [#allocation15], 1 }
 0x98f   :  { %4193 = vsyncpa [#allocation18], 1 }
 0x990   :  { %4194 = vsyncpa [#allocation4], 1 }

// kernel: tpu_custom_call.1
= control target key start
LH: loop header
LB: loop body
LE: loop exit
PB: predicated region body
PF: predicated region fallthrough
CT: control target
= control target key end

     0   :  { %16 = vsyncpa [#allocation3], 0  ;;  %s6186_s0 = inlined_call_operand.hbm [shape: f32[16,640], index: 0, kind: input, shape index: {}]   ;;  %s6187_s1 = inlined_call_operand.hbm [shape: bf16[640,384], index: 1, kind: input, shape index: {}]   ;;  %s6188_s2 = inlined_call_operand.hbm [shape: bf16[384,256], index: 2, kind: input, shape index: {}]   ;;  %s6189_s3 = inlined_call_operand.hbm [shape: bf16[256,128], index: 3, kind: input, shape index: {}]   ;;  %s6190_s4 = inlined_call_operand.hbm [shape: bf16[128,128], index: 4, kind: input, shape index: {}]   ;;  %s6191_s5 = inlined_call_operand.hbm [shape: bf16[128,128], index: 5, kind: input, shape index: {}]   ;;  %s6192_s6 = inlined_call_operand.hbm [shape: bf16[128,256], index: 6, kind: input, shape index: {}]   ;;  %s6193_s7 = inlined_call_operand.hbm [shape: bf16[256,384], index: 7, kind: input, shape index: {}]   ;;  %s6194_s8 = inlined_call_operand.hbm [shape: bf16[384,640], index: 8, kind: input, shape index: {}]   ;;  %s6195_s9 = inlined_call_operand.hbm [shape: bf16[640,128], index: 9, kind: input, shape index: {}]   ;;  %s6196_s10 = inlined_call_operand.vmem [shape: f32[1,2432], index: 10, kind: input, shape index: {}]   ;;  %s6197_s11 = inlined_call_operand.hbm [shape: f32[16,128], index: 11, kind: output, shape index: {}]  }
   0x1   :  { %17 = vsyncpa [#allocation6], 0 }
   0x2   :  { %18 = vsyncpa [#allocation9], 0 }
   0x3   :  { %19 = vsyncpa [#allocation12], 0 }
   0x4   :  { %20 = vsyncpa [#allocation15], 0 }
   0x5   :  { %21 = vsyncpa [#allocation18], 0 }
   0x6   :  { %22 = vsyncpa [#allocation4], 0  ;;  %s5798_s17 = smov [#allocation5]   ;;  %s5542_s21 = scalar_lea.hbm %s6187_s1, 15360 }
   0x7   :  { %s40_s18 = sshll.u32 %s5798_s17, 4  ;;  %p5543_p0 = scmp.ne.s32.totalorder %s6187_s1, %s5542_s21  ;;  %s41_s18 = int_to_ptr.vmem [resolvable:$true] %s40_s18 }
   0x8   :  { %p5546_p1 = scmp.lt.u32.totalorder %s5542_s21, %s6187_s1 }
   0xa   :  { %p5548_p2 = pnand %p5546_p1, %p5543_p0 }
   0xc   :  { %5551 = shalt.err (!%p5548_p2)
}
   0xd   :  { %s5552_s26 = scalar_lea.vmem %s41_s18, 15360  ;;  %p5557_p4 = scmp.lt.s32.totalorder %s41_s18, %s41_s18 }
   0xe   :  { %p5553_p3 = scmp.ne.s32.totalorder %s41_s18, %s5552_s26  ;;  %p5558_p5 = scmp.lt.s32.totalorder %s5552_s26, %s5552_s26 }
  0x10   :  { %p5559_p6 = por %p5558_p5, %p5557_p4 }
  0x12   :  { %p5560_p7 = pnand %p5559_p6, %p5553_p3 }
  0x14   :  { %5563 = shalt.err (!%p5560_p7)
}
  0x15   :  { %s5799_s27 = smov 192   ;;  %s5800_s28 = smov 12  }
  0x16   :  { %46 = dma.hbm_to_vmem [thread:$0]  %s6187_s1, 15360, %s41_s18, [#allocation6], %s5799_s27, %s5799_s27, %s5800_s28  }
  0x17   :  { %s5801_s12 = smov [#allocation8]   ;;  %s5564_s16 = scalar_lea.hbm %s6189_s3, 2048 }
  0x18   :  { %s64_s13 = sshll.u32 %s5801_s12, 4  ;;  %p5565_p8 = scmp.ne.s32.totalorder %s6189_s3, %s5564_s16  ;;  %s65_s13 = int_to_ptr.vmem [resolvable:$true] %s64_s13 }
  0x19   :  { %p5568_p9 = scmp.lt.u32.totalorder %s5564_s16, %s6189_s3 }
  0x1b   :  { %p5570_p10 = pnand %p5568_p9, %p5565_p8 }
  0x1d   :  { %5573 = shalt.err (!%p5570_p10)
}
  0x1e   :  { %s5574_s22 = scalar_lea.vmem %s65_s13, 2048  ;;  %p5579_p12 = scmp.lt.s32.totalorder %s65_s13, %s65_s13 }
  0x1f   :  { %p5575_p11 = scmp.ne.s32.totalorder %s65_s13, %s5574_s22  ;;  %p5580_p13 = scmp.lt.s32.totalorder %s5574_s22, %s5574_s22 }
  0x21   :  { %p5581_p0 = por %p5580_p13, %p5579_p12 }
  0x23   :  { %p5582_p1 = pnand %p5581_p0, %p5575_p11 }
  0x25   :  { %5585 = shalt.err (!%p5582_p1)
}
  0x26   :  { %s5802_s1 = smov 64   ;;  %s5803_s18 = smov 4  }
  0x27   :  { %70 = dma.hbm_to_vmem [thread:$0]  %s6189_s3, 2048, %s65_s13, [#allocation9], %s5802_s1, %s5802_s1, %s5803_s18  }
  0x28   :  { %s5804_s25 = smov [#allocation11]   ;;  %s5805_s29 = smov [#allocation14]  }
  0x29   :  { %s88_s26 = sshll.u32 %s5804_s25, 4  ;;  %s112_s30 = sshll.u32 %s5805_s29, 4  ;;  %s89_s26 = int_to_ptr.vmem [resolvable:$true] %s88_s26  ;;  %s5912_s30 = int_to_ptr.vmem [resolvable:$true] %s112_s30 }
  0x2a   :  { %s5586_s15 = scalar_lea.hbm %s6191_s5, 1024 }
  0x2b   :  { %p5587_p2 = scmp.ne.s32.totalorder %s6191_s5, %s5586_s15  ;;  %p5590_p3 = scmp.lt.u32.totalorder %s5586_s15, %s6191_s5 }
  0x2d   :  { %p5592_p4 = pnand %p5590_p3, %p5587_p2 }
  0x2f   :  { %5595 = shalt.err (!%p5592_p4)
}
  0x30   :  { %s5596_s3 = scalar_lea.vmem %s89_s26, 1024  ;;  %p5601_p6 = scmp.lt.s32.totalorder %s89_s26, %s89_s26 }
  0x31   :  { %p5597_p5 = scmp.ne.s32.totalorder %s89_s26, %s5596_s3  ;;  %p5602_p7 = scmp.lt.s32.totalorder %s5596_s3, %s5596_s3 }
  0x33   :  { %p5603_p8 = por %p5602_p7, %p5601_p6 }
  0x35   :  { %p5604_p9 = pnand %p5603_p8, %p5597_p5 }
  0x37   :  { %5607 = shalt.err (!%p5604_p9)
}
  0x38   :  { %94 = dma.hbm_to_vmem [thread:$0]  %s6191_s5, 1024, %s89_s26, [#allocation12], %s5802_s1, %s5802_s1, %s5803_s18  }
  0x39   :  { %s5608_s24 = scalar_lea.hbm %s6193_s7, 6144 }
  0x3a   :  { %p5609_p10 = scmp.ne.s32.totalorder %s6193_s7, %s5608_s24  ;;  %p5612_p11 = scmp.lt.u32.totalorder %s5608_s24, %s6193_s7 }
  0x3c   :  { %p5614_p12 = pnand %p5612_p11, %p5609_p10 }
  0x3e   :  { %5617 = shalt.err (!%p5614_p12)
}
  0x3f   :  { %s5618_s15 = scalar_lea.vmem %s5912_s30, 6144  ;;  %p5623_p0 = scmp.lt.s32.totalorder %s5912_s30, %s5912_s30 }
  0x40   :  { %p5619_p13 = scmp.ne.s32.totalorder %s5912_s30, %s5618_s15  ;;  %p5624_p1 = scmp.lt.s32.totalorder %s5618_s15, %s5618_s15 }
  0x42   :  { %p5625_p2 = por %p5624_p1, %p5623_p0 }
  0x44   :  { %p5626_p3 = pnand %p5625_p2, %p5619_p13 }
  0x46   :  { %5629 = shalt.err (!%p5626_p3)
}
  0x47   :  { %118 = dma.hbm_to_vmem [thread:$0]  %s6193_s7, 6144, %s5912_s30, [#allocation15], %s5799_s27, %s5799_s27, %s5800_s28  }
  0x48   :  { %s5806_s16 = smov [#allocation2]   ;;  %s5630_s3 = scalar_lea.hbm %s6186_s0, 1280 }
  0x49   :  { %s28_s17 = sshll.u32 %s5806_s16, 4  ;;  %p5631_p4 = scmp.ne.s32.totalorder %s6186_s0, %s5630_s3  ;;  %s29_s17 = int_to_ptr.vmem [resolvable:$true] %s28_s17 }
  0x4a   :  { %p5634_p5 = scmp.lt.u32.totalorder %s5630_s3, %s6186_s0 }
  0x4c   :  { %p5636_p6 = pnand %p5634_p5, %p5631_p4 }
  0x4e   :  { %5639 = shalt.err (!%p5636_p6)
}
  0x4f   :  { %s5640_s24 = scalar_lea.vmem %s29_s17, 1280  ;;  %p5645_p8 = scmp.lt.s32.totalorder %s29_s17, %s29_s17 }
  0x50   :  { %p5641_p7 = scmp.ne.s32.totalorder %s29_s17, %s5640_s24  ;;  %p5646_p9 = scmp.lt.s32.totalorder %s5640_s24, %s5640_s24 }
  0x52   :  { %p5647_p10 = por %p5646_p9, %p5645_p8 }
  0x54   :  { %p5648_p11 = pnand %p5647_p10, %p5641_p7 }
  0x56   :  { %5651 = shalt.err (!%p5648_p11)
}
  0x57   :  { %s5807_s7 = smov 640   ;;  %s5808_s27 = smov 40  }
  0x58   :  { %34 = dma.hbm_to_vmem [thread:$0]  %s6186_s0, 1280, %s29_s17, [#allocation3], %s5807_s7, %s5807_s7, %s5808_s27  }
  0x59   :  { %s5809_s25 = smov [#allocation7]   ;;  %s5652_s15 = scalar_lea.hbm %s6188_s2, 6144 }
  0x5a   :  { %s52_s29 = sshll.u32 %s5809_s25, 4  ;;  %p5653_p12 = scmp.ne.s32.totalorder %s6188_s2, %s5652_s15  ;;  %s53_s29 = int_to_ptr.vmem [resolvable:$true] %s52_s29 }
  0x5b   :  { %p5656_p13 = scmp.lt.u32.totalorder %s5652_s15, %s6188_s2 }
  0x5d   :  { %p5658_p0 = pnand %p5656_p13, %p5653_p12 }
  0x5f   :  { %5661 = shalt.err (!%p5658_p0)
}
  0x60   :  { %s5662_s20 = scalar_lea.vmem %s53_s29, 6144  ;;  %p5667_p2 = scmp.lt.s32.totalorder %s53_s29, %s53_s29 }
  0x61   :  { %p5663_p1 = scmp.ne.s32.totalorder %s53_s29, %s5662_s20  ;;  %p5668_p3 = scmp.lt.s32.totalorder %s5662_s20, %s5662_s20 }
  0x63   :  { %p5669_p4 = por %p5668_p3, %p5667_p2 }
  0x65   :  { %p5670_p5 = pnand %p5669_p4, %p5663_p1 }
  0x67   :  { %5673 = shalt.err (!%p5670_p5)
}
  0x68   :  { %s5810_s0 = smov 128   ;;  %s5811_s17 = smov 8  }
  0x69   :  { %58 = dma.hbm_to_vmem [thread:$0]  %s6188_s2, 6144, %s53_s29, [#allocation6], %s5810_s0, %s5810_s0, %s5811_s17  }
  0x6a   :  { %s5812_s21 = smov [#allocation10]   ;;  %s5813_s23 = smov [#allocation13]  }
  0x6b   :  { %s76_s22 = sshll.u32 %s5812_s21, 4  ;;  %s100_s24 = sshll.u32 %s5813_s23, 4  ;;  %s77_s22 = int_to_ptr.vmem [resolvable:$true] %s76_s22  ;;  %s5976_s24 = int_to_ptr.vmem [resolvable:$true] %s100_s24 }
  0x6c   :  { %s5674_s28 = scalar_lea.hbm %s6190_s4, 1024 }
  0x6d   :  { %p5675_p6 = scmp.ne.s32.totalorder %s6190_s4, %s5674_s28  ;;  %p5678_p7 = scmp.lt.u32.totalorder %s5674_s28, %s6190_s4 }
  0x6f   :  { %p5680_p8 = pnand %p5678_p7, %p5675_p6 }
  0x71   :  { %5683 = shalt.err (!%p5680_p8)
}
  0x72   :  { %s5684_s2 = scalar_lea.vmem %s77_s22, 1024  ;;  %p5689_p10 = scmp.lt.s32.totalorder %s77_s22, %s77_s22 }
  0x73   :  { %p5685_p9 = scmp.ne.s32.totalorder %s77_s22, %s5684_s2  ;;  %p5690_p11 = scmp.lt.s32.totalorder %s5684_s2, %s5684_s2 }
  0x75   :  { %p5691_p12 = por %p5690_p11, %p5689_p10 }
  0x77   :  { %p5692_p13 = pnand %p5691_p12, %p5685_p9 }
  0x79   :  { %5695 = shalt.err (!%p5692_p13)
}
  0x7a   :  { %82 = dma.hbm_to_vmem [thread:$0]  %s6190_s4, 1024, %s77_s22, [#allocation9], %s5802_s1, %s5802_s1, %s5803_s18  }
  0x7b   :  { %s5696_s16 = scalar_lea.hbm %s6192_s6, 2048 }
  0x7c   :  { %p5697_p0 = scmp.ne.s32.totalorder %s6192_s6, %s5696_s16  ;;  %p5700_p1 = scmp.lt.u32.totalorder %s5696_s16, %s6192_s6 }
  0x7e   :  { %p5702_p2 = pnand %p5700_p1, %p5697_p0 }
  0x80   :  { %5705 = shalt.err (!%p5702_p2)
}
  0x81   :  { %s5706_s21 = scalar_lea.vmem %s5976_s24, 2048  ;;  %p5711_p4 = scmp.lt.s32.totalorder %s5976_s24, %s5976_s24 }
  0x82   :  { %p5707_p3 = scmp.ne.s32.totalorder %s5976_s24, %s5706_s21  ;;  %p5712_p5 = scmp.lt.s32.totalorder %s5706_s21, %s5706_s21 }
  0x84   :  { %p5713_p6 = por %p5712_p5, %p5711_p4 }
  0x86   :  { %p5714_p7 = pnand %p5713_p6, %p5707_p3 }
  0x88   :  { %5717 = shalt.err (!%p5714_p7)
}
  0x89   :  { %106 = dma.hbm_to_vmem [thread:$0]  %s6192_s6, 2048, %s5976_s24, [#allocation12], %s5810_s0, %s5810_s0, %s5811_s17  }
  0x8a   :  { %s5814_s23 = smov [#allocation16]   ;;  %s5718_s30 = scalar_lea.hbm %s6194_s8, 15360 }
  0x8b   :  { %s124_s7 = sshll.u32 %s5814_s23, 4  ;;  %p5719_p8 = scmp.ne.s32.totalorder %s6194_s8, %s5718_s30  ;;  %s125_s7 = int_to_ptr.vmem [resolvable:$true] %s124_s7 }
  0x8c   :  { %p5722_p9 = scmp.lt.u32.totalorder %s5718_s30, %s6194_s8 }
  0x8e   :  { %p5724_p10 = pnand %p5722_p9, %p5719_p8 }
  0x90   :  { %5727 = shalt.err (!%p5724_p10)
}
  0x91   :  { %s5728_s29 = scalar_lea.vmem %s125_s7, 15360  ;;  %p5733_p12 = scmp.lt.s32.totalorder %s125_s7, %s125_s7 }
  0x92   :  { %p5729_p11 = scmp.ne.s32.totalorder %s125_s7, %s5728_s29  ;;  %p5734_p13 = scmp.lt.s32.totalorder %s5728_s29, %s5728_s29 }
  0x94   :  { %p5735_p0 = por %p5734_p13, %p5733_p12 }
  0x96   :  { %p5736_p1 = pnand %p5735_p0, %p5729_p11 }
  0x98   :  { %5739 = shalt.err (!%p5736_p1)
}
  0x99   :  { %s5815_s6 = smov 320   ;;  %s5816_s24 = smov 20  }
  0x9a   :  { %130 = dma.hbm_to_vmem [thread:$0]  %s6194_s8, 15360, %s125_s7, [#allocation15], %s5815_s6, %s5815_s6, %s5816_s24  }
  0x9b   :  { %s5817_s26 = smov [#allocation17]   ;;  %s5740_s3 = scalar_lea.hbm %s6195_s9, 5120 }
  0x9c   :  { %s136_s16 = sshll.u32 %s5817_s26, 4  ;;  %p5741_p2 = scmp.ne.s32.totalorder %s6195_s9, %s5740_s3  ;;  %s137_s16 = int_to_ptr.vmem [resolvable:$true] %s136_s16 }
  0x9d   :  { %p5744_p3 = scmp.lt.u32.totalorder %s5740_s3, %s6195_s9 }
  0x9f   :  { %p5746_p4 = pnand %p5744_p3, %p5741_p2 }
  0xa1   :  { %5749 = shalt.err (!%p5746_p4)
}
  0xa2   :  { %s5750_s23 = scalar_lea.vmem %s137_s16, 5120  ;;  %p5755_p6 = scmp.lt.s32.totalorder %s137_s16, %s137_s16 }
  0xa3   :  { %p5751_p5 = scmp.ne.s32.totalorder %s137_s16, %s5750_s23  ;;  %p5756_p7 = scmp.lt.s32.totalorder %s5750_s23, %s5750_s23 }
  0xa5   :  { %p5757_p8 = por %p5756_p7, %p5755_p6 }
  0xa7   :  { %p5758_p9 = pnand %p5757_p8, %p5751_p5 }
  0xa9   :  { %5761 = shalt.err (!%p5758_p9)
}
  0xaa   :  { %142 = dma.hbm_to_vmem [thread:$0]  %s6195_s9, 5120, %s137_s16, [#allocation18], %s5802_s1, %s5802_s1, %s5803_s18  }
  0xab   :  { %5784 = dma.done.wait [#allocation3], 1280  }
  0xac   :  { %5785 = vsyncadd [#allocation3], 4294966016 }
  0xad   :  { %5786 = dma.done.wait [#allocation6], 21504  }
  0xae   :  { %5787 = vsyncadd [#allocation6], 4294945792 }
  0xaf   :  { %5788 = dma.done.wait [#allocation9], 3072  }
  0xb0   :  { %5789 = vsyncadd [#allocation9], 4294964224 }
  0xb1   :  { %5790 = dma.done.wait [#allocation12], 3072  }
  0xb2   :  { %5791 = vsyncadd [#allocation12], 4294964224 }
  0xb3   :  { %5792 = dma.done.wait [#allocation15], 21504  }
  0xb4   :  { %5793 = vsyncadd [#allocation15], 4294945792 }
  0xb5   :  { %5794 = dma.done.wait [#allocation18], 5120  }
  0xb6   :  { %5795 = vsyncadd [#allocation18], 4294962176  ;;  %v4982_v0 = vld [vmem:[#allocation5 + $0x4] ss:$12 sps:$4 sm:$0xff]   ;;  %v4984_v1 = vld [vmem:[#allocation5] ss:$12 sps:$4 sm:$0xff]  }
  0xb7   :  { %1008 = vmatprep.subr.bf16.mxu0 %v4982_v0  ;;  %v4985_v2 = vld [vmem:[#allocation5 + $0x1c] ss:$12 sps:$4 sm:$0xff]   ;;  %v4987_v3 = vld [vmem:[#allocation5 + $0x18] ss:$12 sps:$4 sm:$0xff]   ;;  %v4988_v4 = vld [vmem:[#allocation5 + $0x34] ss:$12 sps:$4 sm:$0xff]  }
  0xb8   :  { %1009 = vmatpush1.bf16.msra.mxu0 %v4984_v1  ;;  %v4990_v5 = vld [vmem:[#allocation5 + $0x30] ss:$12 sps:$4 sm:$0xff]   ;;  %v4991_v6 = vld [vmem:[#allocation5 + $0x4c] ss:$12 sps:$4 sm:$0xff]   ;;  %v4993_v7 = vld [vmem:[#allocation5 + $0x48] ss:$12 sps:$4 sm:$0xff]  }
  0xb9   :  { %1010 = vmatprep.subr.bf16.mxu0 %v4985_v2  ;;  %v4994_v8 = vld [vmem:[#allocation5 + $0x64] ss:$12 sps:$4 sm:$0xff]   ;;  %v4996_v9 = vld [vmem:[#allocation5 + $0x60] ss:$12 sps:$4 sm:$0xff]   ;;  %v5012_v10 = vld [vmem:[#allocation5 + $0xc8] ss:$12 sps:$4 sm:$0xff]  }
  0xba   :  { %v5013_v11 = vld [vmem:[#allocation5 + $0x8] ss:$12 sps:$4 sm:$0xff]   ;;  %4623 = vmatprep.subr.bf16.mxu1 %v5012_v10  ;;  %v5017_v13 = vld [vmem:[#allocation5 + $0xe0] ss:$12 sps:$4 sm:$0xff]   ;;  %v4999_v15 = vld [vmem:[#allocation5 + $0x78] ss:$12 sps:$4 sm:$0xff]  }
  0xbb   :  { %v4997_v12 = vld [vmem:[#allocation5 + $0x7c] ss:$12 sps:$4 sm:$0xff]   ;;  %4624 = vmatpush3.bf16.msra.mxu1 %v5013_v11  ;;  %v5018_v14 = vld [vmem:[#allocation5 + $0x20] ss:$12 sps:$4 sm:$0xff]   ;;  %v5022_v17 = vld [vmem:[#allocation5 + $0xf8] ss:$12 sps:$4 sm:$0xff]  }
  0xbc   :  { %1011 = vmatpush1.bf16.msra.mxu0 %v4987_v3  ;;  %v5000_v16 = vld [vmem:[#allocation5 + $0x94] ss:$12 sps:$4 sm:$0xff]   ;;  %4625 = vmatprep.subr.bf16.mxu1 %v5017_v13  ;;  %v5023_v18 = vld [vmem:[#allocation5 + $0x38] ss:$12 sps:$4 sm:$0xff]   ;;  %v5002_v19 = vld [vmem:[#allocation5 + $0x90] ss:$12 sps:$4 sm:$0xff]  }
  0xbd   :  { %1012 = vmatprep.subr.bf16.mxu0 %v4988_v4  ;;  %v5003_v20 = vld [vmem:[#allocation5 + $0xac] ss:$12 sps:$4 sm:$0xff]   ;;  %v5027_v21 = vld [vmem:[#allocation5 + $0x110] ss:$12 sps:$4 sm:$0xff]   ;;  %v5005_v23 = vld [vmem:[#allocation5 + $0xa8] ss:$12 sps:$4 sm:$0xff]  }
  0xbe   :  { %v5028_v22 = vld [vmem:[#allocation5 + $0x50] ss:$12 sps:$4 sm:$0xff]   ;;  %v5032_v24 = vld [vmem:[#allocation5 + $0x128] ss:$12 sps:$4 sm:$0xff]   ;;  %v5037_v27 = vld [vmem:[#allocation5 + $0x140] ss:$12 sps:$4 sm:$0xff]  }
  0xbf   :  { %4626 = vmatpush3.bf16.msra.mxu1 %v5018_v14  ;;  %v5006_v25 = vld [vmem:[#allocation5 + $0xc4] ss:$12 sps:$4 sm:$0xff]   ;;  %v5033_v26 = vld [vmem:[#allocation5 + $0x68] ss:$12 sps:$4 sm:$0xff]   ;;  %v5008_v28 = vld [vmem:[#allocation5 + $0xc0] ss:$12 sps:$4 sm:$0xff]  }
  0xc0   :  { %1013 = vmatpush1.bf16.msra.mxu0 %v4990_v5  ;;  %4627 = vmatprep.subr.bf16.mxu1 %v5022_v17  ;;  %v5009_v29 = vld [vmem:[#allocation5 + $0xdc] ss:$12 sps:$4 sm:$0xff]   ;;  %v5038_v30 = vld [vmem:[#allocation5 + $0x80] ss:$12 sps:$4 sm:$0xff]   ;;  %v5042_v31 = vld [vmem:[#allocation5 + $0x158] ss:$12 sps:$4 sm:$0xff]  }
  0xc1   :  { %1014 = vmatprep.subr.bf16.mxu0 %v4991_v6  ;;  %v5011_v32 = vld [vmem:[#allocation5 + $0xd8] ss:$12 sps:$4 sm:$0xff]   ;;  %v5014_v35 = vld [vmem:[#allocation5 + $0xf4] ss:$12 sps:$4 sm:$0xff]   ;;  %v5047_v38 = vld [vmem:[#allocation5 + $0x170] ss:$12 sps:$4 sm:$0xff]  }
  0xc2   :  { %v177_v33 = vld [vmem:[#allocation2 + $0x8] sm:$0xff]  ;;  %v182_v34 = vld [vmem:[#allocation2 + $0x30] sm:$0xff]  ;;  %v5021_v41 = vld [vmem:[#allocation5 + $0x108] ss:$12 sps:$4 sm:$0xff]   ;;  %vm5819_vm0 = vmmov 0   ;;  %s5821_s20 = smov [#allocation19]  }
  0xc3   :  { %4628 = vmatpush3.bf16.msra.mxu1 %v5023_v18  ;;  %v187_v36 = vpack.c.bf16 %v182_v34, %v177_v33  ;;  %v5043_v37 = vld [vmem:[#allocation5 + $0x98] ss:$12 sps:$4 sm:$0xff]   ;;  %v5016_v39 = vld [vmem:[#allocation5 + $0xf0] ss:$12 sps:$4 sm:$0xff]   ;;  %v5052_v44 = vld [vmem:[#allocation5 + $0x248] ss:$12 sps:$4 sm:$0xff]  }
  0xc4   :  { %1015 = vmatpush1.bf16.msra.mxu0 %v4993_v7  ;;  %4629 = vmatprep.subr.bf16.mxu1 %v5027_v21  ;;  %v5019_v40 = vld [vmem:[#allocation5 + $0x10c] ss:$12 sps:$4 sm:$0xff]   ;;  %v176_v42 = vld [vmem:[#allocation2] sm:$0xff]  ;;  %v5029_v51 = vld [vmem:[#allocation5 + $0x13c] ss:$12 sps:$4 sm:$0xff]   ;;  %s4178_s3 = sshll.u32 %s5821_s20, 4  ;;  %s4179_s3 = int_to_ptr.vmem [resolvable:$true] %s4178_s3 }
  0xc5   :  { %1016 = vmatprep.subr.bf16.mxu0 %v4994_v8  ;;  %1040 = vmatprep.mubr.bf16.mxu0 %v187_v36  ;;  %v5048_v43 = vld [vmem:[#allocation5 + $0xb0] ss:$12 sps:$4 sm:$0xff]   ;;  %v5053_v47 = vld [vmem:[#allocation5 + $0x188] ss:$12 sps:$4 sm:$0xff]   ;;  %v5057_v49 = vld [vmem:[#allocation5 + $0x260] ss:$12 sps:$4 sm:$0xff]   ;;  %p5767_p11 = scmp.lt.s32.totalorder %s4179_s3, %s4179_s3 }
  0xc6   :  { %1169 = vmatprep.mubr.bf16.mxu1 %v187_v36  ;;  %v181_v45 = vld [vmem:[#allocation2 + $0x28] sm:$0xff]  ;;  %v5024_v46 = vld [vmem:[#allocation5 + $0x124] ss:$12 sps:$4 sm:$0xff]   ;;  %v5026_v50 = vld [vmem:[#allocation5 + $0x120] ss:$12 sps:$4 sm:$0xff]  }
  0xc7   :  { %4630 = vmatpush3.bf16.msra.mxu1 %v5028_v22  ;;  %v186_v48 = vpack.c.bf16 %v181_v45, %v176_v42  ;;  %v5058_v52 = vld [vmem:[#allocation5 + $0x1a0] ss:$12 sps:$4 sm:$0xff]   ;;  %v5062_v53 = vld [vmem:[#allocation5 + $0x278] ss:$12 sps:$4 sm:$0xff]   ;;  %v5067_v57 = vld [vmem:[#allocation5 + $0x290] ss:$12 sps:$4 sm:$0xff]  }
  0xc8   :  { %1017 = vmatpush1.bf16.msra.mxu0 %v4996_v9  ;;  %4631 = vmatprep.subr.bf16.mxu1 %v5032_v24  ;;  %v5031_v54 = vld [vmem:[#allocation5 + $0x138] ss:$12 sps:$4 sm:$0xff]   ;;  %v5034_v55 = vld [vmem:[#allocation5 + $0x154] ss:$12 sps:$4 sm:$0xff]   ;;  %v5036_v58 = vld [vmem:[#allocation5 + $0x150] ss:$12 sps:$4 sm:$0xff]  }
  0xc9   :  { %1018 = vmatprep.subr.bf16.mxu0 %v4997_v12  ;;  %v5063_v56 = vld [vmem:[#allocation5 + $0x1b8] ss:$12 sps:$4 sm:$0xff]   ;;  %v5068_v60 = vld [vmem:[#allocation5 + $0x1d0] ss:$12 sps:$4 sm:$0xff]   ;;  %v5072_v61 = vld [vmem:[#allocation5 + $0x2a8] ss:$12 sps:$4 sm:$0xff]  }
  0xca   :  { %v5039_v59 = vld [vmem:[#allocation5 + $0x16c] ss:$12 sps:$4 sm:$0xff]   ;;  %v5041_v62 = vld [vmem:[#allocation5 + $0x168] ss:$12 sps:$4 sm:$0xff]   ;;  %v5046_v63 = vld [vmem:[#allocation5 + $0x184] ss:$12 sps:$4 sm:$0xff]  }
  0xcb   :  { %4632 = vmatpush3.bf16.msra.mxu1 %v5033_v26  ;;  %v5073_v0 = vld [vmem:[#allocation5 + $0x1e8] ss:$12 sps:$4 sm:$0xff]   ;;  %v5077_v1 = vld [vmem:[#allocation5 + $0x2c0] ss:$12 sps:$4 sm:$0xff]   ;;  %v5082_v5 = vld [vmem:[#allocation5 + $0x2d8] ss:$12 sps:$4 sm:$0xff]  }
  0xcc   :  { %1019 = vmatpush1.bf16.msra.mxu0 %v4999_v15  ;;  %4633 = vmatprep.subr.bf16.mxu1 %v5037_v27  ;;  %v5044_v2 = vld [vmem:[#allocation5 + $0x180] ss:$12 sps:$4 sm:$0xff]   ;;  %v5051_v3 = vld [vmem:[#allocation5 + $0x19c] ss:$12 sps:$4 sm:$0xff]   ;;  %v5049_v6 = vld [vmem:[#allocation5 + $0x198] ss:$12 sps:$4 sm:$0xff]  }
  0xcd   :  { %1020 = vmatprep.subr.bf16.mxu0 %v5000_v16  ;;  %v5078_v4 = vld [vmem:[#allocation5 + $0x200] ss:$12 sps:$4 sm:$0xff]   ;;  %v184_v9 = vld [vmem:[#allocation2 + $0x40] sm:$0xff]  ;;  %v5083_v10 = vld [vmem:[#allocation5 + $0x218] ss:$12 sps:$4 sm:$0xff]   ;;  %v5818_v22 = vmov 0.0  }
  0xce   :  { %v5056_v7 = vld [vmem:[#allocation5 + $0x1b4] ss:$12 sps:$4 sm:$0xff]   ;;  %v179_v8 = vld [vmem:[#allocation2 + $0x18] sm:$0xff]  ;;  %v5087_v12 = vld [vmem:[#allocation5 + $0x2f0] ss:$12 sps:$4 sm:$0xff]  }
  0xcf   :  { %4634 = vmatpush3.bf16.msra.mxu1 %v5038_v30  ;;  %v189_v11 = vpack.c.bf16 %v184_v9, %v179_v8  ;;  %v5054_v13 = vld [vmem:[#allocation5 + $0x1b0] ss:$12 sps:$4 sm:$0xff]   ;;  %v5061_v14 = vld [vmem:[#allocation5 + $0x1cc] ss:$12 sps:$4 sm:$0xff]   ;;  %v178_v16 = vld [vmem:[#allocation2 + $0x10] sm:$0xff] }
  0xd0   :  { %1021 = vmatpush1.bf16.msra.mxu0 %v5002_v19  ;;  %4635 = vmatprep.subr.bf16.mxu1 %v5042_v31  ;;  %v5088_v15 = vld [vmem:[#allocation5 + $0x230] ss:$12 sps:$4 sm:$0xff]   ;;  %v183_v17 = vld [vmem:[#allocation2 + $0x38] sm:$0xff]  ;;  %v5069_v26 = vld [vmem:[#allocation5 + $0x1f8] ss:$12 sps:$4 sm:$0xff]  }
  0xd1   :  { %1022 = vmatprep.subr.bf16.mxu0 %v5003_v20  ;;  %v5059_v18 = vld [vmem:[#allocation5 + $0x1c8] ss:$12 sps:$4 sm:$0xff]   ;;  %v5066_v19 = vld [vmem:[#allocation5 + $0x1e4] ss:$12 sps:$4 sm:$0xff]   ;;  %v6040_v20 = vpack.c.bf16 %v183_v17, %v178_v16  ;;  %v5081_v30 = vld [vmem:[#allocation5 + $0x22c] ss:$12 sps:$4 sm:$0xff]  }
  0xd2   :  { %v5092_v21 = vld [vmem:[#allocation5 + $0x308] ss:$12 sps:$4 sm:$0xff]   ;;  %v5104_v31 = vld [vmem:[#allocation5 + $0x350] ss:$12 sps:$4 sm:$0xff]   ;;  %v5099_v42 = vld [vmem:[#allocation5 + $0x28c] ss:$12 sps:$4 sm:$0xff]  }
  0xd3   :  { %4636 = vmatpush3.bf16.msra.mxu1 %v5043_v37  ;;  %v5071_v24 = vld [vmem:[#allocation5 + $0x1fc] ss:$12 sps:$4 sm:$0xff]   ;;  %v5076_v27 = vld [vmem:[#allocation5 + $0x214] ss:$12 sps:$4 sm:$0xff]   ;;  %v5086_v33 = vld [vmem:[#allocation5 + $0x244] ss:$12 sps:$4 sm:$0xff]  }
  0xd4   :  { %1023 = vmatpush1.bf16.msra.mxu0 %v5005_v23  ;;  %4637 = vmatprep.subr.bf16.mxu1 %v5047_v38  ;;  %v5064_v23 = vld [vmem:[#allocation5 + $0x1e0] ss:$12 sps:$4 sm:$0xff]   ;;  %v5108_v34 = vld [vmem:[#allocation5 + $0x368] ss:$12 sps:$4 sm:$0xff]   ;;  %v5089_v38 = vld [vmem:[#allocation5 + $0x258] ss:$12 sps:$4 sm:$0xff]  }
  0xd5   :  { %1024 = vmatprep.subr.bf16.mxu0 %v5006_v25  ;;  %v5096_v25 = vld [vmem:[#allocation5 + $0x320] ss:$12 sps:$4 sm:$0xff]   ;;  %v5091_v36 = vld [vmem:[#allocation5 + $0x25c] ss:$12 sps:$4 sm:$0xff]   ;;  %v5133_v16 = vld [vmem:[#allocation5 + $0x378] ss:$12 sps:$4 sm:$0xff]  }
  0xd6   :  { %v5112_v37 = vld [vmem:[#allocation5 + $0x380] ss:$12 sps:$4 sm:$0xff]   ;;  %v185_v45 = vld [vmem:[#allocation2 + $0x48] sm:$0xff] }
  0xd7   :  { %4638 = vmatpush3.bf16.msra.mxu1 %v5048_v43  ;;  %v5120_v43 = vld [vmem:[#allocation5 + $0x3b0] ss:$12 sps:$4 sm:$0xff]   ;;  %v5129_v9 = vld [vmem:[#allocation5 + $0x34c] ss:$12 sps:$4 sm:$0xff]   ;;  %v5138_v17 = vld [vmem:[#allocation5 + $0x394] ss:$12 sps:$4 sm:$0xff]  }
  0xd8   :  { %1025 = vmatpush1.bf16.msra.mxu0 %v5008_v28  ;;  %4645 = vmatprep.subr.bf16.mxu1 %v5052_v44  ;;  %v5100_v28 = vld [vmem:[#allocation5 + $0x338] ss:$12 sps:$4 sm:$0xff]   ;;  %v180_v44 = vld [vmem:[#allocation2 + $0x20] sm:$0xff] }
  0xd9   :  { %1026 = vmatprep.subr.bf16.mxu0 %v5009_v29  ;;  %v5074_v29 = vld [vmem:[#allocation5 + $0x210] ss:$12 sps:$4 sm:$0xff]  }
  0xda   :  { %1170 = vmatmul.mubr.bf16.vlgmr.msra.gmra.mrb[0].mxu1 %v186_v48  ;;  %v5124_v8 = vld [vmem:[#allocation5 + $0x330] ss:$12 sps:$4 sm:$0xff]  }
  0xdb   :  { %4646 = vmatpush3.bf16.msra.mxu1 %v5053_v47  ;;  %1210 = vmatprep.mubr.bf16.mxu1 %v189_v11  ;;  %v5097_v47 = vld [vmem:[#allocation5 + $0x288] ss:$12 sps:$4 sm:$0xff]  }
  0xdc   :  { %1027 = vmatpush1.bf16.msra.mxu0 %v5011_v32  ;;  %4647 = vmatprep.subr.bf16.mxu1 %v5057_v49  ;;  %v5079_v32 = vld [vmem:[#allocation5 + $0x228] ss:$12 sps:$4 sm:$0xff]  }
  0xdd   :  { %1028 = vmatprep.subr.bf16.mxu0 %v5014_v35  ;;  %v5084_v35 = vld [vmem:[#allocation5 + $0x240] ss:$12 sps:$4 sm:$0xff]  }
  0xde   :  { %v5142_v49 = vld [vmem:[#allocation7] ss:$8 sps:$4 sm:$0xff]  }
  0xdf   :  { %4648 = vmatpush3.bf16.msra.mxu1 %v5058_v52  ;;  %v5101_v52 = vld [vmem:[#allocation5 + $0x2a0] ss:$12 sps:$4 sm:$0xff]  }
  0xe0   :  { %1029 = vmatpush1.bf16.msra.mxu0 %v5016_v39  ;;  %4649 = vmatprep.subr.bf16.mxu1 %v5062_v53  ;;  %v5095_v39 = vld [vmem:[#allocation5 + $0x274] ss:$12 sps:$4 sm:$0xff]   ;;  %v5107_v53 = vld [vmem:[#allocation5 + $0x2bc] ss:$12 sps:$4 sm:$0xff]  }
  0xe1   :  { %1030 = vmatprep.subr.bf16.mxu0 %v5019_v40  ;;  %v5093_v40 = vld [vmem:[#allocation5 + $0x270] ss:$12 sps:$4 sm:$0xff]  }
  0xe3   :  { %4650 = vmatpush3.bf16.msra.mxu1 %v5063_v56  ;;  %v5105_v56 = vld [vmem:[#allocation5 + $0x2b8] ss:$12 sps:$4 sm:$0xff]  }
  0xe4   :  { %1031 = vmatpush1.bf16.msra.mxu0 %v5021_v41  ;;  %4651 = vmatprep.subr.bf16.mxu1 %v5067_v57  ;;  %v5116_v41 = vld [vmem:[#allocation5 + $0x398] ss:$12 sps:$4 sm:$0xff]   ;;  %v5111_v57 = vld [vmem:[#allocation5 + $0x2d4] ss:$12 sps:$4 sm:$0xff]  }
  0xe5   :  { %1032 = vmatprep.subr.bf16.mxu0 %v5024_v46  ;;  %v5144_v46 = vld [vmem:[#allocation7 + $0x4] ss:$8 sps:$4 sm:$0xff]  }
  0xe7   :  { %4652 = vmatpush3.bf16.msra.mxu1 %v5068_v60  ;;  %v5109_v60 = vld [vmem:[#allocation5 + $0x2d0] ss:$12 sps:$4 sm:$0xff]  }
  0xe8   :  { %1033 = vmatpush1.bf16.msra.mxu0 %v5026_v50  ;;  %4653 = vmatprep.subr.bf16.mxu1 %v5072_v61  ;;  %v6053_v50 = vpack.c.bf16 %v185_v45, %v180_v44  ;;  %v5115_v61 = vld [vmem:[#allocation5 + $0x2ec] ss:$12 sps:$4 sm:$0xff]  }
  0xe9   :  { %1034 = vmatprep.subr.bf16.mxu0 %v5029_v51  ;;  %v5147_v51 = vld [vmem:[#allocation7 + $0x14] ss:$8 sps:$4 sm:$0xff]  }
  0xeb   :  { %4654 = vmatpush3.bf16.msra.mxu1 %v5073_v0  ;;  %v5113_v0 = vld [vmem:[#allocation5 + $0x2e8] ss:$12 sps:$4 sm:$0xff]  }
  0xec   :  { %1035 = vmatpush1.bf16.msra.mxu0 %v5031_v54  ;;  %4655 = vmatprep.subr.bf16.mxu1 %v5077_v1  ;;  %v5145_v54 = vld [vmem:[#allocation7 + $0x10] ss:$8 sps:$4 sm:$0xff]  }
  0xed   :  { %1036 = vmatprep.subr.bf16.mxu0 %v5034_v55  ;;  %v5150_v55 = vld [vmem:[#allocation7 + $0x24] ss:$8 sps:$4 sm:$0xff]  }
  0xee   :  { %v5119_v1 = vld [vmem:[#allocation5 + $0x304] ss:$12 sps:$4 sm:$0xff]  }
  0xef   :  { %4656 = vmatpush3.bf16.msra.mxu1 %v5078_v4  ;;  %v5123_v4 = vld [vmem:[#allocation5 + $0x31c] ss:$12 sps:$4 sm:$0xff]  }
  0xf0   :  { %1037 = vmatpush1.bf16.msra.mxu0 %v5036_v58  ;;  %4657 = vmatprep.subr.bf16.mxu1 %v5082_v5  ;;  %v5148_v58 = vld [vmem:[#allocation7 + $0x20] ss:$8 sps:$4 sm:$0xff]   ;;  %v5121_v5 = vld [vmem:[#allocation5 + $0x318] ss:$12 sps:$4 sm:$0xff]  }
  0xf1   :  { %1038 = vmatprep.subr.bf16.mxu0 %v5039_v59  ;;  %v5153_v59 = vld [vmem:[#allocation7 + $0x34] ss:$8 sps:$4 sm:$0xff]  }
  0xf3   :  { %4658 = vmatpush3.bf16.msra.mxu1 %v5083_v10  ;;  %v5157_v10 = vld [vmem:[#allocation7 + $0x50] ss:$8 sps:$4 sm:$0xff]  }
  0xf4   :  { %1039 = vmatpush1.bf16.msra.mxu0 %v5041_v62  ;;  %4659 = vmatprep.subr.bf16.mxu1 %v5087_v12  ;;  %v5151_v62 = vld [vmem:[#allocation7 + $0x30] ss:$8 sps:$4 sm:$0xff]   ;;  %v5127_v12 = vld [vmem:[#allocation5 + $0x348] ss:$12 sps:$4 sm:$0xff]  }
  0xf5   :  { %1051 = vmatprep.subr.bf16.mxu0 %v5046_v63  ;;  %v5156_v63 = vld [vmem:[#allocation7 + $0x44] ss:$8 sps:$4 sm:$0xff]  }
  0xf7   :  { %1041 = vmatmul.mubr.bf16.vlgmr.msra.gmra.mrb[0].mxu0 %v186_v48  ;;  %4660 = vmatpush3.bf16.msra.mxu1 %v5088_v15  ;;  %v5103_v48 = vld [vmem:[#allocation5 + $0x2a4] ss:$12 sps:$4 sm:$0xff]   ;;  %v5135_v15 = vld [vmem:[#allocation5 + $0x37c] ss:$12 sps:$4 sm:$0xff]  }
  0xf8   :  { %1052 = vmatpush1.bf16.msra.mxu0 %v5044_v2  ;;  %1083 = vmatprep.mubr.bf16.mxu0 %v189_v11  ;;  %v5154_v2 = vld [vmem:[#allocation7 + $0x40] ss:$8 sps:$4 sm:$0xff]   ;;  %v5159_v11 = vld [vmem:[#allocation7 + $0x54] ss:$8 sps:$4 sm:$0xff]  }
  0xf9   :  { %1053 = vmatprep.subr.bf16.mxu0 %v5051_v3  ;;  %4822 = vmatprep.subr.bf16.mxu1 %v5818_v22  ;;  %v5117_v3 = vld [vmem:[#allocation5 + $0x300] ss:$12 sps:$4 sm:$0xff]  }
  0xfa   :  { %1211 = vmatmul.mubr.bf16.vlgmr.msra.gmra.mrb[4].mxu1 %v6040_v20 }
  0xfb   :  { %4823 = vmatpush3.bf16.msra.mxu1 %v5092_v21  ;;  %4838 = vmatprep.mubr.msk.bf16.mxu1 %vm5819_vm0, %v5818_v22  ;;  %v5160_v21 = vld [vmem:[#allocation7 + $0x60] ss:$8 sps:$4 sm:$0xff]  }
  0xfc   :  { %1054 = vmatpush1.bf16.msra.mxu0 %v5049_v6  ;;  %4824 = vmatprep.subr.bf16.mxu1 %v5818_v22  ;;  %v5126_v6 = vld [vmem:[#allocation5 + $0x334] ss:$12 sps:$4 sm:$0xff]  }
  0xfd   :  { %1055 = vmatprep.subr.bf16.mxu0 %v5056_v7  ;;  %v5820_v7 = vmov 0  }
  0xff   :  { %4825 = vmatpush3.bf16.msra.mxu1 %v5096_v25  ;;  %v5165_v25 = vld [vmem:[#allocation7 + $0x74] ss:$8 sps:$4 sm:$0xff]  }
 0x100   :  { %1056 = vmatpush1.bf16.msra.mxu0 %v5054_v13  ;;  %4826 = vmatprep.subr.bf16.mxu1 %v5818_v22  ;;  %v5132_v13 = vld [vmem:[#allocation5 + $0x364] ss:$12 sps:$4 sm:$0xff]  }
 0x101   :  { %1057 = vmatprep.subr.bf16.mxu0 %v5061_v14  ;;  %v5130_v14 = vld [vmem:[#allocation5 + $0x360] ss:$12 sps:$4 sm:$0xff]  }
 0x103   :  { %4827 = vmatpush3.bf16.msra.mxu1 %v5100_v28  ;;  %v5171_v28 = vld [vmem:[#allocation7 + $0x94] ss:$8 sps:$4 sm:$0xff]  }
 0x104   :  { %1058 = vmatpush1.bf16.msra.mxu0 %v5059_v18  ;;  %4828 = vmatprep.subr.bf16.mxu1 %v5818_v22  ;;  %v5136_v18 = vld [vmem:[#allocation5 + $0x390] ss:$12 sps:$4 sm:$0xff]  }
 0x105   :  { %1059 = vmatprep.subr.bf16.mxu0 %v5066_v19  ;;  %v5141_v19 = vld [vmem:[#allocation5 + $0x3ac] ss:$12 sps:$4 sm:$0xff]  }
 0x107   :  { %4829 = vmatpush3.bf16.msra.mxu1 %v5104_v31  ;;  %v5172_v31 = vld [vmem:[#allocation7 + $0xa0] ss:$8 sps:$4 sm:$0xff]  }
 0x108   :  { %1060 = vmatpush1.bf16.msra.mxu0 %v5064_v23  ;;  %4830 = vmatprep.subr.bf16.mxu1 %v5818_v22  ;;  %v5162_v23 = vld [vmem:[#allocation7 + $0x64] ss:$8 sps:$4 sm:$0xff]  }
 0x109   :  { %1061 = vmatprep.subr.bf16.mxu0 %v5071_v24  ;;  %v5163_v24 = vld [vmem:[#allocation7 + $0x70] ss:$8 sps:$4 sm:$0xff]  }
 0x10b   :  { %4831 = vmatpush3.bf16.msra.mxu1 %v5108_v34  ;;  %v5180_v34 = vld [vmem:[#allocation7 + $0xc4] ss:$8 sps:$4 sm:$0xff]  }
 0x10c   :  { %1062 = vmatpush1.bf16.msra.mxu0 %v5069_v26  ;;  %4832 = vmatprep.subr.bf16.mxu1 %v5818_v22  ;;  %v5166_v26 = vld [vmem:[#allocation7 + $0x80] ss:$8 sps:$4 sm:$0xff]  }
 0x10d   :  { %1063 = vmatprep.subr.bf16.mxu0 %v5076_v27  ;;  %v5168_v27 = vld [vmem:[#allocation7 + $0x84] ss:$8 sps:$4 sm:$0xff]  }
 0x10f   :  { %4833 = vmatpush3.bf16.msra.mxu1 %v5112_v37  ;;  %v5181_v37 = vld [vmem:[#allocation7 + $0xd0] ss:$8 sps:$4 sm:$0xff]  }
 0x110   :  { %1064 = vmatpush1.bf16.msra.mxu0 %v5074_v29  ;;  %4834 = vmatprep.subr.bf16.mxu1 %v5818_v22  ;;  %v5169_v29 = vld [vmem:[#allocation7 + $0x90] ss:$8 sps:$4 sm:$0xff]  }
 0x111   :  { %1065 = vmatprep.subr.bf16.mxu0 %v5081_v30  ;;  %v5174_v30 = vld [vmem:[#allocation7 + $0xa4] ss:$8 sps:$4 sm:$0xff]  }
 0x113   :  { %4835 = vmatpush3.bf16.msra.mxu1 %v5116_v41  ;;  %v5187_v41 = vld [vmem:[#allocation7 + $0xf0] ss:$8 sps:$4 sm:$0xff]  }
 0x114   :  { %1066 = vmatpush1.bf16.msra.mxu0 %v5079_v32  ;;  %4836 = vmatprep.subr.bf16.mxu1 %v5818_v22  ;;  %v5177_v32 = vld [vmem:[#allocation7 + $0xb4] ss:$8 sps:$4 sm:$0xff]  }
 0x115   :  { %1067 = vmatprep.subr.bf16.mxu0 %v5086_v33  ;;  %v5175_v33 = vld [vmem:[#allocation7 + $0xb0] ss:$8 sps:$4 sm:$0xff]  }
 0x117   :  { %4837 = vmatpush3.bf16.msra.mxu1 %v5120_v43 }
 0x118   :  { %1068 = vmatpush1.bf16.msra.mxu0 %v5084_v35  ;;  %1569 = vmatprep.subr.bf16.mxu1 %v5144_v46  ;;  %v5178_v35 = vld [vmem:[#allocation7 + $0xc0] ss:$8 sps:$4 sm:$0xff]  }
 0x119   :  { %1069 = vmatprep.subr.bf16.mxu0 %v5091_v36  ;;  %v5183_v36 = vld [vmem:[#allocation7 + $0xd4] ss:$8 sps:$4 sm:$0xff]  }
 0x11a   :  { %4839 = vmatmul.mubr.bf16.vlgmr.msra.gmra.mrb[8].mxu1 %v6053_v50 }
 0x11b   :  { %1570 = vmatpush1.bf16.msra.mxu1 %v5142_v49  ;;  %v353_v49 = vlaneseq }
 0x11c   :  { %1070 = vmatpush1.bf16.msra.mxu0 %v5089_v38  ;;  %1571 = vmatprep.subr.bf16.mxu1 %v5147_v51  ;;  %v5186_v38 = vld [vmem:[#allocation7 + $0xe4] ss:$8 sps:$4 sm:$0xff]  }
 0x11d   :  { %1071 = vmatprep.subr.bf16.mxu0 %v5095_v39  ;;  %v5184_v39 = vld [vmem:[#allocation7 + $0xe0] ss:$8 sps:$4 sm:$0xff]  }
 0x11f   :  { %1572 = vmatpush1.bf16.msra.mxu1 %v5145_v54  ;;  %v5214_v54 = vld [vmem:[#allocation8 + $0x40] sm:$0xff]  }
 0x120   :  { %1072 = vmatpush1.bf16.msra.mxu0 %v5093_v40  ;;  %1573 = vmatprep.subr.bf16.mxu1 %v5150_v55  ;;  %v5189_v40 = vld [vmem:[#allocation7 + $0xf4] ss:$8 sps:$4 sm:$0xff]   ;;  %v5215_v55 = vld [vmem:[#allocation8] sm:$0xff]  }
 0x121   :  { %1073 = vmatprep.subr.bf16.mxu0 %v5099_v42  ;;  %v5192_v42 = vld [vmem:[#allocation7 + $0x104] ss:$8 sps:$4 sm:$0xff]  }
 0x123   :  { %1574 = vmatpush1.bf16.msra.mxu1 %v5148_v58 }
 0x124   :  { %1074 = vmatpush1.bf16.msra.mxu0 %v5097_v47  ;;  %1575 = vmatprep.subr.bf16.mxu1 %v5153_v59  ;;  %v5217_v59 = vld [vmem:[#allocation8 + $0x8] sm:$0xff]  }
 0x125   :  { %1075 = vmatprep.subr.bf16.mxu0 %v5103_v48 }
 0x127   :  { %1576 = vmatpush1.bf16.msra.mxu1 %v5151_v62 }
 0x128   :  { %1076 = vmatpush1.bf16.msra.mxu0 %v5101_v52  ;;  %1577 = vmatprep.subr.bf16.mxu1 %v5156_v63  ;;  %v351_v52 = vld [vmem:[%s6196_s10] sm:$0x7] }
 0x129   :  { %1077 = vmatprep.subr.bf16.mxu0 %v5107_v53 }
 0x12b   :  { %1578 = vmatpush1.bf16.msra.mxu1 %v5154_v2 }
 0x12c   :  { %1078 = vmatpush1.bf16.msra.mxu0 %v5105_v56  ;;  %1579 = vmatprep.subr.bf16.mxu1 %v5159_v11  ;;  %v5216_v56 = vld [vmem:[#allocation8 + $0x48] sm:$0xff]  }
 0x12d   :  { %1079 = vmatprep.subr.bf16.mxu0 %v5111_v57  ;;  %v5224_v11 = vld [vmem:[#allocation8 + $0x68] sm:$0xff]  }
 0x12f   :  { %1580 = vmatpush1.bf16.msra.mxu1 %v5157_v10  ;;  %v5223_v10 = vld [vmem:[#allocation8 + $0x20] sm:$0xff]  }
 0x130   :  { %1080 = vmatpush1.bf16.msra.mxu0 %v5109_v60  ;;  %1581 = vmatprep.subr.bf16.mxu1 %v5162_v23 }
 0x131   :  { %1081 = vmatprep.subr.bf16.mxu0 %v5115_v61  ;;  %v5218_v61 = vld [vmem:[#allocation8 + $0x50] sm:$0xff]  }
 0x133   :  { %1582 = vmatpush1.bf16.msra.mxu1 %v5160_v21 }
 0x134   :  { %1082 = vmatpush1.bf16.msra.mxu0 %v5113_v0  ;;  %1583 = vmatprep.subr.bf16.mxu1 %v5165_v25 }
 0x135   :  { %1094 = vmatprep.subr.bf16.mxu0 %v5119_v1 }
 0x137   :  { %1084 = vmatmul.mubr.bf16.vlgmr.msra.gmra.mrb[0].mxu0 %v6040_v20  ;;  %v5139_v20 = vld [vmem:[#allocation5 + $0x3a8] ss:$12 sps:$4 sm:$0xff]   ;;  %1584 = vmatpush1.bf16.msra.mxu1 %v5163_v24 }
 0x138   :  { %1095 = vmatpush1.bf16.msra.mxu0 %v5117_v3  ;;  %1126 = vmatprep.mubr.bf16.mxu0 %v5820_v7 }
 0x139   :  { %1096 = vmatprep.subr.bf16.mxu0 %v5123_v4  ;;  %1585 = vmatprep.subr.bf16.mxu1 %v5168_v27  ;;  %v5219_v4 = vld [vmem:[#allocation8 + $0x10] sm:$0xff]  }
 0x13b   :  { %1586 = vmatpush1.bf16.msra.mxu1 %v5166_v26 }
 0x13c   :  { %1097 = vmatpush1.bf16.msra.mxu0 %v5121_v5  ;;  %1587 = vmatprep.subr.bf16.mxu1 %v5171_v28  ;;  %v5220_v5 = vld [vmem:[#allocation8 + $0x58] sm:$0xff]  }
 0x13d   :  { %1098 = vmatprep.subr.bf16.mxu0 %v5126_v6 }
 0x13f   :  { %1588 = vmatpush1.bf16.msra.mxu1 %v5169_v29 }
 0x140   :  { %1099 = vmatpush1.bf16.msra.mxu0 %v5124_v8  ;;  %1589 = vmatprep.subr.bf16.mxu1 %v5174_v30  ;;  %v5221_v8 = vld [vmem:[#allocation8 + $0x18] sm:$0xff]  }
 0x141   :  { %1100 = vmatprep.subr.bf16.mxu0 %v5129_v9  ;;  %v5222_v9 = vld [vmem:[#allocation8 + $0x60] sm:$0xff]  }
 0x143   :  { %1590 = vmatpush1.bf16.msra.mxu1 %v5172_v31 }
 0x144   :  { %1101 = vmatpush1.bf16.msra.mxu0 %v5127_v12  ;;  %1591 = vmatprep.subr.bf16.mxu1 %v5177_v32 }
 0x145   :  { %1102 = vmatprep.subr.bf16.mxu0 %v5132_v13 }
 0x147   :  { %1592 = vmatpush1.bf16.msra.mxu1 %v5175_v33 }
 0x148   :  { %1103 = vmatpush1.bf16.msra.mxu0 %v5130_v14  ;;  %1593 = vmatprep.subr.bf16.mxu1 %v5180_v34 }
 0x149   :  { %1104 = vmatprep.subr.bf16.mxu0 %v5135_v15 }
 0x14b   :  { %1594 = vmatpush1.bf16.msra.mxu1 %v5178_v35 }
 0x14c   :  { %1105 = vmatpush1.bf16.msra.mxu0 %v5133_v16  ;;  %1595 = vmatprep.subr.bf16.mxu1 %v5183_v36 }
 0x14d   :  { %1106 = vmatprep.subr.bf16.mxu0 %v5138_v17 }
 0x14f   :  { %1596 = vmatpush1.bf16.msra.mxu1 %v5181_v37 }
 0x150   :  { %1107 = vmatpush1.bf16.msra.mxu0 %v5136_v18  ;;  %1597 = vmatprep.subr.bf16.mxu1 %v5186_v38 }
 0x151   :  { %1108 = vmatprep.subr.bf16.mxu0 %v5141_v19 }
 0x153   :  { %1598 = vmatpush1.bf16.msra.mxu1 %v5184_v39 }
 0x154   :  { %1109 = vmatpush1.bf16.msra.mxu0 %v5139_v20  ;;  %1599 = vmatprep.subr.bf16.mxu1 %v5189_v40  ;;  %v5190_v40 = vld [vmem:[#allocation7 + $0x100] ss:$8 sps:$4 sm:$0xff]  }
 0x155   :  { %4676 = vmatprep.subr.bf16.mxu0 %v5214_v54  ;;  %v5208_v54 = vld [vmem:[#allocation7 + $0x160] ss:$8 sps:$4 sm:$0xff]  }
 0x157   :  { %1127 = vmatmul.mubr.bf16.vlgmr.msra.gmra.mrb[0].mxu0 %v6053_v50  ;;  %1600 = vmatpush1.bf16.msra.mxu1 %v5187_v41  ;;  %v6059_v50 = vshrl.u32 %v353_v49, 7  ;;  %v5195_v41 = vld [vmem:[#allocation7 + $0x114] ss:$8 sps:$4 sm:$0xff]  }
 0x158   :  { %1612 = vmatprep.subr.bf16.mxu1 %v5192_v42  ;;  %4677 = vmatpush3.bf16.msra.mxu0 %v5215_v55  ;;  %v5193_v42 = vld [vmem:[#allocation7 + $0x110] ss:$8 sps:$4 sm:$0xff]   ;;  %v5207_v49 = vld [vmem:[#allocation7 + $0x154] ss:$8 sps:$4 sm:$0xff]  }
 0x159   :  { %v6062_v51 = vsub.s32 2, %v6059_v50  ;;  %4678 = vmatprep.subr.bf16.mxu0 %v5216_v56  ;;  %v6069_v21 = vsub.s32 0, %v6059_v50  ;;  %v6072_v23 = vsub.s32 1, %v6059_v50  ;;  %v5213_v55 = vld [vmem:[#allocation7 + $0x174] ss:$8 sps:$4 sm:$0xff]  }
 0x15a   :  { %v5211_v56 = vld [vmem:[#allocation7 + $0x170] ss:$8 sps:$4 sm:$0xff]  }
 0x15b   :  { %v364_v53 = vrot.slane %v351_v52, %v6062_v51  ;;  %v356_v24 = vrot.slane %v351_v52, %v6069_v21  ;;  %v360_v25 = vrot.slane %v351_v52, %v6072_v23  ;;  %v5205_v52 = vld [vmem:[#allocation7 + $0x150] ss:$8 sps:$4 sm:$0xff]  }
 0x15c   :  { %4679 = vmatpush3.bf16.msra.mxu0 %v5217_v59  ;;  %v5227_v59 = vld [vmem:[#allocation8 + $0x30] sm:$0xff]  }
 0x15d   :  { %4680 = vmatprep.subr.bf16.mxu0 %v5218_v61  ;;  %v5229_v61 = vld [vmem:[#allocation8 + $0x38] sm:$0xff]  }
 0x160   :  { %4681 = vmatpush3.bf16.msra.mxu0 %v5219_v4 }
 0x161   :  { %4682 = vmatprep.subr.bf16.mxu0 %v5220_v5 }
 0x164   :  { %4683 = vmatpush3.bf16.msra.mxu0 %v5221_v8 }
 0x165   :  { %4684 = vmatprep.subr.bf16.mxu0 %v5222_v9 }
 0x168   :  { %4685 = vmatpush3.bf16.msra.mxu0 %v5223_v10 }
 0x169   :  { %4686 = vmatprep.subr.bf16.mxu0 %v5224_v11 }
 0x1ad   :  { %v4639_v43 = vpop.f32.mrb[0].mxu1 }
 0x1ae   :  { %v4640_v44 = vpop.f32.mrb[1].mxu1 }
 0x1af   :  { %v4641_v45 = vadd.f32 %v4640_v44, %v4639_v43  ;;  %v4642_v46 = vpop.f32.mrb[2].mxu1  ;;  %v5198_v43 = vld [vmem:[#allocation7 + $0x124] ss:$8 sps:$4 sm:$0xff]   ;;  %v5196_v44 = vld [vmem:[#allocation7 + $0x120] ss:$8 sps:$4 sm:$0xff]  }
 0x1b0   :  { %v4643_v47 = vpop.f32.mrb[3].mxu1 }
 0x1b1   :  { %v4644_v48 = vadd.f32 %v4643_v47, %v4642_v46  ;;  %v1172_v57 = vadd.f32 %v4641_v45, %v364_v53  ;;  %v5201_v45 = vld [vmem:[#allocation7 + $0x134] ss:$8 sps:$4 sm:$0xff]   ;;  %v5199_v46 = vld [vmem:[#allocation7 + $0x130] ss:$8 sps:$4 sm:$0xff]   ;;  %v5204_v47 = vld [vmem:[#allocation7 + $0x144] ss:$8 sps:$4 sm:$0xff]  }
 0x1b3   :  { %v1175_v62 = vadd.f32 %v4644_v48, %v364_v53  ;;  %v5202_v48 = vld [vmem:[#allocation7 + $0x140] ss:$8 sps:$4 sm:$0xff]   ;;  %v5210_v53 = vld [vmem:[#allocation7 + $0x164] ss:$8 sps:$4 sm:$0xff]  }
 0x1cd   :  { %v4661_v58 = vpop.f32.mrb[4].mxu1 }
 0x1ce   :  { %v4662_v60 = vpop.f32.mrb[5].mxu1 }
 0x1cf   :  { %v4663_v63 = vadd.f32 %v4662_v60, %v4661_v58  ;;  %v4664_v0 = vpop.f32.mrb[6].mxu1  ;;  %v5226_v58 = vld [vmem:[#allocation8 + $0x70] sm:$0xff]   ;;  %v5228_v60 = vld [vmem:[#allocation8 + $0x78] sm:$0xff]  }
 0x1d0   :  { %v4665_v1 = vpop.f32.mrb[7].mxu1 }
 0x1d1   :  { %v4666_v2 = vadd.f32 %v4665_v1, %v4664_v0  ;;  %v1213_v3 = vadd.f32 %v4663_v63, %v1172_v57  ;;  %v5225_v57 = vld [vmem:[#allocation8 + $0x28] sm:$0xff]  }
 0x1d2   :  { %4687 = vmatpush3.bf16.msra.mxu0 %v5225_v57  ;;  %v5260_v57 = vld [vmem:[#allocation13 + $0x44] ss:$8 sps:$4 sm:$0xff]  }
 0x1d3   :  { %v1216_v6 = vadd.f32 %v4666_v2, %v1175_v62  ;;  %4688 = vmatprep.subr.bf16.mxu0 %v5226_v58  ;;  %v1317_v62 = vld [vmem:[%s6196_s10 + $0x3] sm:$0x3]  ;;  %v5258_v58 = vld [vmem:[#allocation13 + $0x40] ss:$8 sps:$4 sm:$0xff]  }
 0x1d4   :  { %v1322_v63 = vrot.slane %v1317_v62, %v6069_v21  ;;  %v1326_v0 = vrot.slane %v1317_v62, %v6072_v23 }
 0x1d6   :  { %4689 = vmatpush3.bf16.msra.mxu0 %v5227_v59  ;;  %v5263_v59 = vld [vmem:[#allocation13 + $0x54] ss:$8 sps:$4 sm:$0xff]  }
 0x1d7   :  { %4690 = vmatprep.subr.bf16.mxu0 %v5228_v60  ;;  %v5261_v60 = vld [vmem:[#allocation13 + $0x50] ss:$8 sps:$4 sm:$0xff]  }
 0x1da   :  { %4691 = vmatpush3.bf16.msra.mxu0 %v5229_v61  ;;  %v4380_v61 = vld [vmem:[%s6196_s10 + $0x6] ss:$0 sm:$0xff] }
 0x1db   :  { %4842 = vmatprep.subr.bf16.mxu0 %v5818_v22 }
 0x1ed   :  { %v1253_v12 = vpop.f32.mrb[8].mxu1 }
 0x1ee   :  { %v1254_v13 = vadd.f32 %v1253_v12, %v1213_v3  ;;  %v4840_v14 = vpop.f32.mrb[9].mxu1 }
 0x1ef   :  { %v1256_v15 = vpop.f32.mrb[10].mxu1 }
 0x1f0   :  { %v1262_v16 = vmax.f32 %v1254_v13, 0.0  ;;  %v1257_v17 = vadd.f32 %v1256_v15, %v1216_v6  ;;  %v4841_v18 = vpop.f32.mrb[11].mxu1 }
 0x1f1   :  { %v5232_v18 = vld [vmem:[#allocation10 + $0x10] sm:$0xff]  }
 0x1f2   :  { %v1265_v19 = vmax.f32 %v1257_v17, 0.0  ;;  %v5231_v17 = vld [vmem:[#allocation10 + $0x8] sm:$0xff]  }
 0x1f4   :  { %v1268_v20 = vpack.c.bf16 %v1265_v19, %v1262_v16  ;;  %v5230_v16 = vld [vmem:[#allocation10] sm:$0xff]   ;;  %v5233_v19 = vld [vmem:[#allocation10 + $0x18] sm:$0xff]  }
 0x22a   :  { %v1128_v26 = vpop.f32.mrb[0].mxu0 }
 0x22b   :  { %v4922_v27 = vadd.f32 %v1128_v26, %v356_v24  ;;  %v1130_v28 = vpop.f32.mrb[1].mxu0  ;;  %v5237_v26 = vld [vmem:[#allocation10 + $0x38] sm:$0xff]  }
 0x22c   :  { %v4923_v29 = vadd.f32 %v1130_v28, %v360_v25  ;;  %v1132_v30 = vpop.f32.mrb[2].mxu0  ;;  %v5239_v28 = vld [vmem:[#allocation11 + $0x8] sm:$0xff]  }
 0x22d   :  { %v4924_v31 = vadd.f32 %v1132_v30, %v356_v24  ;;  %v1134_v32 = vpop.f32.mrb[3].mxu0  ;;  %v1260_v34 = vmax.f32 %v4922_v27, 0.0  ;;  %v5235_v24 = vld [vmem:[#allocation10 + $0x28] sm:$0xff]   ;;  %v5238_v27 = vld [vmem:[#allocation11] sm:$0xff]   ;;  %v5241_v30 = vld [vmem:[#allocation11 + $0x18] sm:$0xff]  }
 0x22e   :  { %v4925_v33 = vadd.f32 %v1134_v32, %v360_v25  ;;  %v1261_v36 = vmax.f32 %v4923_v29, 0.0  ;;  %v5236_v25 = vld [vmem:[#allocation10 + $0x30] sm:$0xff]   ;;  %v5243_v32 = vld [vmem:[#allocation11 + $0x28] sm:$0xff]  }
 0x22f   :  { %v1263_v35 = vmax.f32 %v4924_v31, 0.0  ;;  %v5240_v29 = vld [vmem:[#allocation11 + $0x10] sm:$0xff]   ;;  %v5242_v31 = vld [vmem:[#allocation11 + $0x20] sm:$0xff]  }
 0x230   :  { %v1264_v37 = vmax.f32 %v4925_v33, 0.0 }
 0x231   :  { %v1266_v38 = vpack.c.bf16 %v1263_v35, %v1260_v34  ;;  %v4363_v34 = vld [vmem:[%s6196_s10 + $0x5] ss:$0 sm:$0xff] }
 0x232   :  { %v1267_v39 = vpack.c.bf16 %v1264_v37, %v1261_v36 }
 0x234   :  { %1601 = vmatprep.mubr.bf16.mxu1 %v1267_v39 }
 0x235   :  { %1602 = vmatmul.mubr.bf16.vlgmr.msra.gmra.mrb[12].mxu1 %v1266_v38 }
 0x236   :  { %1613 = vmatpush1.bf16.msra.mxu1 %v5190_v40  ;;  %1644 = vmatprep.mubr.bf16.mxu1 %v5820_v7 }
 0x237   :  { %1614 = vmatprep.subr.bf16.mxu1 %v5195_v41 }
 0x23a   :  { %1615 = vmatpush1.bf16.msra.mxu1 %v5193_v42 }
 0x23b   :  { %1616 = vmatprep.subr.bf16.mxu1 %v5198_v43 }
 0x23e   :  { %1617 = vmatpush1.bf16.msra.mxu1 %v5196_v44 }
 0x23f   :  { %1618 = vmatprep.subr.bf16.mxu1 %v5201_v45  ;;  %v5244_v45 = vld [vmem:[#allocation11 + $0x30] sm:$0xff]  }
 0x242   :  { %1619 = vmatpush1.bf16.msra.mxu1 %v5199_v46  ;;  %v5245_v46 = vld [vmem:[#allocation11 + $0x38] sm:$0xff]  }
 0x243   :  { %1620 = vmatprep.subr.bf16.mxu1 %v5204_v47  ;;  %v5246_v47 = vld [vmem:[#allocation13] ss:$8 sps:$4 sm:$0xff]  }
 0x246   :  { %1621 = vmatpush1.bf16.msra.mxu1 %v5202_v48  ;;  %v5248_v48 = vld [vmem:[#allocation13 + $0x4] ss:$8 sps:$4 sm:$0xff]  }
 0x247   :  { %1622 = vmatprep.subr.bf16.mxu1 %v5207_v49  ;;  %v5251_v49 = vld [vmem:[#allocation13 + $0x14] ss:$8 sps:$4 sm:$0xff]  }
 0x24a   :  { %1623 = vmatpush1.bf16.msra.mxu1 %v5205_v52  ;;  %v5249_v52 = vld [vmem:[#allocation13 + $0x10] ss:$8 sps:$4 sm:$0xff]  }
 0x24b   :  { %1624 = vmatprep.subr.bf16.mxu1 %v5210_v53  ;;  %v5254_v53 = vld [vmem:[#allocation13 + $0x24] ss:$8 sps:$4 sm:$0xff]  }
 0x24e   :  { %1625 = vmatpush1.bf16.msra.mxu1 %v5208_v54  ;;  %v5252_v54 = vld [vmem:[#allocation13 + $0x20] ss:$8 sps:$4 sm:$0xff]  }
 0x24f   :  { %1626 = vmatprep.subr.bf16.mxu1 %v5213_v55  ;;  %v5257_v55 = vld [vmem:[#allocation13 + $0x34] ss:$8 sps:$4 sm:$0xff]  }
 0x252   :  { %1627 = vmatpush1.bf16.msra.mxu1 %v5211_v56  ;;  %v5255_v56 = vld [vmem:[#allocation13 + $0x30] ss:$8 sps:$4 sm:$0xff]  }
 0x253   :  { %4862 = vmatprep.subr.bf16.mxu1 %v5818_v22 }
 0x255   :  { %1645 = vmatmul.mubr.bf16.vlgmr.msra.gmra.mrb[12].mxu1 %v1268_v20  ;;  %v5234_v20 = vld [vmem:[#allocation10 + $0x20] sm:$0xff]  }
 0x256   :  { %4878 = vmatprep.mubr.msk.bf16.mxu1 %vm5819_vm0, %v5818_v22  ;;  %4863 = vmatpush3.bf16.msra.mxu1 %v5238_v27  ;;  %v5285_v27 = vld [vmem:[#allocation14 + $0x78] ss:$12 sps:$4 sm:$0xff]  }
 0x257   :  { %4864 = vmatprep.subr.bf16.mxu1 %v5818_v22 }
 0x25a   :  { %4865 = vmatpush3.bf16.msra.mxu1 %v5239_v28  ;;  %v5290_v28 = vld [vmem:[#allocation14 + $0x94] ss:$12 sps:$4 sm:$0xff]  }
 0x25b   :  { %4866 = vmatprep.subr.bf16.mxu1 %v5818_v22 }
 0x25e   :  { %4867 = vmatpush3.bf16.msra.mxu1 %v5240_v29  ;;  %v5288_v29 = vld [vmem:[#allocation14 + $0x90] ss:$12 sps:$4 sm:$0xff]  }
 0x25f   :  { %4868 = vmatprep.subr.bf16.mxu1 %v5818_v22 }
 0x262   :  { %4869 = vmatpush3.bf16.msra.mxu1 %v5241_v30  ;;  %v5293_v30 = vld [vmem:[#allocation14 + $0xac] ss:$12 sps:$4 sm:$0xff]  }
 0x263   :  { %4870 = vmatprep.subr.bf16.mxu1 %v5818_v22 }
 0x266   :  { %4871 = vmatpush3.bf16.msra.mxu1 %v5242_v31  ;;  %v5291_v31 = vld [vmem:[#allocation14 + $0xa8] ss:$12 sps:$4 sm:$0xff]  }
 0x267   :  { %4872 = vmatprep.subr.bf16.mxu1 %v5818_v22 }
 0x26a   :  { %4873 = vmatpush3.bf16.msra.mxu1 %v5243_v32  ;;  %v5296_v32 = vld [vmem:[#allocation14 + $0xc4] ss:$12 sps:$4 sm:$0xff]  }
 0x26b   :  { %4874 = vmatprep.subr.bf16.mxu1 %v5818_v22 }
 0x26e   :  { %4875 = vmatpush3.bf16.msra.mxu1 %v5244_v45 }
 0x26f   :  { %4876 = vmatprep.subr.bf16.mxu1 %v5818_v22 }
 0x272   :  { %4877 = vmatpush3.bf16.msra.mxu1 %v5245_v46 }
 0x328   :  { %v1646_v1 = vpop.f32.mrb[12].mxu1 }
 0x329   :  { %v4926_v2 = vadd.f32 %v1646_v1, %v1322_v63  ;;  %v1648_v3 = vpop.f32.mrb[13].mxu1 }
 0x32a   :  { %v4927_v4 = vadd.f32 %v1648_v3, %v1326_v0  ;;  %v1650_v5 = vpop.f32.mrb[14].mxu1 }
 0x32b   :  { %v4928_v6 = vadd.f32 %v1650_v5, %v1322_v63  ;;  %v1652_v8 = vpop.f32.mrb[15].mxu1  ;;  %v1655_v10 = vmax.f32 %v4926_v2, 0.0 }
 0x32c   :  { %v4929_v9 = vadd.f32 %v1652_v8, %v1326_v0  ;;  %v1656_v12 = vmax.f32 %v4927_v4, 0.0  ;;  %v5266_v8 = vld [vmem:[#allocation13 + $0x64] ss:$8 sps:$4 sm:$0xff]  }
 0x32d   :  { %v1657_v11 = vmax.f32 %v4928_v6, 0.0 }
 0x32e   :  { %v1658_v13 = vmax.f32 %v4929_v9, 0.0  ;;  %v5264_v9 = vld [vmem:[#allocation13 + $0x60] ss:$8 sps:$4 sm:$0xff]  }
 0x32f   :  { %v1659_v14 = vpack.c.bf16 %v1657_v11, %v1655_v10  ;;  %v5269_v10 = vld [vmem:[#allocation13 + $0x74] ss:$8 sps:$4 sm:$0xff]   ;;  %v5267_v11 = vld [vmem:[#allocation13 + $0x70] ss:$8 sps:$4 sm:$0xff]  }
 0x330   :  { %v1660_v15 = vpack.c.bf16 %v1658_v13, %v1656_v12  ;;  %v5270_v12 = vld [vmem:[#allocation14] ss:$12 sps:$4 sm:$0xff]   ;;  %v5272_v13 = vld [vmem:[#allocation14 + $0x4] ss:$12 sps:$4 sm:$0xff]  }
 0x331   :  { %2564 = vmatprep.subr.bf16.mxu1 %v5272_v13  ;;  %v5339_v13 = vld [vmem:[#allocation16 + $0xc] ss:$20 sps:$4 sm:$0xff]  }
 0x332   :  { %1828 = vmatprep.mubr.bf16.mxu0 %v1660_v15  ;;  %v5273_v15 = vld [vmem:[#allocation14 + $0x18] ss:$12 sps:$4 sm:$0xff]  }
 0x333   :  { %1829 = vmatmul.mubr.bf16.vlgmr.msra.gmra.mrb[4].mxu0 %v1659_v14  ;;  %v5275_v14 = vld [vmem:[#allocation14 + $0x1c] ss:$12 sps:$4 sm:$0xff]  }
 0x334   :  { %4843 = vmatpush3.bf16.msra.mxu0 %v5230_v16  ;;  %4858 = vmatprep.mubr.msk.bf16.mxu0 %vm5819_vm0, %v5818_v22  ;;  %v5278_v16 = vld [vmem:[#allocation14 + $0x34] ss:$12 sps:$4 sm:$0xff]  }
 0x335   :  { %4844 = vmatprep.subr.bf16.mxu0 %v5818_v22 }
 0x338   :  { %4845 = vmatpush3.bf16.msra.mxu0 %v5231_v17  ;;  %v5297_v17 = vld [vmem:[#allocation14 + $0xc8] ss:$12 sps:$4 sm:$0xff]  }
 0x339   :  { %4846 = vmatprep.subr.bf16.mxu0 %v5818_v22 }
 0x33c   :  { %4847 = vmatpush3.bf16.msra.mxu0 %v5232_v18  ;;  %v5276_v18 = vld [vmem:[#allocation14 + $0x30] ss:$12 sps:$4 sm:$0xff]  }
 0x33d   :  { %4848 = vmatprep.subr.bf16.mxu0 %v5818_v22 }
 0x340   :  { %4849 = vmatpush3.bf16.msra.mxu0 %v5233_v19  ;;  %v5281_v19 = vld [vmem:[#allocation14 + $0x4c] ss:$12 sps:$4 sm:$0xff]  }
 0x341   :  { %4850 = vmatprep.subr.bf16.mxu0 %v5818_v22 }
 0x344   :  { %4851 = vmatpush3.bf16.msra.mxu0 %v5234_v20  ;;  %v5279_v20 = vld [vmem:[#allocation14 + $0x48] ss:$12 sps:$4 sm:$0xff]  }
 0x345   :  { %4852 = vmatprep.subr.bf16.mxu0 %v5818_v22 }
 0x348   :  { %4853 = vmatpush3.bf16.msra.mxu0 %v5235_v24  ;;  %v5284_v24 = vld [vmem:[#allocation14 + $0x64] ss:$12 sps:$4 sm:$0xff]  }
 0x349   :  { %4854 = vmatprep.subr.bf16.mxu0 %v5818_v22 }
 0x34c   :  { %4855 = vmatpush3.bf16.msra.mxu0 %v5236_v25  ;;  %v5282_v25 = vld [vmem:[#allocation14 + $0x60] ss:$12 sps:$4 sm:$0xff]  }
 0x34d   :  { %4856 = vmatprep.subr.bf16.mxu0 %v5818_v22 }
 0x350   :  { %4857 = vmatpush3.bf16.msra.mxu0 %v5237_v26  ;;  %v5287_v26 = vld [vmem:[#allocation14 + $0x7c] ss:$12 sps:$4 sm:$0xff]  }
 0x351   :  { %2178 = vmatprep.subr.bf16.mxu0 %v5248_v48 }
 0x406   :  { %v4692_v33 = vpop.f32.mrb[4].mxu0 }
 0x407   :  { %v4693_v35 = vpop.f32.mrb[5].mxu0 }
 0x408   :  { %v4694_v36 = vadd.f32 %v4693_v35, %v4692_v33  ;;  %v4695_v37 = vpop.f32.mrb[6].mxu0  ;;  %v5294_v33 = vld [vmem:[#allocation14 + $0xc0] ss:$12 sps:$4 sm:$0xff]   ;;  %v5299_v35 = vld [vmem:[#allocation14 + $0xd8] ss:$12 sps:$4 sm:$0xff]  }
 0x409   :  { %v4696_v38 = vpop.f32.mrb[7].mxu0 }
 0x40a   :  { %v1831_v39 = vadd.f32 %v4694_v36, %v4363_v34  ;;  %v4697_v40 = vadd.f32 %v4696_v38, %v4695_v37  ;;  %v5306_v36 = vld [vmem:[#allocation14 + $0xf4] ss:$12 sps:$4 sm:$0xff]   ;;  %v5304_v37 = vld [vmem:[#allocation14 + $0xf0] ss:$12 sps:$4 sm:$0xff]   ;;  %v5311_v38 = vld [vmem:[#allocation14 + $0x10c] ss:$12 sps:$4 sm:$0xff]  }
 0x40c   :  { %v1834_v41 = vadd.f32 %v4697_v40, %v4363_v34  ;;  %v1837_v42 = vmax.f32 %v1831_v39, 0.0  ;;  %v5301_v34 = vld [vmem:[#allocation14 + $0xdc] ss:$12 sps:$4 sm:$0xff]   ;;  %v5316_v40 = vld [vmem:[#allocation14 + $0x124] ss:$12 sps:$4 sm:$0xff]  }
 0x40d   :  { %v5309_v39 = vld [vmem:[#allocation14 + $0x108] ss:$12 sps:$4 sm:$0xff]  }
 0x40e   :  { %v1838_v43 = vmax.f32 %v1834_v41, 0.0  ;;  %v5314_v41 = vld [vmem:[#allocation14 + $0x120] ss:$12 sps:$4 sm:$0xff]  }
 0x410   :  { %v1839_v44 = vpack.c.bf16 %v1838_v43, %v1837_v42  ;;  %v5321_v42 = vld [vmem:[#allocation14 + $0x13c] ss:$12 sps:$4 sm:$0xff]   ;;  %v5319_v43 = vld [vmem:[#allocation14 + $0x138] ss:$12 sps:$4 sm:$0xff]  }
 0x412   :  { %4859 = vmatmul.mubr.bf16.vlgmr.msra.gmra.mrb[8].mxu0 %v1839_v44  ;;  %v4389_v44 = vld [vmem:[%s6196_s10 + $0x7] ss:$0 sm:$0xff] }
 0x413   :  { %2210 = vmatprep.mubr.bf16.mxu0 %v5820_v7  ;;  %2179 = vmatpush1.bf16.msra.mxu0 %v5246_v47 }
 0x414   :  { %2180 = vmatprep.subr.bf16.mxu0 %v5251_v49 }
 0x417   :  { %2181 = vmatpush1.bf16.msra.mxu0 %v5249_v52 }
 0x418   :  { %2182 = vmatprep.subr.bf16.mxu0 %v5254_v53 }
 0x41b   :  { %2183 = vmatpush1.bf16.msra.mxu0 %v5252_v54 }
 0x41c   :  { %2184 = vmatprep.subr.bf16.mxu0 %v5257_v55  ;;  %v5298_v55 = vld [vmem:[#allocation14 + $0x8] ss:$12 sps:$4 sm:$0xff]  }
 0x41f   :  { %2185 = vmatpush1.bf16.msra.mxu0 %v5255_v56 }
 0x420   :  { %2186 = vmatprep.subr.bf16.mxu0 %v5260_v57  ;;  %v5302_v57 = vld [vmem:[#allocation14 + $0xe0] ss:$12 sps:$4 sm:$0xff]  }
 0x423   :  { %2187 = vmatpush1.bf16.msra.mxu0 %v5258_v58  ;;  %v5303_v58 = vld [vmem:[#allocation14 + $0x20] ss:$12 sps:$4 sm:$0xff]  }
 0x424   :  { %2188 = vmatprep.subr.bf16.mxu0 %v5263_v59  ;;  %v5307_v59 = vld [vmem:[#allocation14 + $0xf8] ss:$12 sps:$4 sm:$0xff]  }
 0x427   :  { %2189 = vmatpush1.bf16.msra.mxu0 %v5261_v60  ;;  %v5308_v60 = vld [vmem:[#allocation14 + $0x38] ss:$12 sps:$4 sm:$0xff]  }
 0x428   :  { %2190 = vmatprep.subr.bf16.mxu0 %v5266_v8  ;;  %v5331_v8 = vld [vmem:[#allocation14 + $0x16c] ss:$12 sps:$4 sm:$0xff]  }
 0x42b   :  { %2191 = vmatpush1.bf16.msra.mxu0 %v5264_v9  ;;  %v5332_v9 = vld [vmem:[#allocation14 + $0x170] ss:$12 sps:$4 sm:$0xff]  }
 0x42c   :  { %2192 = vmatprep.subr.bf16.mxu0 %v5269_v10  ;;  %v5329_v10 = vld [vmem:[#allocation14 + $0x168] ss:$12 sps:$4 sm:$0xff]  }
 0x42f   :  { %2193 = vmatpush1.bf16.msra.mxu0 %v5267_v11  ;;  %v5333_v11 = vld [vmem:[#allocation14 + $0xb0] ss:$12 sps:$4 sm:$0xff]  }
 0x430   :  { %4716 = vmatprep.subr.bf16.mxu0 %v5297_v17 }
 0x4e5   :  { %v1945_v62 = vpop.f32.mrb[8].mxu0 }
 0x4e6   :  { %v1946_v63 = vadd.f32 %v4380_v61, %v1945_v62  ;;  %v4860_v0 = vpop.f32.mrb[9].mxu0  ;;  %v5313_v62 = vld [vmem:[#allocation14 + $0x50] ss:$12 sps:$4 sm:$0xff]  }
 0x4e7   :  { %v1948_v1 = vpop.f32.mrb[10].mxu0  ;;  %v5318_v0 = vld [vmem:[#allocation14 + $0x68] ss:$12 sps:$4 sm:$0xff]  }
 0x4e8   :  { %v1949_v2 = vadd.f32 %v4380_v61, %v1948_v1  ;;  %v4861_v3 = vpop.f32.mrb[11].mxu0  ;;  %v1952_v4 = vmax.f32 %v1946_v63, 0.0  ;;  %v5312_v61 = vld [vmem:[#allocation14 + $0x110] ss:$12 sps:$4 sm:$0xff]   ;;  %v5317_v63 = vld [vmem:[#allocation14 + $0x128] ss:$12 sps:$4 sm:$0xff]  }
 0x4e9   :  { %v5322_v1 = vld [vmem:[#allocation14 + $0x140] ss:$12 sps:$4 sm:$0xff]  }
 0x4ea   :  { %v1953_v5 = vmax.f32 %v1949_v2, 0.0  ;;  %v5323_v2 = vld [vmem:[#allocation14 + $0x80] ss:$12 sps:$4 sm:$0xff]  }
 0x4eb   :  { %v5326_v3 = vld [vmem:[#allocation14 + $0x154] ss:$12 sps:$4 sm:$0xff]  }
 0x4ec   :  { %v1954_v6 = vpack.c.bf16 %v1953_v5, %v1952_v4  ;;  %v5327_v4 = vld [vmem:[#allocation14 + $0x158] ss:$12 sps:$4 sm:$0xff]   ;;  %v5324_v5 = vld [vmem:[#allocation14 + $0x150] ss:$12 sps:$4 sm:$0xff]  }
 0x4ee   :  { %4879 = vmatmul.mubr.bf16.vlgmr.msra.gmra.mrb[16].mxu1 %v1954_v6  ;;  %v5328_v6 = vld [vmem:[#allocation14 + $0x98] ss:$12 sps:$4 sm:$0xff]  }
 0x4ef   :  { %2565 = vmatpush1.bf16.msra.mxu1 %v5270_v12  ;;  %v5336_v12 = vld [vmem:[#allocation16 + $0x4] ss:$20 sps:$4 sm:$0xff]  }
 0x4f0   :  { %2566 = vmatprep.subr.bf16.mxu1 %v5275_v14  ;;  %v2086_v14 = vld [vmem:[%s6196_s10 + $0x8] sm:$0x3] }
 0x4f3   :  { %2567 = vmatpush1.bf16.msra.mxu1 %v5273_v15  ;;  %v2091_v15 = vrot.slane %v2086_v14, %v6069_v21 }
 0x4f4   :  { %2568 = vmatprep.subr.bf16.mxu1 %v5278_v16  ;;  %v2095_v16 = vrot.slane %v2086_v14, %v6072_v23  ;;  %v5397_v14 = vld [vmem:[#allocation16 + $0x198] ss:$20 sps:$4 sm:$0xff]  }
 0x4f7   :  { %2569 = vmatpush1.bf16.msra.mxu1 %v5276_v18 }
 0x4f8   :  { %2570 = vmatprep.subr.bf16.mxu1 %v5281_v19 }
 0x4fb   :  { %2571 = vmatpush1.bf16.msra.mxu1 %v5279_v20 }
 0x4fc   :  { %2572 = vmatprep.subr.bf16.mxu1 %v5284_v24 }
 0x4ff   :  { %2573 = vmatpush1.bf16.msra.mxu1 %v5282_v25 }
 0x500   :  { %2574 = vmatprep.subr.bf16.mxu1 %v5287_v26 }
 0x503   :  { %2575 = vmatpush1.bf16.msra.mxu1 %v5285_v27 }
 0x504   :  { %2576 = vmatprep.subr.bf16.mxu1 %v5290_v28 }
 0x507   :  { %2577 = vmatpush1.bf16.msra.mxu1 %v5288_v29 }
 0x508   :  { %2578 = vmatprep.subr.bf16.mxu1 %v5293_v30 }
 0x50b   :  { %2579 = vmatpush1.bf16.msra.mxu1 %v5291_v31 }
 0x50c   :  { %2580 = vmatprep.subr.bf16.mxu1 %v5296_v32 }
 0x50f   :  { %2581 = vmatpush1.bf16.msra.mxu1 %v5294_v33 }
 0x510   :  { %2582 = vmatprep.subr.bf16.mxu1 %v5301_v34  ;;  %v5334_v34 = vld [vmem:[#allocation16] ss:$20 sps:$4 sm:$0xff]  }
 0x513   :  { %2583 = vmatpush1.bf16.msra.mxu1 %v5299_v35  ;;  %v5337_v35 = vld [vmem:[#allocation16 + $0x8] ss:$20 sps:$4 sm:$0xff]  }
 0x514   :  { %2584 = vmatprep.subr.bf16.mxu1 %v5306_v36  ;;  %v5342_v36 = vld [vmem:[#allocation16 + $0x2c] ss:$20 sps:$4 sm:$0xff]  }
 0x517   :  { %2585 = vmatpush1.bf16.msra.mxu1 %v5304_v37  ;;  %v5345_v37 = vld [vmem:[#allocation16 + $0x34] ss:$20 sps:$4 sm:$0xff]  }
 0x518   :  { %2586 = vmatprep.subr.bf16.mxu1 %v5311_v38  ;;  %v5340_v38 = vld [vmem:[#allocation16 + $0x28] ss:$20 sps:$4 sm:$0xff]  }
 0x51b   :  { %2587 = vmatpush1.bf16.msra.mxu1 %v5309_v39  ;;  %v5343_v39 = vld [vmem:[#allocation16 + $0x30] ss:$20 sps:$4 sm:$0xff]  }
 0x51c   :  { %2588 = vmatprep.subr.bf16.mxu1 %v5316_v40  ;;  %v5348_v40 = vld [vmem:[#allocation16 + $0x54] ss:$20 sps:$4 sm:$0xff]  }
 0x51f   :  { %2589 = vmatpush1.bf16.msra.mxu1 %v5314_v41  ;;  %v5351_v41 = vld [vmem:[#allocation16 + $0x5c] ss:$20 sps:$4 sm:$0xff]  }
 0x520   :  { %2590 = vmatprep.subr.bf16.mxu1 %v5321_v42  ;;  %v5346_v42 = vld [vmem:[#allocation16 + $0x50] ss:$20 sps:$4 sm:$0xff]  }
 0x523   :  { %2591 = vmatpush1.bf16.msra.mxu1 %v5319_v43  ;;  %v5349_v43 = vld [vmem:[#allocation16 + $0x58] ss:$20 sps:$4 sm:$0xff]  }
 0x524   :  { %2592 = vmatprep.subr.bf16.mxu1 %v5326_v3  ;;  %v5387_v3 = vld [vmem:[#allocation16 + $0x14c] ss:$20 sps:$4 sm:$0xff]  }
 0x527   :  { %2593 = vmatpush1.bf16.msra.mxu1 %v5324_v5  ;;  %v5385_v5 = vld [vmem:[#allocation16 + $0x148] ss:$20 sps:$4 sm:$0xff]  }
 0x528   :  { %2594 = vmatprep.subr.bf16.mxu1 %v5331_v8  ;;  %v5393_v8 = vld [vmem:[#allocation16 + $0x174] ss:$20 sps:$4 sm:$0xff]  }
 0x52b   :  { %2595 = vmatpush1.bf16.msra.mxu1 %v5329_v10  ;;  %v5391_v10 = vld [vmem:[#allocation16 + $0x170] ss:$20 sps:$4 sm:$0xff]  }
 0x52c   :  { %3538 = vmatprep.subr.bf16.mxu1 %v5339_v13  ;;  %v5394_v13 = vld [vmem:[#allocation16 + $0x190] ss:$20 sps:$4 sm:$0xff]  }
 0x5c1   :  { %v2060_v45 = vpop.f32.mrb[16].mxu1 }
 0x5c2   :  { %v2061_v46 = vadd.f32 %v4389_v44, %v2060_v45  ;;  %v4880_v47 = vpop.f32.mrb[17].mxu1  ;;  %v5357_v45 = vld [vmem:[#allocation16 + $0x84] ss:$20 sps:$4 sm:$0xff]  }
 0x5c3   :  { %v2063_v48 = vpop.f32.mrb[18].mxu1  ;;  %v5355_v47 = vld [vmem:[#allocation16 + $0x80] ss:$20 sps:$4 sm:$0xff]  }
 0x5c4   :  { %v2064_v49 = vadd.f32 %v4389_v44, %v2063_v48  ;;  %v4881_v52 = vpop.f32.mrb[19].mxu1  ;;  %v2067_v53 = vmax.f32 %v2061_v46, 0.0  ;;  %v5354_v44 = vld [vmem:[#allocation16 + $0x7c] ss:$20 sps:$4 sm:$0xff]   ;;  %v5352_v46 = vld [vmem:[#allocation16 + $0x78] ss:$20 sps:$4 sm:$0xff]  }
 0x5c5   :  { %v5360_v48 = vld [vmem:[#allocation16 + $0xa4] ss:$20 sps:$4 sm:$0xff]   ;;  %v5358_v52 = vld [vmem:[#allocation16 + $0xa0] ss:$20 sps:$4 sm:$0xff]  }
 0x5c6   :  { %v2068_v54 = vmax.f32 %v2064_v49, 0.0  ;;  %v5363_v49 = vld [vmem:[#allocation16 + $0xac] ss:$20 sps:$4 sm:$0xff]  }
 0x5c8   :  { %v2069_v56 = vpack.c.bf16 %v2068_v54, %v2067_v53  ;;  %v5361_v53 = vld [vmem:[#allocation16 + $0xa8] ss:$20 sps:$4 sm:$0xff]   ;;  %v5366_v54 = vld [vmem:[#allocation16 + $0xcc] ss:$20 sps:$4 sm:$0xff]  }
 0x5ca   :  { %2211 = vmatmul.mubr.bf16.vlgmr.msra.gmra.mrb[12].mxu0 %v2069_v56  ;;  %v5364_v56 = vld [vmem:[#allocation16 + $0xc8] ss:$20 sps:$4 sm:$0xff]  }
 0x5cb   :  { %4717 = vmatpush3.bf16.msra.mxu0 %v5298_v55  ;;  %v5369_v55 = vld [vmem:[#allocation16 + $0xd4] ss:$20 sps:$4 sm:$0xff]  }
 0x5cc   :  { %4718 = vmatprep.subr.bf16.mxu0 %v5302_v57  ;;  %v5367_v57 = vld [vmem:[#allocation16 + $0xd0] ss:$20 sps:$4 sm:$0xff]  }
 0x5cf   :  { %4719 = vmatpush3.bf16.msra.mxu0 %v5303_v58  ;;  %v5372_v58 = vld [vmem:[#allocation16 + $0xf4] ss:$20 sps:$4 sm:$0xff]  }
 0x5d0   :  { %4720 = vmatprep.subr.bf16.mxu0 %v5307_v59  ;;  %v5375_v59 = vld [vmem:[#allocation16 + $0xfc] ss:$20 sps:$4 sm:$0xff]  }
 0x5d3   :  { %4721 = vmatpush3.bf16.msra.mxu0 %v5308_v60  ;;  %v5370_v60 = vld [vmem:[#allocation16 + $0xf0] ss:$20 sps:$4 sm:$0xff]  }
 0x5d4   :  { %4722 = vmatprep.subr.bf16.mxu0 %v5312_v61  ;;  %v5373_v61 = vld [vmem:[#allocation16 + $0xf8] ss:$20 sps:$4 sm:$0xff]  }
 0x5d7   :  { %4723 = vmatpush3.bf16.msra.mxu0 %v5313_v62  ;;  %v5378_v62 = vld [vmem:[#allocation16 + $0x11c] ss:$20 sps:$4 sm:$0xff]  }
 0x5d8   :  { %4724 = vmatprep.subr.bf16.mxu0 %v5317_v63  ;;  %v5381_v63 = vld [vmem:[#allocation16 + $0x124] ss:$20 sps:$4 sm:$0xff]  }
 0x5db   :  { %4725 = vmatpush3.bf16.msra.mxu0 %v5318_v0  ;;  %v5376_v0 = vld [vmem:[#allocation16 + $0x118] ss:$20 sps:$4 sm:$0xff]  }
 0x5dc   :  { %4726 = vmatprep.subr.bf16.mxu0 %v5322_v1  ;;  %v5379_v1 = vld [vmem:[#allocation16 + $0x120] ss:$20 sps:$4 sm:$0xff]  }
 0x5df   :  { %4727 = vmatpush3.bf16.msra.mxu0 %v5323_v2  ;;  %v5384_v2 = vld [vmem:[#allocation16 + $0x144] ss:$20 sps:$4 sm:$0xff]  }
 0x5e0   :  { %4728 = vmatprep.subr.bf16.mxu0 %v5327_v4  ;;  %v5382_v4 = vld [vmem:[#allocation16 + $0x140] ss:$20 sps:$4 sm:$0xff]  }
 0x5e3   :  { %4729 = vmatpush3.bf16.msra.mxu0 %v5328_v6  ;;  %v5390_v6 = vld [vmem:[#allocation16 + $0x16c] ss:$20 sps:$4 sm:$0xff]  }
 0x5e4   :  { %4730 = vmatprep.subr.bf16.mxu0 %v5332_v9  ;;  %v5388_v9 = vld [vmem:[#allocation16 + $0x168] ss:$20 sps:$4 sm:$0xff]  }
 0x5e7   :  { %4731 = vmatpush3.bf16.msra.mxu0 %v5333_v11  ;;  %v5396_v11 = vld [vmem:[#allocation16 + $0x194] ss:$20 sps:$4 sm:$0xff]  }
 0x5e8   :  { %3452 = vmatprep.subr.bf16.mxu0 %v5336_v12  ;;  %v5399_v12 = vld [vmem:[#allocation16 + $0x19c] ss:$20 sps:$4 sm:$0xff]  }
 0x69d   :  { %v2212_v17 = vpop.f32.mrb[12].mxu0 }
 0x69e   :  { %v2213_v18 = vadd.f32 %v2212_v17, %v2091_v15  ;;  %v2214_v19 = vpop.f32.mrb[13].mxu0  ;;  %v5400_v17 = vld [vmem:[#allocation16 + $0x1b8] ss:$20 sps:$4 sm:$0xff]  }
 0x69f   :  { %v2215_v20 = vadd.f32 %v2214_v19, %v2095_v16  ;;  %v2216_v24 = vpop.f32.mrb[14].mxu0  ;;  %v5408_v19 = vld [vmem:[#allocation16 + $0x1e4] ss:$20 sps:$4 sm:$0xff]  }
 0x6a0   :  { %v2217_v25 = vadd.f32 %v2216_v24, %v2091_v15  ;;  %v2218_v26 = vpop.f32.mrb[15].mxu0  ;;  %v2221_v28 = vmax.f32 %v2213_v18, 0.0  ;;  %v5402_v15 = vld [vmem:[#allocation16 + $0x1bc] ss:$20 sps:$4 sm:$0xff]   ;;  %v5403_v18 = vld [vmem:[#allocation16 + $0x1c0] ss:$20 sps:$4 sm:$0xff]  }
 0x6a1   :  { %v2219_v27 = vadd.f32 %v2218_v26, %v2095_v16  ;;  %v2222_v30 = vmax.f32 %v2215_v20, 0.0  ;;  %v5405_v16 = vld [vmem:[#allocation16 + $0x1c4] ss:$20 sps:$4 sm:$0xff]   ;;  %v5411_v20 = vld [vmem:[#allocation16 + $0x1ec] ss:$20 sps:$4 sm:$0xff]  }
 0x6a2   :  { %v2223_v29 = vmax.f32 %v2217_v25, 0.0  ;;  %v5406_v24 = vld [vmem:[#allocation16 + $0x1e0] ss:$20 sps:$4 sm:$0xff]   ;;  %v5409_v25 = vld [vmem:[#allocation16 + $0x1e8] ss:$20 sps:$4 sm:$0xff]  }
 0x6a3   :  { %v2224_v31 = vmax.f32 %v2219_v27, 0.0  ;;  %v5414_v26 = vld [vmem:[#allocation16 + $0x20c] ss:$20 sps:$4 sm:$0xff]   ;;  %v5417_v27 = vld [vmem:[#allocation16 + $0x214] ss:$20 sps:$4 sm:$0xff]  }
 0x6a4   :  { %v2225_v32 = vpack.c.bf16 %v2223_v29, %v2221_v28  ;;  %v5412_v28 = vld [vmem:[#allocation16 + $0x208] ss:$20 sps:$4 sm:$0xff]   ;;  %v5415_v29 = vld [vmem:[#allocation16 + $0x210] ss:$20 sps:$4 sm:$0xff]  }
 0x6a5   :  { %v2226_v33 = vpack.c.bf16 %v2224_v31, %v2222_v30  ;;  %v5420_v30 = vld [vmem:[#allocation16 + $0x234] ss:$20 sps:$4 sm:$0xff]   ;;  %v5423_v31 = vld [vmem:[#allocation16 + $0x23c] ss:$20 sps:$4 sm:$0xff]  }
 0x6a7   :  { %2596 = vmatprep.mubr.bf16.mxu1 %v2226_v33  ;;  %2639 = vmatprep.mubr.bf16.mxu0 %v2226_v33  ;;  %v5421_v33 = vld [vmem:[#allocation16 + $0x238] ss:$20 sps:$4 sm:$0xff]  }
 0x6a8   :  { %2597 = vmatmul.mubr.bf16.vlgmr.msra.gmra.mrb[20].mxu1 %v2225_v32  ;;  %2640 = vmatmul.mubr.bf16.vlgmr.msra.gmra.mrb[16].mxu0 %v2225_v32  ;;  %v5418_v32 = vld [vmem:[#allocation16 + $0x230] ss:$20 sps:$4 sm:$0xff]  }
 0x6a9   :  { %3453 = vmatpush1.bf16.msra.mxu0 %v5334_v34  ;;  %3539 = vmatpush1.bf16.msra.mxu1 %v5337_v35  ;;  %v5426_v34 = vld [vmem:[#allocation16 + $0x25c] ss:$20 sps:$4 sm:$0xff]   ;;  %v5429_v35 = vld [vmem:[#allocation16 + $0x264] ss:$20 sps:$4 sm:$0xff]  }
 0x6aa   :  { %3454 = vmatprep.subr.bf16.mxu0 %v5342_v36  ;;  %3540 = vmatprep.subr.bf16.mxu1 %v5345_v37  ;;  %v5424_v36 = vld [vmem:[#allocation16 + $0x258] ss:$20 sps:$4 sm:$0xff]   ;;  %v5427_v37 = vld [vmem:[#allocation16 + $0x260] ss:$20 sps:$4 sm:$0xff]  }
 0x6ad   :  { %3455 = vmatpush1.bf16.msra.mxu0 %v5340_v38  ;;  %3541 = vmatpush1.bf16.msra.mxu1 %v5343_v39  ;;  %v5432_v38 = vld [vmem:[#allocation16 + $0x284] ss:$20 sps:$4 sm:$0xff]   ;;  %v5435_v39 = vld [vmem:[#allocation16 + $0x28c] ss:$20 sps:$4 sm:$0xff]  }
 0x6ae   :  { %3456 = vmatprep.subr.bf16.mxu0 %v5348_v40  ;;  %3542 = vmatprep.subr.bf16.mxu1 %v5351_v41  ;;  %v2291_v40 = vld [vmem:[%s6196_s10 + $0xa] sm:$0x7] }
 0x6af   :  { %v2296_v41 = vrot.slane %v2291_v40, %v6069_v21 }
 0x6b1   :  { %3457 = vmatpush1.bf16.msra.mxu0 %v5346_v42  ;;  %3543 = vmatpush1.bf16.msra.mxu1 %v5349_v43  ;;  %v2300_v42 = vrot.slane %v2291_v40, %v6072_v23 }
 0x6b2   :  { %3458 = vmatprep.subr.bf16.mxu0 %v5354_v44  ;;  %3544 = vmatprep.subr.bf16.mxu1 %v5357_v45  ;;  %v2304_v45 = vrot.slane %v2291_v40, %v6062_v51  ;;  %v5478_v40 = vld [vmem:[#allocation16 + $0x150] ss:$20 sps:$4 sm:$0xff]  }
 0x6b5   :  { %3459 = vmatpush1.bf16.msra.mxu0 %v5352_v46  ;;  %3545 = vmatpush1.bf16.msra.mxu1 %v5355_v47 }
 0x6b6   :  { %3460 = vmatprep.subr.bf16.mxu0 %v5360_v48  ;;  %3546 = vmatprep.subr.bf16.mxu1 %v5363_v49 }
 0x6b9   :  { %3461 = vmatpush1.bf16.msra.mxu0 %v5358_v52  ;;  %3547 = vmatpush1.bf16.msra.mxu1 %v5361_v53 }
 0x6ba   :  { %3462 = vmatprep.subr.bf16.mxu0 %v5366_v54  ;;  %3548 = vmatprep.subr.bf16.mxu1 %v5369_v55 }
 0x6bd   :  { %3463 = vmatpush1.bf16.msra.mxu0 %v5364_v56  ;;  %3549 = vmatpush1.bf16.msra.mxu1 %v5367_v57 }
 0x6be   :  { %3464 = vmatprep.subr.bf16.mxu0 %v5372_v58  ;;  %3550 = vmatprep.subr.bf16.mxu1 %v5375_v59 }
 0x6c1   :  { %3465 = vmatpush1.bf16.msra.mxu0 %v5370_v60  ;;  %3551 = vmatpush1.bf16.msra.mxu1 %v5373_v61 }
 0x6c2   :  { %3466 = vmatprep.subr.bf16.mxu0 %v5378_v62  ;;  %3552 = vmatprep.subr.bf16.mxu1 %v5381_v63 }
 0x6c5   :  { %3467 = vmatpush1.bf16.msra.mxu0 %v5376_v0  ;;  %3553 = vmatpush1.bf16.msra.mxu1 %v5379_v1 }
 0x6c6   :  { %3468 = vmatprep.subr.bf16.mxu0 %v5384_v2  ;;  %3554 = vmatprep.subr.bf16.mxu1 %v5387_v3 }
 0x6c9   :  { %3469 = vmatpush1.bf16.msra.mxu0 %v5382_v4  ;;  %3555 = vmatpush1.bf16.msra.mxu1 %v5385_v5 }
 0x6ca   :  { %3470 = vmatprep.subr.bf16.mxu0 %v5390_v6  ;;  %3556 = vmatprep.subr.bf16.mxu1 %v5393_v8  ;;  %v5430_v6 = vld [vmem:[#allocation16 + $0x280] ss:$20 sps:$4 sm:$0xff]   ;;  %v5433_v8 = vld [vmem:[#allocation16 + $0x288] ss:$20 sps:$4 sm:$0xff]  }
 0x6cd   :  { %3471 = vmatpush1.bf16.msra.mxu0 %v5388_v9  ;;  %3557 = vmatpush1.bf16.msra.mxu1 %v5391_v10  ;;  %v5438_v9 = vld [vmem:[#allocation16 + $0x2ac] ss:$20 sps:$4 sm:$0xff]   ;;  %v5441_v10 = vld [vmem:[#allocation16 + $0x2b4] ss:$20 sps:$4 sm:$0xff]  }
 0x6ce   :  { %3472 = vmatprep.subr.bf16.mxu0 %v5396_v11  ;;  %3558 = vmatprep.subr.bf16.mxu1 %v5399_v12  ;;  %v5436_v12 = vld [vmem:[#allocation16 + $0x2a8] ss:$20 sps:$4 sm:$0xff]  }
 0x6d1   :  { %3473 = vmatpush1.bf16.msra.mxu0 %v5394_v13  ;;  %3559 = vmatpush1.bf16.msra.mxu1 %v5397_v14  ;;  %v5439_v13 = vld [vmem:[#allocation16 + $0x2b0] ss:$20 sps:$4 sm:$0xff]   ;;  %v5444_v14 = vld [vmem:[#allocation16 + $0x2d4] ss:$20 sps:$4 sm:$0xff]  }
 0x6d2   :  { %3474 = vmatprep.subr.bf16.mxu0 %v5402_v15  ;;  %3560 = vmatprep.subr.bf16.mxu1 %v5405_v16  ;;  %v5447_v15 = vld [vmem:[#allocation16 + $0x2dc] ss:$20 sps:$4 sm:$0xff]  }
 0x6d3   :  { %v5442_v16 = vld [vmem:[#allocation16 + $0x2d0] ss:$20 sps:$4 sm:$0xff]  }
 0x6d5   :  { %3475 = vmatpush1.bf16.msra.mxu0 %v5400_v17  ;;  %3561 = vmatpush1.bf16.msra.mxu1 %v5403_v18  ;;  %v5445_v17 = vld [vmem:[#allocation16 + $0x2d8] ss:$20 sps:$4 sm:$0xff]   ;;  %v5450_v18 = vld [vmem:[#allocation16 + $0x2fc] ss:$20 sps:$4 sm:$0xff]  }
 0x6d6   :  { %3476 = vmatprep.subr.bf16.mxu0 %v5408_v19  ;;  %3562 = vmatprep.subr.bf16.mxu1 %v5411_v20  ;;  %v5453_v19 = vld [vmem:[#allocation16 + $0x304] ss:$20 sps:$4 sm:$0xff]  }
 0x6d7   :  { %v5448_v20 = vld [vmem:[#allocation16 + $0x2f8] ss:$20 sps:$4 sm:$0xff]  }
 0x6d9   :  { %3477 = vmatpush1.bf16.msra.mxu0 %v5406_v24  ;;  %3563 = vmatpush1.bf16.msra.mxu1 %v5409_v25  ;;  %v5451_v24 = vld [vmem:[#allocation16 + $0x300] ss:$20 sps:$4 sm:$0xff]   ;;  %v5456_v25 = vld [vmem:[#allocation16 + $0x324] ss:$20 sps:$4 sm:$0xff]  }
 0x6da   :  { %3478 = vmatprep.subr.bf16.mxu0 %v5414_v26  ;;  %3564 = vmatprep.subr.bf16.mxu1 %v5417_v27  ;;  %v5459_v26 = vld [vmem:[#allocation16 + $0x32c] ss:$20 sps:$4 sm:$0xff]  }
 0x6db   :  { %v5454_v27 = vld [vmem:[#allocation16 + $0x320] ss:$20 sps:$4 sm:$0xff]  }
 0x6dd   :  { %3479 = vmatpush1.bf16.msra.mxu0 %v5412_v28  ;;  %3565 = vmatpush1.bf16.msra.mxu1 %v5415_v29  ;;  %v5462_v28 = vld [vmem:[#allocation16 + $0x34c] ss:$20 sps:$4 sm:$0xff]   ;;  %v5465_v29 = vld [vmem:[#allocation16 + $0x354] ss:$20 sps:$4 sm:$0xff]  }
 0x6de   :  { %3480 = vmatprep.subr.bf16.mxu0 %v5420_v30  ;;  %3566 = vmatprep.subr.bf16.mxu1 %v5423_v31  ;;  %v5460_v30 = vld [vmem:[#allocation16 + $0x348] ss:$20 sps:$4 sm:$0xff]   ;;  %v5463_v31 = vld [vmem:[#allocation16 + $0x350] ss:$20 sps:$4 sm:$0xff]  }
 0x6e1   :  { %3481 = vmatpush1.bf16.msra.mxu0 %v5418_v32  ;;  %3567 = vmatpush1.bf16.msra.mxu1 %v5421_v33  ;;  %v5468_v32 = vld [vmem:[#allocation16 + $0x374] ss:$20 sps:$4 sm:$0xff]   ;;  %v5471_v33 = vld [vmem:[#allocation16 + $0x37c] ss:$20 sps:$4 sm:$0xff]  }
 0x6e2   :  { %3482 = vmatprep.subr.bf16.mxu0 %v5426_v34  ;;  %3568 = vmatprep.subr.bf16.mxu1 %v5429_v35  ;;  %v5466_v34 = vld [vmem:[#allocation16 + $0x370] ss:$20 sps:$4 sm:$0xff]   ;;  %v5469_v35 = vld [vmem:[#allocation16 + $0x378] ss:$20 sps:$4 sm:$0xff]  }
 0x6e5   :  { %3483 = vmatpush1.bf16.msra.mxu0 %v5424_v36  ;;  %3569 = vmatpush1.bf16.msra.mxu1 %v5427_v37  ;;  %v5474_v36 = vld [vmem:[#allocation16 + $0x39c] ss:$20 sps:$4 sm:$0xff]   ;;  %v5477_v37 = vld [vmem:[#allocation16 + $0x3a4] ss:$20 sps:$4 sm:$0xff]  }
 0x6e6   :  { %3495 = vmatprep.subr.bf16.mxu0 %v5432_v38  ;;  %3581 = vmatprep.subr.bf16.mxu1 %v5435_v39  ;;  %v5472_v38 = vld [vmem:[#allocation16 + $0x398] ss:$20 sps:$4 sm:$0xff]   ;;  %v5475_v39 = vld [vmem:[#allocation16 + $0x3a0] ss:$20 sps:$4 sm:$0xff]  }
 0x77b   :  { %v2598_v43 = vpop.f32.mrb[20].mxu1  ;;  %v4732_v44 = vpop.f32.mrb[16].mxu0 }
 0x77c   :  { %v2599_v46 = vadd.f32 %v2598_v43, %v2296_v41  ;;  %v2600_v47 = vpop.f32.mrb[21].mxu1  ;;  %v4733_v48 = vpop.f32.mrb[17].mxu0  ;;  %v5481_v43 = vld [vmem:[#allocation16 + $0x178] ss:$20 sps:$4 sm:$0xff]  }
 0x77d   :  { %v2601_v49 = vadd.f32 %v2600_v47, %v2300_v42  ;;  %v4734_v52 = vadd.f32 %v4733_v48, %v4732_v44  ;;  %v2602_v53 = vpop.f32.mrb[22].mxu1  ;;  %v4735_v54 = vpop.f32.mrb[18].mxu0  ;;  %v5482_v44 = vld [vmem:[#allocation16 + $0x38] ss:$20 sps:$4 sm:$0xff]   ;;  %v5485_v47 = vld [vmem:[#allocation16 + $0x60] ss:$20 sps:$4 sm:$0xff]  }
 0x77e   :  { %v2603_v55 = vadd.f32 %v2602_v53, %v2296_v41  ;;  %v2604_v56 = vpop.f32.mrb[23].mxu1  ;;  %v4736_v57 = vpop.f32.mrb[19].mxu0  ;;  %v2648_v61 = vmax.f32 %v2599_v46, 0.0  ;;  %v5479_v41 = vld [vmem:[#allocation16 + $0x10] ss:$20 sps:$4 sm:$0xff]  }
 0x77f   :  { %v2642_v58 = vadd.f32 %v4734_v52, %v2304_v45  ;;  %v2605_v59 = vadd.f32 %v2604_v56, %v2300_v42  ;;  %v4737_v60 = vadd.f32 %v4736_v57, %v4735_v54  ;;  %v2649_v63 = vmax.f32 %v2601_v49, 0.0  ;;  %v5480_v42 = vld [vmem:[#allocation16 + $0x290] ss:$20 sps:$4 sm:$0xff]   ;;  %v5484_v46 = vld [vmem:[#allocation16 + $0x1a0] ss:$20 sps:$4 sm:$0xff]  }
 0x780   :  { %v2651_v62 = vmax.f32 %v2603_v55, 0.0  ;;  %v5486_v48 = vld [vmem:[#allocation16 + $0x2e0] ss:$20 sps:$4 sm:$0xff]   ;;  %v5487_v49 = vld [vmem:[#allocation16 + $0x1c8] ss:$20 sps:$4 sm:$0xff]  }
 0x781   :  { %v2652_v0 = vmax.f32 %v2605_v59, 0.0  ;;  %v2645_v1 = vadd.f32 %v4737_v60, %v2304_v45  ;;  %v2650_v3 = vmax.f32 %v2642_v58, 0.0  ;;  %v5483_v45 = vld [vmem:[#allocation16 + $0x2b8] ss:$20 sps:$4 sm:$0xff]   ;;  %v5488_v52 = vld [vmem:[#allocation16 + $0x88] ss:$20 sps:$4 sm:$0xff]  }
 0x782   :  { %v6123_v2 = vpack.c.bf16 %v2651_v62, %v2648_v61  ;;  %v5489_v53 = vld [vmem:[#allocation16 + $0x308] ss:$20 sps:$4 sm:$0xff]   ;;  %v5490_v54 = vld [vmem:[#allocation16 + $0x1f0] ss:$20 sps:$4 sm:$0xff]   ;;  %v5493_v57 = vld [vmem:[#allocation16 + $0x218] ss:$20 sps:$4 sm:$0xff]  }
 0x783   :  { %v6125_v4 = vpack.c.bf16 %v2652_v0, %v2649_v63  ;;  %v2653_v5 = vmax.f32 %v2645_v1, 0.0  ;;  %v5491_v55 = vld [vmem:[#allocation16 + $0xb0] ss:$20 sps:$4 sm:$0xff]   ;;  %v5494_v58 = vld [vmem:[#allocation16 + $0xd8] ss:$20 sps:$4 sm:$0xff]  }
 0x784   :  { %v5492_v56 = vld [vmem:[#allocation16 + $0x330] ss:$20 sps:$4 sm:$0xff]   ;;  %v5495_v59 = vld [vmem:[#allocation16 + $0x358] ss:$20 sps:$4 sm:$0xff]   ;;  %v5496_v60 = vld [vmem:[#allocation16 + $0x240] ss:$20 sps:$4 sm:$0xff]  }
 0x785   :  { %v6127_v11 = vpack.c.bf16 %v2653_v5, %v2650_v3  ;;  %3484 = vmatprep.mubr.bf16.mxu0 %v6125_v4  ;;  %3570 = vmatprep.mubr.bf16.mxu1 %v6125_v4  ;;  %v5497_v61 = vld [vmem:[#allocation16 + $0x100] ss:$20 sps:$4 sm:$0xff]   ;;  %v5499_v63 = vld [vmem:[#allocation16 + $0x268] ss:$20 sps:$4 sm:$0xff]  }
 0x786   :  { %3485 = vmatmul.mubr.bf16.vlgmr.msra.gmra.mrb[20].mxu0 %v6123_v2  ;;  %3571 = vmatmul.mubr.bf16.vlgmr.msra.gmra.mrb[24].mxu1 %v6123_v2  ;;  %v5498_v62 = vld [vmem:[#allocation16 + $0x380] ss:$20 sps:$4 sm:$0xff]   ;;  %v5500_v0 = vld [vmem:[#allocation16 + $0x128] ss:$20 sps:$4 sm:$0xff]  }
 0x787   :  { %3496 = vmatpush1.bf16.msra.mxu0 %v5430_v6  ;;  %3582 = vmatpush1.bf16.msra.mxu1 %v5433_v8  ;;  %v5501_v1 = vld [vmem:[#allocation16 + $0x3a8] ss:$20 sps:$4 sm:$0xff]   ;;  %v5502_v3 = vld [vmem:[#allocation17 + $0x40] sm:$0xff]  }
 0x788   :  { %3497 = vmatprep.subr.bf16.mxu0 %v5438_v9  ;;  %3583 = vmatprep.subr.bf16.mxu1 %v5441_v10  ;;  %v5504_v5 = vld [vmem:[#allocation17] sm:$0xff]   ;;  %v5506_v8 = vld [vmem:[#allocation17 + $0x48] sm:$0xff]  }
 0x789   :  { %3527 = vmatprep.mubr.bf16.mxu0 %v5820_v7  ;;  %3613 = vmatprep.mubr.bf16.mxu1 %v5820_v7  ;;  %v5457_v7 = vld [vmem:[#allocation16 + $0x328] ss:$20 sps:$4 sm:$0xff]   ;;  %v5505_v6 = vld [vmem:[#allocation17 + $0x80] sm:$0xff]  }
 0x78a   :  { %v5507_v9 = vld [vmem:[#allocation17 + $0xc8] sm:$0xff]  }
 0x78b   :  { %3498 = vmatpush1.bf16.msra.mxu0 %v5436_v12  ;;  %3584 = vmatpush1.bf16.msra.mxu1 %v5439_v13  ;;  %v5508_v10 = vld [vmem:[#allocation17 + $0x8] sm:$0xff]   ;;  %v5510_v13 = vld [vmem:[#allocation17 + $0x50] sm:$0xff]  }
 0x78c   :  { %3499 = vmatprep.subr.bf16.mxu0 %v5444_v14  ;;  %3585 = vmatprep.subr.bf16.mxu1 %v5447_v15  ;;  %v5509_v12 = vld [vmem:[#allocation17 + $0x88] sm:$0xff]   ;;  %v5511_v14 = vld [vmem:[#allocation17 + $0xd0] sm:$0xff]  }
 0x78d   :  { %v5512_v15 = vld [vmem:[#allocation17 + $0x10] sm:$0xff]  }
 0x78f   :  { %3500 = vmatpush1.bf16.msra.mxu0 %v5442_v16  ;;  %3586 = vmatpush1.bf16.msra.mxu1 %v5445_v17  ;;  %v5513_v16 = vld [vmem:[#allocation17 + $0x90] sm:$0xff]   ;;  %v5514_v17 = vld [vmem:[#allocation17 + $0x58] sm:$0xff]  }
 0x790   :  { %3501 = vmatprep.subr.bf16.mxu0 %v5450_v18  ;;  %3587 = vmatprep.subr.bf16.mxu1 %v5453_v19  ;;  %v5515_v18 = vld [vmem:[#allocation17 + $0xd8] sm:$0xff]   ;;  %v5518_v19 = vld [vmem:[#allocation17 + $0x60] sm:$0xff]  }
 0x793   :  { %3502 = vmatpush1.bf16.msra.mxu0 %v5448_v20  ;;  %3588 = vmatpush1.bf16.msra.mxu1 %v5451_v24  ;;  %v5519_v20 = vld [vmem:[#allocation17 + $0xe0] sm:$0xff]  }
 0x794   :  { %3503 = vmatprep.subr.bf16.mxu0 %v5456_v25  ;;  %3589 = vmatprep.subr.bf16.mxu1 %v5459_v26  ;;  %v5520_v24 = vld [vmem:[#allocation17 + $0x20] sm:$0xff]   ;;  %v5522_v26 = vld [vmem:[#allocation17 + $0x68] sm:$0xff]  }
 0x795   :  { %v5521_v25 = vld [vmem:[#allocation17 + $0xa0] sm:$0xff]  }
 0x797   :  { %3504 = vmatpush1.bf16.msra.mxu0 %v5454_v27  ;;  %3590 = vmatpush1.bf16.msra.mxu1 %v5457_v7  ;;  %v5523_v27 = vld [vmem:[#allocation17 + $0xe8] sm:$0xff]  }
 0x798   :  { %3505 = vmatprep.subr.bf16.mxu0 %v5462_v28  ;;  %3591 = vmatprep.subr.bf16.mxu1 %v5465_v29  ;;  %v5524_v7 = vld [vmem:[#allocation17 + $0x28] sm:$0xff]   ;;  %v5526_v29 = vld [vmem:[#allocation17 + $0x70] sm:$0xff]  }
 0x799   :  { %v5525_v28 = vld [vmem:[#allocation17 + $0xa8] sm:$0xff]  }
 0x79b   :  { %3506 = vmatpush1.bf16.msra.mxu0 %v5460_v30  ;;  %3592 = vmatpush1.bf16.msra.mxu1 %v5463_v31  ;;  %v5527_v30 = vld [vmem:[#allocation17 + $0xf0] sm:$0xff]  }
 0x79c   :  { %3507 = vmatprep.subr.bf16.mxu0 %v5468_v32  ;;  %3593 = vmatprep.subr.bf16.mxu1 %v5471_v33  ;;  %v5528_v31 = vld [vmem:[#allocation17 + $0x30] sm:$0xff]   ;;  %v5530_v33 = vld [vmem:[#allocation17 + $0x78] sm:$0xff]  }
 0x79d   :  { %v5529_v32 = vld [vmem:[#allocation17 + $0xb0] sm:$0xff]  }
 0x79f   :  { %3508 = vmatpush1.bf16.msra.mxu0 %v5466_v34  ;;  %3594 = vmatpush1.bf16.msra.mxu1 %v5469_v35  ;;  %v5531_v34 = vld [vmem:[#allocation17 + $0xf8] sm:$0xff]  }
 0x7a0   :  { %3509 = vmatprep.subr.bf16.mxu0 %v5474_v36  ;;  %3595 = vmatprep.subr.bf16.mxu1 %v5477_v37  ;;  %v5532_v35 = vld [vmem:[#allocation17 + $0x38] sm:$0xff]  }
 0x7a1   :  { %v5533_v36 = vld [vmem:[#allocation17 + $0xb8] sm:$0xff]  }
 0x7a2   :  { %v2801_v37 = vld [vmem:[%s6196_s10 + $0xd] sm:$0x1f] }
 0x7a3   :  { %3510 = vmatpush1.bf16.msra.mxu0 %v5472_v38  ;;  %3596 = vmatpush1.bf16.msra.mxu1 %v5475_v39  ;;  %v2817_v38 = vsub.s32 3, %v6059_v50  ;;  %v2806_v39 = vrot.slane %v2801_v37, %v6069_v21 }
 0x7a4   :  { %4738 = vmatprep.subr.bf16.mxu0 %v5478_v40  ;;  %4882 = vmatprep.subr.bf16.mxu1 %v5818_v22  ;;  %v2814_v40 = vrot.slane %v2801_v37, %v6062_v51 }
 0x7a6   :  { %3528 = vmatmul.mubr.bf16.vlgmr.msra.gmra.mrb[20].mxu0 %v6127_v11  ;;  %3614 = vmatmul.mubr.bf16.vlgmr.msra.gmra.mrb[24].mxu1 %v6127_v11 }
 0x7a7   :  { %4739 = vmatpush3.bf16.msra.mxu0 %v5479_v41  ;;  %3656 = vmatprep.mubr.bf16.mxu0 %v6125_v4  ;;  %v5503_v4 = vld [vmem:[#allocation17 + $0xc0] sm:$0xff]   ;;  %v2810_v41 = vrot.slane %v2801_v37, %v6072_v23 }
 0x7a8   :  { %4883 = vmatpush3.bf16.msra.mxu1 %v5480_v42  ;;  %4740 = vmatprep.subr.bf16.mxu0 %v5481_v43  ;;  %v2818_v42 = vrot.slane %v2801_v37, %v2817_v38 }
 0x7a9   :  { %4884 = vmatprep.subr.bf16.mxu1 %v5818_v22  ;;  %4898 = vmatprep.mubr.msk.bf16.mxu1 %vm5819_vm0, %v5818_v22 }
 0x7ab   :  { %4741 = vmatpush3.bf16.msra.mxu0 %v5482_v44 }
 0x7ac   :  { %4885 = vmatpush3.bf16.msra.mxu1 %v5483_v45  ;;  %4742 = vmatprep.subr.bf16.mxu0 %v5484_v46 }
 0x7ad   :  { %4886 = vmatprep.subr.bf16.mxu1 %v5818_v22 }
 0x7af   :  { %4743 = vmatpush3.bf16.msra.mxu0 %v5485_v47 }
 0x7b0   :  { %4887 = vmatpush3.bf16.msra.mxu1 %v5486_v48  ;;  %4744 = vmatprep.subr.bf16.mxu0 %v5487_v49 }
 0x7b1   :  { %4888 = vmatprep.subr.bf16.mxu1 %v5818_v22 }
 0x7b3   :  { %4745 = vmatpush3.bf16.msra.mxu0 %v5488_v52 }
 0x7b4   :  { %4889 = vmatpush3.bf16.msra.mxu1 %v5489_v53  ;;  %4746 = vmatprep.subr.bf16.mxu0 %v5490_v54 }
 0x7b5   :  { %4890 = vmatprep.subr.bf16.mxu1 %v5818_v22 }
 0x7b7   :  { %4747 = vmatpush3.bf16.msra.mxu0 %v5491_v55 }
 0x7b8   :  { %4891 = vmatpush3.bf16.msra.mxu1 %v5492_v56  ;;  %4748 = vmatprep.subr.bf16.mxu0 %v5493_v57 }
 0x7b9   :  { %4892 = vmatprep.subr.bf16.mxu1 %v5818_v22 }
 0x7bb   :  { %4749 = vmatpush3.bf16.msra.mxu0 %v5494_v58 }
 0x7bc   :  { %4893 = vmatpush3.bf16.msra.mxu1 %v5495_v59  ;;  %4750 = vmatprep.subr.bf16.mxu0 %v5496_v60 }
 0x7bd   :  { %4894 = vmatprep.subr.bf16.mxu1 %v5818_v22 }
 0x7bf   :  { %4751 = vmatpush3.bf16.msra.mxu0 %v5497_v61 }
 0x7c0   :  { %4895 = vmatpush3.bf16.msra.mxu1 %v5498_v62  ;;  %4752 = vmatprep.subr.bf16.mxu0 %v5499_v63 }
 0x7c1   :  { %4896 = vmatprep.subr.bf16.mxu1 %v5818_v22 }
 0x7c3   :  { %4753 = vmatpush3.bf16.msra.mxu0 %v5500_v0 }
 0x7c4   :  { %4897 = vmatpush3.bf16.msra.mxu1 %v5501_v1  ;;  %4769 = vmatprep.subr.bf16.mxu0 %v5502_v3 }
 0x7c5   :  { %4791 = vmatprep.subr.bf16.mxu1 %v5503_v4 }
 0x7c6   :  { %3657 = vmatmul.mubr.bf16.vlgmr.msra.gmra.mrb[24].mxu0 %v6123_v2  ;;  %v5516_v2 = vld [vmem:[#allocation17 + $0x18] sm:$0xff]  }
 0x7c7   :  { %4899 = vmatmul.mubr.bf16.vlgmr.msra.gmra.mrb[28].mxu1 %v6127_v11  ;;  %4770 = vmatpush3.bf16.msra.mxu0 %v5504_v5  ;;  %v5517_v11 = vld [vmem:[#allocation17 + $0x98] sm:$0xff]  }
 0x7c8   :  { %4792 = vmatpush3.bf16.msra.mxu1 %v5505_v6  ;;  %4771 = vmatprep.subr.bf16.mxu0 %v5506_v8  ;;  %v5534_v8 = vld [vmem:[#allocation17 + $0x100] sm:$0xff]  }
 0x7c9   :  { %4793 = vmatprep.subr.bf16.mxu1 %v5507_v9  ;;  %v5535_v9 = vld [vmem:[#allocation17 + $0x108] sm:$0xff]  }
 0x7cb   :  { %4772 = vmatpush3.bf16.msra.mxu0 %v5508_v10  ;;  %v5536_v10 = vld [vmem:[#allocation17 + $0x110] sm:$0xff]  }
 0x7cc   :  { %4794 = vmatpush3.bf16.msra.mxu1 %v5509_v12  ;;  %4773 = vmatprep.subr.bf16.mxu0 %v5510_v13  ;;  %v5537_v12 = vld [vmem:[#allocation17 + $0x118] sm:$0xff]   ;;  %v5538_v13 = vld [vmem:[#allocation17 + $0x120] sm:$0xff]  }
 0x7cd   :  { %4795 = vmatprep.subr.bf16.mxu1 %v5511_v14  ;;  %v2821_v14 = vsub.s32 4, %v6059_v50  ;;  %v5541_v50 = vld [vmem:[#allocation17 + $0x138] sm:$0xff]  }
 0x7cf   :  { %4774 = vmatpush3.bf16.msra.mxu0 %v5512_v15  ;;  %v5539_v15 = vld [vmem:[#allocation17 + $0x128] sm:$0xff]  }
 0x7d0   :  { %4796 = vmatpush3.bf16.msra.mxu1 %v5513_v16  ;;  %4775 = vmatprep.subr.bf16.mxu0 %v5514_v17  ;;  %v2822_v17 = vrot.slane %v2801_v37, %v2821_v14  ;;  %v4582_v37 = vld [vmem:[%s6196_s10 + $0x12] ss:$0 sm:$0xff]  ;;  %s5762_s10 = scalar_lea.vmem %s4179_s3, 256 }
 0x7d1   :  { %4797 = vmatprep.subr.bf16.mxu1 %v5515_v18  ;;  %v5540_v18 = vld [vmem:[#allocation17 + $0x130] sm:$0xff]   ;;  %p5763_p10 = scmp.ne.s32.totalorder %s4179_s3, %s5762_s10  ;;  %p5768_p12 = scmp.lt.s32.totalorder %s5762_s10, %s5762_s10 }
 0x7d3   :  { %4776 = vmatpush3.bf16.msra.mxu0 %v5516_v2  ;;  %p5769_p13 = por %p5768_p12, %p5767_p11 }
 0x7d4   :  { %4798 = vmatpush3.bf16.msra.mxu1 %v5517_v11  ;;  %4777 = vmatprep.subr.bf16.mxu0 %v5518_v19 }
 0x7d5   :  { %4799 = vmatprep.subr.bf16.mxu1 %v5519_v20  ;;  %p5770_p0 = pnand %p5769_p13, %p5763_p10 }
 0x7d7   :  { %4778 = vmatpush3.bf16.msra.mxu0 %v5520_v24 }
 0x7d8   :  { %4800 = vmatpush3.bf16.msra.mxu1 %v5521_v25  ;;  %4779 = vmatprep.subr.bf16.mxu0 %v5522_v26 }
 0x7d9   :  { %4801 = vmatprep.subr.bf16.mxu1 %v5523_v27 }
 0x7db   :  { %4780 = vmatpush3.bf16.msra.mxu0 %v5524_v7 }
 0x7dc   :  { %4802 = vmatpush3.bf16.msra.mxu1 %v5525_v28  ;;  %4781 = vmatprep.subr.bf16.mxu0 %v5526_v29 }
 0x7dd   :  { %4803 = vmatprep.subr.bf16.mxu1 %v5527_v30 }
 0x7df   :  { %4782 = vmatpush3.bf16.msra.mxu0 %v5528_v31 }
 0x7e0   :  { %4804 = vmatpush3.bf16.msra.mxu1 %v5529_v32  ;;  %4783 = vmatprep.subr.bf16.mxu0 %v5530_v33 }
 0x7e1   :  { %4805 = vmatprep.subr.bf16.mxu1 %v5531_v34 }
 0x7e3   :  { %4784 = vmatpush3.bf16.msra.mxu0 %v5532_v35 }
 0x7e4   :  { %4806 = vmatpush3.bf16.msra.mxu1 %v5533_v36  ;;  %4902 = vmatprep.subr.bf16.mxu0 %v5818_v22 }
 0x879   :  { %v3529_v43 = vpop.f32.mrb[20].mxu0  ;;  %v3615_v44 = vpop.f32.mrb[24].mxu1 }
 0x87a   :  { %v4930_v45 = vadd.f32 %v3529_v43, %v2806_v39  ;;  %v4934_v46 = vadd.f32 %v3615_v44, %v2814_v40  ;;  %v3531_v47 = vpop.f32.mrb[21].mxu0  ;;  %v3617_v48 = vpop.f32.mrb[25].mxu1 }
 0x87b   :  { %v4931_v49 = vadd.f32 %v3531_v47, %v2810_v41  ;;  %v4935_v52 = vadd.f32 %v3617_v48, %v2818_v42  ;;  %v3533_v53 = vpop.f32.mrb[22].mxu0  ;;  %v3619_v54 = vpop.f32.mrb[26].mxu1 }
 0x87c   :  { %v4932_v55 = vadd.f32 %v3533_v53, %v2806_v39  ;;  %v4936_v56 = vadd.f32 %v3619_v54, %v2814_v40  ;;  %v3535_v57 = vpop.f32.mrb[23].mxu0  ;;  %v3621_v58 = vpop.f32.mrb[27].mxu1  ;;  %v3706_v51 = vmax.f32 %v4930_v45, 0.0  ;;  %v3708_v60 = vmax.f32 %v4934_v46, 0.0 }
 0x87d   :  { %v4933_v21 = vadd.f32 %v3535_v57, %v2810_v41  ;;  %v4937_v59 = vadd.f32 %v3621_v58, %v2818_v42  ;;  %v3707_v62 = vmax.f32 %v4931_v49, 0.0  ;;  %v3709_v63 = vmax.f32 %v4935_v52, 0.0 }
 0x87e   :  { %v3711_v23 = vmax.f32 %v4932_v55, 0.0  ;;  %v3713_v61 = vmax.f32 %v4936_v56, 0.0 }
 0x87f   :  { %v3712_v0 = vmax.f32 %v4933_v21, 0.0  ;;  %v3714_v1 = vmax.f32 %v4937_v59, 0.0 }
 0x880   :  { %v3716_v3 = vpack.c.bf16 %v3711_v23, %v3706_v51  ;;  %v3718_v4 = vpack.c.bf16 %v3713_v61, %v3708_v60 }
 0x881   :  { %v3717_v5 = vpack.c.bf16 %v3712_v0, %v3707_v62  ;;  %v3719_v6 = vpack.c.bf16 %v3714_v1, %v3709_v63 }
 0x883   :  { %4080 = vmatprep.mubr.bf16.mxu0 %v3717_v5  ;;  %4121 = vmatprep.mubr.bf16.mxu1 %v3719_v6 }
 0x884   :  { %4081 = vmatmul.mubr.bf16.vlgmr.msra.gmra.mrb[28].mxu0 %v3716_v3  ;;  %4122 = vmatmul.mubr.bf16.vlgmr.msra.gmra.mrb[32].mxu1 %v3718_v4 }
 0x885   :  { %4903 = vmatpush3.bf16.msra.mxu0 %v5534_v8  ;;  %4918 = vmatprep.mubr.msk.bf16.mxu0 %vm5819_vm0, %v5818_v22 }
 0x886   :  { %4904 = vmatprep.subr.bf16.mxu0 %v5818_v22 }
 0x889   :  { %4905 = vmatpush3.bf16.msra.mxu0 %v5535_v9 }
 0x88a   :  { %4906 = vmatprep.subr.bf16.mxu0 %v5818_v22 }
 0x88d   :  { %4907 = vmatpush3.bf16.msra.mxu0 %v5536_v10 }
 0x88e   :  { %4908 = vmatprep.subr.bf16.mxu0 %v5818_v22 }
 0x891   :  { %4909 = vmatpush3.bf16.msra.mxu0 %v5537_v12 }
 0x892   :  { %4910 = vmatprep.subr.bf16.mxu0 %v5818_v22 }
 0x895   :  { %4911 = vmatpush3.bf16.msra.mxu0 %v5538_v13 }
 0x896   :  { %4912 = vmatprep.subr.bf16.mxu0 %v5818_v22 }
 0x899   :  { %v4754_v16 = vpop.f32.mrb[24].mxu0  ;;  %4913 = vmatpush3.bf16.msra.mxu0 %v5539_v15 }
 0x89a   :  { %v3699_v2 = vpop.f32.mrb[28].mxu1  ;;  %v4755_v11 = vpop.f32.mrb[25].mxu0  ;;  %4914 = vmatprep.subr.bf16.mxu0 %v5818_v22 }
 0x89b   :  { %v4756_v19 = vadd.f32 %v4755_v11, %v4754_v16  ;;  %v4900_v20 = vpop.f32.mrb[29].mxu1  ;;  %v4757_v24 = vpop.f32.mrb[26].mxu0 }
 0x89c   :  { %v3702_v25 = vpop.f32.mrb[30].mxu1  ;;  %v4758_v26 = vpop.f32.mrb[27].mxu0 }
 0x89d   :  { %v3659_v27 = vadd.f32 %v4756_v19, %v2822_v17  ;;  %v4759_v7 = vadd.f32 %v4758_v26, %v4757_v24  ;;  %v4901_v28 = vpop.f32.mrb[31].mxu1  ;;  %4915 = vmatpush3.bf16.msra.mxu0 %v5540_v18 }
 0x89e   :  { %4916 = vmatprep.subr.bf16.mxu0 %v5818_v22 }
 0x89f   :  { %v3700_v29 = vadd.f32 %v3699_v2, %v3659_v27  ;;  %v3662_v30 = vadd.f32 %v4759_v7, %v2822_v17 }
 0x8a1   :  { %v3703_v31 = vadd.f32 %v3702_v25, %v3662_v30  ;;  %4917 = vmatpush3.bf16.msra.mxu0 %v5541_v50  ;;  %v3710_v32 = vmax.f32 %v3700_v29, 0.0 }
 0x8a3   :  { %v3715_v33 = vmax.f32 %v3703_v31, 0.0 }
 0x8a5   :  { %v3720_v34 = vpack.c.bf16 %v3715_v33, %v3710_v32 }
 0x8a7   :  { %4919 = vmatmul.mubr.bf16.vlgmr.msra.gmra.mrb[32].mxu0 %v3720_v34 }
 0x957   :  { %v4785_v35 = vpop.f32.mrb[28].mxu0  ;;  %v4807_v36 = vpop.f32.mrb[32].mxu1 }
 0x958   :  { %v4786_v38 = vpop.f32.mrb[29].mxu0  ;;  %v4808_v39 = vpop.f32.mrb[33].mxu1 }
 0x959   :  { %v4787_v40 = vadd.f32 %v4786_v38, %v4785_v35  ;;  %v4809_v41 = vadd.f32 %v4808_v39, %v4807_v36  ;;  %v4788_v42 = vpop.f32.mrb[30].mxu0  ;;  %v4810_v22 = vpop.f32.mrb[34].mxu1 }
 0x95a   :  { %v4789_v43 = vpop.f32.mrb[31].mxu0  ;;  %v4811_v44 = vpop.f32.mrb[35].mxu1 }
 0x95b   :  { %v4083_v45 = vadd.f32 %v4787_v40, %v4582_v37  ;;  %v4790_v46 = vadd.f32 %v4789_v43, %v4788_v42  ;;  %v4812_v47 = vadd.f32 %v4811_v44, %v4810_v22 }
 0x95d   :  { %v4086_v48 = vadd.f32 %v4790_v46, %v4582_v37  ;;  %v4124_v49 = vadd.f32 %v4809_v41, %v4083_v45 }
 0x95f   :  { %v4127_v52 = vadd.f32 %v4812_v47, %v4086_v48 }
 0x97a   :  { %v4164_v53 = vpop.f32.mrb[32].mxu0 }
 0x97b   :  { %v4165_v54 = vadd.f32 %v4164_v53, %v4124_v49  ;;  %v4920_v55 = vpop.f32.mrb[33].mxu0 }
 0x97c   :  { %v4167_v56 = vpop.f32.mrb[34].mxu0 }
 0x97d   :  { %4171 = vst [vmem:[#allocation19] sm:$0xff] %v4165_v54  ;;  %v4168_v57 = vadd.f32 %v4167_v56, %v4127_v52  ;;  %v4921_v58 = vpop.f32.mrb[35].mxu0 }
 0x97f   :  { %4172 = vst [vmem:[#allocation19 + $0x8] sm:$0xff] %v4168_v57 }
 0x980   :  { %5773 = shalt.err (!%p5770_p0)
}
 0x981   :  { %s5774_s4 = scalar_lea.hbm %s6197_s11, 256 }
 0x982   :  { %p5775_p1 = scmp.ne.s32.totalorder %s6197_s11, %s5774_s4  ;;  %p5778_p2 = scmp.lt.u32.totalorder %s5774_s4, %s6197_s11 }
 0x984   :  { %p5780_p3 = pnand %p5778_p2, %p5775_p1 }
 0x986   :  { %5783 = shalt.err (!%p5780_p3)
}
 0x987   :  { %4184 = dma.vmem_to_hbm [thread:$0]  %s4179_s3, 256, %s6197_s11, [#allocation4], %s5810_s0, %s5810_s0, %s5811_s17  }
 0x988   :  { %5796 = dma.done.wait [#allocation4], 256  }
 0x989   :  { %5797 = vsyncadd [#allocation4], 4294967040 }
 0x98a   :  { %4188 = vsyncpa [#allocation3], 1 }
 0x98b   :  { %4189 = vsyncpa [#allocation6], 1 }
 0x98c   :  { %4190 = vsyncpa [#allocation9], 1 }
 0x98d   :  { %4191 = vsyncpa [#allocation12], 1 }
 0x98e   :  { %4192 = vsyncpa [#allocation15], 1 }
 0x98f   :  { %4193 = vsyncpa [#allocation18], 1 }
 0x990   :  { %4194 = vsyncpa [#allocation4], 1 }

</bundles_post_ra>
